<compile_context>
chip_gen: v7x
topology: tpu7x:2x2x1
jax: 0.10.0
libtpu: 0.0.40
codegen_flags: <defaults>
</compile_context>

<pallas_src>
import functools

import jax
import jax.numpy as jnp
from jax.experimental import pallas as pl
from jax.experimental.pallas import tpu as pltpu


# --------------------------------------------------------------------------
# In-kernel helper: one pooled output row of (3x3 conv + bias + LeakyReLU + 2x2 maxpool)
# --------------------------------------------------------------------------
def _pooled_conv_row(xkw_ref, r0, w3, bias, wh, slope):
    """Conv rows r0 and r0+1 (taps kw-folded into K) + bias + LeakyReLU + 2x2 max-pool.

    xkw_ref : VMEM ref (rows, Wp, 3*Cin); xkw[r, c, kw*Cin+ci] = xpad[r, c+kw, ci].
    r0      : first conv row of this pooled row (= 2 * pooled_row_index), traced scalar.
    w3      : tuple of 3 values, each (3*Cin, Cout) (one per kh), loaded once per step.
    bias    : (1, Cout) value.
    Returns the pooled row, shape (wh, Cout) = (Wp // 2, Cout).
    """

    def acc(s0, s1, s2):
        a = jnp.dot(s0, w3[0], preferred_element_type=jnp.float32)
        a = a + jnp.dot(s1, w3[1], preferred_element_type=jnp.float32)
        a = a + jnp.dot(s2, w3[2], preferred_element_type=jnp.float32)
        return a

    m = None
    for p in (0, 1):  # output-column parity: the column half of the 2x2 pool
        slabs = [xkw_ref[r0 + j, pl.ds(p, wh, stride=2), :] for j in range(4)]
        mp = jnp.maximum(acc(slabs[0], slabs[1], slabs[2]),   # conv row r0
                         acc(slabs[1], slabs[2], slabs[3]))   # conv row r0 + 1
        m = mp if m is None else jnp.maximum(m, mp)
    m = m + bias
    # LeakyReLU commutes with max (slope > 0), so applying it after the pool is exact.
    return jnp.where(m > 0, m, slope * m)


# --------------------------------------------------------------------------
# Fused kernel: conv1 -> lrelu -> pool -> conv2 -> lrelu -> pool -> fc1 -> relu -> fc2
# --------------------------------------------------------------------------
def _custom_cnn_kernel(x_ref, w1_ref, b1_ref, w2_ref, b2_ref,
                       fw1_ref, fb1_ref, fw2_ref, fb2_ref,
                       o_ref,
                       xkw1_ref, xkw2_ref, feat_ref,
                       *, H, W, C1, C2, HD, NB, slope):
    H1h, W1h = H // 2, W // 2          # conv1 pooled dims == conv2 input dims
    H2h, W2h = H1h // 2, W1h // 2      # conv2 pooled dims
    SP = H2h * W2h                     # spatial positions after conv2 pooling

    # Hoist weight / bias loads out of all loops (they stay in vregs for the grid step).
    w1 = tuple(w1_ref[k] for k in range(3))     # each (3*1,  C1)
    w2 = tuple(w2_ref[k] for k in range(3))     # each (3*C1, C2)
    b1 = b1_ref[...]                            # (1, C1)
    b2 = b2_ref[...]                            # (1, C2)

    # Zero the kw-folded scratches once: positions never written below are exactly the
    # conv zero-padding halo, so they stay correct for every sample in the block.
    xkw1_ref[...] = jnp.zeros_like(xkw1_ref)
    xkw2_ref[...] = jnp.zeros_like(xkw2_ref)

    for s in range(NB):                # static loop over the (small) batch block
        # ---- build xkw1[r, c, kw] = xpad1[r, c+kw]  (layer-1 input, kw folded on lanes)
        xkw1_ref[1:H + 1, 1:W,     0:1] = x_ref[s, :, 0:W - 1, :]
        xkw1_ref[1:H + 1, 0:W,     1:2] = x_ref[s, :, :,       :]
        xkw1_ref[1:H + 1, 0:W - 1, 2:3] = x_ref[s, :, 1:W,     :]

        # ---- conv1 + LeakyReLU + pool; pooled rows are scattered straight into xkw2 ----
        @pl.loop(0, H1h)
        def _(ph):
            y = _pooled_conv_row(xkw1_ref, 2 * ph, w1, b1, W1h, slope)     # (W1h, C1)
            # xkw2[r, c, kw*C1+ci] = pool1_pad[r, c+kw, ci], written at row r = ph + 1
            xkw2_ref[ph + 1, 1:W1h,     0:C1]          = y[0:W1h - 1, :]
            xkw2_ref[ph + 1, 0:W1h,     C1:2 * C1]     = y
            xkw2_ref[ph + 1, 0:W1h - 1, 2 * C1:3 * C1] = y[1:W1h, :]

        # ---- conv2 + LeakyReLU + pool -> flattened per-sample features ----
        @pl.loop(0, H2h)
        def _(ph):
            y = _pooled_conv_row(xkw2_ref, 2 * ph, w2, b2, W2h, slope)     # (W2h, C2)
            row0 = pl.multiple_of(s * SP + ph * W2h, W2h)
            feat_ref[pl.ds(row0, W2h), :] = y          # rows = s*SP + ph*W2h + [0, W2h)

    # ---- fc1 -> ReLU -> fc2 over the whole batch block (weights VMEM-resident) ----
    # feat row (n*SP + sp) holds channels for sample n at spatial position sp, so the
    # stride-SP gather below assembles the (NB, C2) operand for each spatial position.
    h = jnp.zeros((NB, HD), jnp.float32)
    for sp in range(SP):
        fsl = feat_ref[pl.ds(sp, NB, stride=SP), :]                        # (NB, C2)
        h = h + jnp.dot(fsl, fw1_ref[sp], preferred_element_type=jnp.float32)
    h = jnp.maximum(h + fb1_ref[...], 0.0)                                 # fc1 + ReLU
    out = jnp.dot(h, fw2_ref[...], preferred_element_type=jnp.float32) + fb2_ref[...]
    o_ref[...] = out.astype(o_ref.dtype)


# --------------------------------------------------------------------------
# Wrapper (matches CustomCNN.forward); params use PyTorch layouts.
# --------------------------------------------------------------------------
def custom_cnn_forward(x_nchw, params, *, slope=0.01, block_batch=8):
    N, Cin, H, W = x_nchw.shape
    assert Cin == 1 and H % 4 == 0 and W % 4 == 0
    C1 = params["conv1_w"].shape[0]
    C2 = params["conv2_w"].shape[0]
    HD, F = params["fc1_w"].shape
    NC = params["fc2_w"].shape[0]
    H1h, W1h = H // 2, W // 2
    H2h, W2h = H1h // 2, W1h // 2
    assert F == C2 * H2h * W2h, "fc1 in-features must equal 32*(H/4)*(W/4)"

    NB = min(N, block_batch)           # batch block per grid step
    assert N % NB == 0

    f32 = jnp.float32
    # One-time layout plumbing on the (tiny) parameters; in real use this is done at init.
    #   conv weights (Cout, Cin, 3, 3) -> (kh, 3*Cin [kw-major], Cout)
    w1t = jnp.transpose(params["conv1_w"], (2, 3, 1, 0)).reshape(3, 3 * Cin, C1).astype(f32)
    w2t = jnp.transpose(params["conv2_w"], (2, 3, 1, 0)).reshape(3, 3 * C1, C2).astype(f32)
    #   fc1 (HD, C*H*W in PyTorch (c,h,w) order) -> (h*W2h+w, c, HD) so the kernel's
    #   natural (h, w, c) flatten matches x.view(-1, num_flat_features(x)).
    fw1t = jnp.transpose(params["fc1_w"].reshape(HD, C2, H2h, W2h),
                         (2, 3, 1, 0)).reshape(H2h * W2h, C2, HD).astype(f32)
    fw2t = jnp.transpose(params["fc2_w"], (1, 0)).astype(f32)              # (HD, NC)
    b1t = params["conv1_b"].reshape(1, C1).astype(f32)
    b2t = params["conv2_b"].reshape(1, C2).astype(f32)
    fb1t = params["fc1_b"].reshape(1, HD).astype(f32)
    fb2t = params["fc2_b"].reshape(1, NC).astype(f32)

    # NCHW with Cin == 1 -> NHWC is a pure reshape (no HBM data movement).
    x4 = x_nchw.reshape(N, H, W, 1).astype(f32)

    kernel = functools.partial(_custom_cnn_kernel, H=H, W=W, C1=C1, C2=C2,
                               HD=HD, NB=NB, slope=slope)

    # NOTE: for v5e one could cast the dot operands to bf16 (keeping f32 accumulation)
    # for ~2x MXU rate; kept f32 here to preserve the reference numerics exactly.
    return pl.pallas_call(
        kernel,
        out_shape=jax.ShapeDtypeStruct((N, NC), jnp.float32),
        grid_spec=pltpu.PrefetchScalarGridSpec(
            num_scalar_prefetch=0,
            grid=(N // NB,),
            in_specs=[
                pl.BlockSpec((NB, H, W, 1), lambda i: (i, 0, 0, 0)),
                pl.BlockSpec((3, 3 * Cin, C1), lambda i: (0, 0, 0)),
                pl.BlockSpec((1, C1), lambda i: (0, 0)),
                pl.BlockSpec((3, 3 * C1, C2), lambda i: (0, 0, 0)),
                pl.BlockSpec((1, C2), lambda i: (0, 0)),
                pl.BlockSpec((H2h * W2h, C2, HD), lambda i: (0, 0, 0)),
                pl.BlockSpec((1, HD), lambda i: (0, 0)),
                pl.BlockSpec((HD, NC), lambda i: (0, 0)),
                pl.BlockSpec((1, NC), lambda i: (0, 0)),
            ],
            out_specs=pl.BlockSpec((NB, NC), lambda i: (i, 0)),
            scratch_shapes=[
                pltpu.VMEM((H + 2, W, 3 * Cin), jnp.float32),      # kw-folded conv1 input
                pltpu.VMEM((H1h + 2, W1h, 3 * C1), jnp.float32),   # kw-folded conv2 input
                pltpu.VMEM((NB * H2h * W2h, C2), jnp.float32),     # flattened features
            ],
        ),
        compiler_params=pltpu.CompilerParams(dimension_semantics=("parallel",)),
    )(x4, w1t, b1t, w2t, b2t, fw1t, fb1t, fw2t, fb2t)


# --------------------------------------------------------------------------
# Pure-JAX reference (same math as the PyTorch module), used for a self-check.
# --------------------------------------------------------------------------
def _reference_forward(x, p, slope=0.01):
    hp = jax.lax.Precision.HIGHEST

    def conv(z, w, b):
        y = jax.lax.conv_general_dilated(z, w, (1, 1), ((1, 1), (1, 1)),
                                         dimension_numbers=("NCHW", "OIHW", "NCHW"),
                                         precision=hp)
        return y + b[None, :, None, None]

    def lrelu(z):
        return jnp.where(z > 0, z, slope * z)

    def pool(z):
        return jax.lax.reduce_window(z, -jnp.inf, jax.lax.max,
                                     (1, 1, 2, 2), (1, 1, 2, 2), "VALID")

    y = pool(lrelu(conv(x, p["conv1_w"], p["conv1_b"])))
    y = pool(lrelu(conv(y, p["conv2_w"], p["conv2_b"])))
    y = y.reshape(y.shape[0], -1)
    y = jnp.maximum(jnp.dot(y, p["fc1_w"].T, precision=hp) + p["fc1_b"], 0.0)
    return jnp.dot(y, p["fc2_w"].T, precision=hp) + p["fc2_b"]


if __name__ == "__main__":
    N, Cin, H, W = 2, 1, 16, 16
    num_classes = 10
    flat_features = 32 * (H // 4) * (W // 4)

    key = jax.random.PRNGKey(0)
    ks = jax.random.split(key, 9)
    scale = 0.05
    params = {
        "conv1_w": scale * jax.random.normal(ks[0], (16, 1, 3, 3), jnp.float32),
        "conv1_b": scale * jax.random.normal(ks[1], (16,), jnp.float32),
        "conv2_w": scale * jax.random.normal(ks[2], (32, 16, 3, 3), jnp.float32),
        "conv2_b": scale * jax.random.normal(ks[3], (32,), jnp.float32),
        "fc1_w": scale * jax.random.normal(ks[4], (128, flat_features), jnp.float32),
        "fc1_b": scale * jax.random.normal(ks[5], (128,), jnp.float32),
        "fc2_w": scale * jax.random.normal(ks[6], (num_classes, 128), jnp.float32),
        "fc2_b": scale * jax.random.normal(ks[7], (num_classes,), jnp.float32),
    }
    x = jax.random.normal(ks[8], (N, Cin, H, W), jnp.float32)

    out = jax.jit(custom_cnn_forward)(x, params)
    out = jax.block_until_ready(out)
    assert out.shape == (N, num_classes)

    ref = _reference_forward(x, params)
    err = float(jnp.max(jnp.abs(out - ref)))
    assert jnp.allclose(out, ref, atol=3e-3, rtol=3e-2), f"mismatch vs reference: {err}"
    print("KERNEL_OK")
</pallas_src>

<mosaic_0001>
module attributes {stable_mosaic.version = 11 : i64} {
  func.func @_custom_cnn_kernel(%arg0: i32, %arg1: memref<2x16x16x1xf32, #tpu.memory_space<vmem>>, %arg2: memref<3x3x16xf32, #tpu.memory_space<vmem>>, %arg3: memref<1x16xf32, #tpu.memory_space<vmem>>, %arg4: memref<3x48x32xf32, #tpu.memory_space<vmem>>, %arg5: memref<1x32xf32, #tpu.memory_space<vmem>>, %arg6: memref<16x32x128xf32, #tpu.memory_space<vmem>>, %arg7: memref<1x128xf32, #tpu.memory_space<vmem>>, %arg8: memref<128x10xf32, #tpu.memory_space<vmem>>, %arg9: memref<1x10xf32, #tpu.memory_space<vmem>>, %arg10: memref<2x10xf32, #tpu.memory_space<vmem>>, %arg11: memref<18x16x3xf32, #tpu.memory_space<vmem>>, %arg12: memref<10x8x48xf32, #tpu.memory_space<vmem>>, %arg13: memref<32x32xf32, #tpu.memory_space<vmem>>) attributes {dimension_semantics = [#tpu.dimension_semantics<parallel>], iteration_bounds = array<i64: 1>, scalar_prefetch = 0 : i64, scratch_operands = 3 : i64, tpu.core_type = #tpu.core_type<tc>, window_params = [{transform_indices = @transform_0, window_bounds = array<i64: 2, 16, 16, 1>}, {pipeline_mode = #tpu.pipeline_mode<synchronous>, transform_indices = @transform_1, window_bounds = array<i64: 3, 3, 16>}, {pipeline_mode = #tpu.pipeline_mode<synchronous>, transform_indices = @transform_2, window_bounds = array<i64: 1, 16>}, {pipeline_mode = #tpu.pipeline_mode<synchronous>, transform_indices = @transform_3, window_bounds = array<i64: 3, 48, 32>}, {pipeline_mode = #tpu.pipeline_mode<synchronous>, transform_indices = @transform_4, window_bounds = array<i64: 1, 32>}, {pipeline_mode = #tpu.pipeline_mode<synchronous>, transform_indices = @transform_5, window_bounds = array<i64: 16, 32, 128>}, {pipeline_mode = #tpu.pipeline_mode<synchronous>, transform_indices = @transform_6, window_bounds = array<i64: 1, 128>}, {pipeline_mode = #tpu.pipeline_mode<synchronous>, transform_indices = @transform_7, window_bounds = array<i64: 128, 10>}, {pipeline_mode = #tpu.pipeline_mode<synchronous>, transform_indices = @transform_8, window_bounds = array<i64: 1, 10>}, {transform_indices = @transform_9, window_bounds = array<i64: 2, 10>}]} {
    %c0 = arith.constant 0 : index
    %c0_0 = arith.constant 0 : index
    %c0_1 = arith.constant 0 : index
    %0 = vector.load %arg2[%c0, %c0_0, %c0_1] : memref<3x3x16xf32, #tpu.memory_space<vmem>>, vector<1x3x16xf32>
    %1 = vector.shape_cast %0 : vector<1x3x16xf32> to vector<3x16xf32>
    %c1 = arith.constant 1 : index
    %c0_2 = arith.constant 0 : index
    %c0_3 = arith.constant 0 : index
    %2 = vector.load %arg2[%c1, %c0_2, %c0_3] : memref<3x3x16xf32, #tpu.memory_space<vmem>>, vector<1x3x16xf32>
    %3 = vector.shape_cast %2 : vector<1x3x16xf32> to vector<3x16xf32>
    %c2 = arith.constant 2 : index
    %c0_4 = arith.constant 0 : index
    %c0_5 = arith.constant 0 : index
    %4 = vector.load %arg2[%c2, %c0_4, %c0_5] : memref<3x3x16xf32, #tpu.memory_space<vmem>>, vector<1x3x16xf32>
    %5 = vector.shape_cast %4 : vector<1x3x16xf32> to vector<3x16xf32>
    %c0_6 = arith.constant 0 : index
    %c0_7 = arith.constant 0 : index
    %c0_8 = arith.constant 0 : index
    %6 = vector.load %arg4[%c0_6, %c0_7, %c0_8] : memref<3x48x32xf32, #tpu.memory_space<vmem>>, vector<1x48x32xf32>
    %7 = vector.shape_cast %6 : vector<1x48x32xf32> to vector<48x32xf32>
    %c1_9 = arith.constant 1 : index
    %c0_10 = arith.constant 0 : index
    %c0_11 = arith.constant 0 : index
    %8 = vector.load %arg4[%c1_9, %c0_10, %c0_11] : memref<3x48x32xf32, #tpu.memory_space<vmem>>, vector<1x48x32xf32>
    %9 = vector.shape_cast %8 : vector<1x48x32xf32> to vector<48x32xf32>
    %c2_12 = arith.constant 2 : index
    %c0_13 = arith.constant 0 : index
    %c0_14 = arith.constant 0 : index
    %10 = vector.load %arg4[%c2_12, %c0_13, %c0_14] : memref<3x48x32xf32, #tpu.memory_space<vmem>>, vector<1x48x32xf32>
    %11 = vector.shape_cast %10 : vector<1x48x32xf32> to vector<48x32xf32>
    %c0_15 = arith.constant 0 : index
    %c0_16 = arith.constant 0 : index
    %12 = vector.load %arg3[%c0_15, %c0_16] : memref<1x16xf32, #tpu.memory_space<vmem>>, vector<1x16xf32>
    %c0_17 = arith.constant 0 : index
    %c0_18 = arith.constant 0 : index
    %13 = vector.load %arg5[%c0_17, %c0_18] : memref<1x32xf32, #tpu.memory_space<vmem>>, vector<1x32xf32>
    %cst = arith.constant 0.000000e+00 : f32
    %14 = vector.broadcast %cst : f32 to vector<18x16x3xf32>
    %c0_19 = arith.constant 0 : index
    %c0_20 = arith.constant 0 : index
    %c0_21 = arith.constant 0 : index
    %15 = vector.load %arg11[%c0_19, %c0_20, %c0_21] : memref<18x16x3xf32, #tpu.memory_space<vmem>>, vector<18x16x3xf32>
    tpu.vector_store %arg11[%c0_19, %c0_20, %c0_21], %14 {strides = array<i32>} : memref<18x16x3xf32, #tpu.memory_space<vmem>>, vector<18x16x3xf32>,
    %cst_22 = arith.constant 0.000000e+00 : f32
    %16 = vector.broadcast %cst_22 : f32 to vector<10x8x48xf32>
    %c0_23 = arith.constant 0 : index
    %c0_24 = arith.constant 0 : index
    %c0_25 = arith.constant 0 : index
    %17 = vector.load %arg12[%c0_23, %c0_24, %c0_25] : memref<10x8x48xf32, #tpu.memory_space<vmem>>, vector<10x8x48xf32>
    tpu.vector_store %arg12[%c0_23, %c0_24, %c0_25], %16 {strides = array<i32>} : memref<10x8x48xf32, #tpu.memory_space<vmem>>, vector<10x8x48xf32>,
    %c0_26 = arith.constant 0 : index
    %c0_27 = arith.constant 0 : index
    %c0_28 = arith.constant 0 : index
    %c0_29 = arith.constant 0 : index
    %18 = vector.load %arg1[%c0_26, %c0_27, %c0_28, %c0_29] : memref<2x16x16x1xf32, #tpu.memory_space<vmem>>, vector<1x16x15x1xf32>
    %19 = vector.shape_cast %18 : vector<1x16x15x1xf32> to vector<16x15x1xf32>
    %c1_30 = arith.constant 1 : index
    %c1_31 = arith.constant 1 : index
    %c0_32 = arith.constant 0 : index
    %20 = vector.load %arg11[%c1_30, %c1_31, %c0_32] : memref<18x16x3xf32, #tpu.memory_space<vmem>>, vector<16x15x1xf32>
    tpu.vector_store %arg11[%c1_30, %c1_31, %c0_32], %19 {strides = array<i32>} : memref<18x16x3xf32, #tpu.memory_space<vmem>>, vector<16x15x1xf32>,
    %c0_33 = arith.constant 0 : index
    %c0_34 = arith.constant 0 : index
    %c0_35 = arith.constant 0 : index
    %c0_36 = arith.constant 0 : index
    %21 = vector.load %arg1[%c0_33, %c0_34, %c0_35, %c0_36] : memref<2x16x16x1xf32, #tpu.memory_space<vmem>>, vector<1x16x16x1xf32>
    %22 = vector.shape_cast %21 : vector<1x16x16x1xf32> to vector<16x16x1xf32>
    %c1_37 = arith.constant 1 : index
    %c0_38 = arith.constant 0 : index
    %c1_39 = arith.constant 1 : index
    %23 = vector.load %arg11[%c1_37, %c0_38, %c1_39] : memref<18x16x3xf32, #tpu.memory_space<vmem>>, vector<16x16x1xf32>
    tpu.vector_store %arg11[%c1_37, %c0_38, %c1_39], %22 {strides = array<i32>} : memref<18x16x3xf32, #tpu.memory_space<vmem>>, vector<16x16x1xf32>,
    %c0_40 = arith.constant 0 : index
    %c0_41 = arith.constant 0 : index
    %c1_42 = arith.constant 1 : index
    %c0_43 = arith.constant 0 : index
    %24 = vector.load %arg1[%c0_40, %c0_41, %c1_42, %c0_43] : memref<2x16x16x1xf32, #tpu.memory_space<vmem>>, vector<1x16x15x1xf32>
    %25 = vector.shape_cast %24 : vector<1x16x15x1xf32> to vector<16x15x1xf32>
    %c1_44 = arith.constant 1 : index
    %c0_45 = arith.constant 0 : index
    %c2_46 = arith.constant 2 : index
    %26 = vector.load %arg11[%c1_44, %c0_45, %c2_46] : memref<18x16x3xf32, #tpu.memory_space<vmem>>, vector<16x15x1xf32>
    tpu.vector_store %arg11[%c1_44, %c0_45, %c2_46], %25 {strides = array<i32>} : memref<18x16x3xf32, #tpu.memory_space<vmem>>, vector<16x15x1xf32>,
    %c0_i32 = arith.constant 0 : i32
    %c8_i32 = arith.constant 8 : i32
    %27 = arith.addi %c0_i32, %c8_i32 : i32
    %c1_i32 = arith.constant 1 : i32
    scf.for %arg14 = %c0_i32 to %27 step %c1_i32  : i32 {
      %c1_i32_174 = arith.constant 1 : i32
      %132 = arith.muli %arg14, %c1_i32_174 : i32
      %c0_i32_175 = arith.constant 0 : i32
      %133 = arith.addi %c0_i32_175, %132 : i32
      %c2_i32 = arith.constant 2 : i32
      %134 = arith.muli %c2_i32, %133 : i32
      %c0_i32_176 = arith.constant 0 : i32
      %135 = arith.addi %134, %c0_i32_176 : i32
      %136 = arith.index_cast %135 : i32 to index
      %c0_177 = arith.constant 0 : index
      %c0_178 = arith.constant 0 : index
      %137 = tpu.strided_load %arg11[%136, %c0_177, %c0_178] {strides = array<i32: 1, 2, 1>} : memref<18x16x3xf32, #tpu.memory_space<vmem>>, vector<1x8x3xf32>
      %138 = vector.shape_cast %137 : vector<1x8x3xf32> to vector<8x3xf32>
      %c1_i32_179 = arith.constant 1 : i32
      %139 = arith.addi %134, %c1_i32_179 : i32
      %140 = arith.index_cast %139 : i32 to index
      %c0_180 = arith.constant 0 : index
      %c0_181 = arith.constant 0 : index
      %141 = tpu.strided_load %arg11[%140, %c0_180, %c0_181] {strides = array<i32: 1, 2, 1>} : memref<18x16x3xf32, #tpu.memory_space<vmem>>, vector<1x8x3xf32>
      %142 = vector.shape_cast %141 : vector<1x8x3xf32> to vector<8x3xf32>
      %c2_i32_182 = arith.constant 2 : i32
      %143 = arith.addi %134, %c2_i32_182 : i32
      %144 = arith.index_cast %143 : i32 to index
      %c0_183 = arith.constant 0 : index
      %c0_184 = arith.constant 0 : index
      %145 = tpu.strided_load %arg11[%144, %c0_183, %c0_184] {strides = array<i32: 1, 2, 1>} : memref<18x16x3xf32, #tpu.memory_space<vmem>>, vector<1x8x3xf32>
      %146 = vector.shape_cast %145 : vector<1x8x3xf32> to vector<8x3xf32>
      %c3_i32 = arith.constant 3 : i32
      %147 = arith.addi %134, %c3_i32 : i32
      %148 = arith.index_cast %147 : i32 to index
      %c0_185 = arith.constant 0 : index
      %c0_186 = arith.constant 0 : index
      %149 = tpu.strided_load %arg11[%148, %c0_185, %c0_186] {strides = array<i32: 1, 2, 1>} : memref<18x16x3xf32, #tpu.memory_space<vmem>>, vector<1x8x3xf32>
      %150 = vector.shape_cast %149 : vector<1x8x3xf32> to vector<8x3xf32>
      %cst_187 = arith.constant dense<0.000000e+00> : vector<8x16xf32>
      %151 = tpu.matmul %138, %1, %cst_187 {dimension_numbers = #tpu.dot_dimension_numbers<[1], [0], [0], [1], [0, 0, 1, 1], [], []>} : vector<8x3xf32>, vector<3x16xf32>, vector<8x16xf32> -> vector<8x16xf32>
      %cst_188 = arith.constant dense<0.000000e+00> : vector<8x16xf32>
      %152 = tpu.matmul %142, %3, %cst_188 {dimension_numbers = #tpu.dot_dimension_numbers<[1], [0], [0], [1], [0, 0, 1, 1], [], []>} : vector<8x3xf32>, vector<3x16xf32>, vector<8x16xf32> -> vector<8x16xf32>
      %153 = arith.addf %151, %152 : vector<8x16xf32>
      %cst_189 = arith.constant dense<0.000000e+00> : vector<8x16xf32>
      %154 = tpu.matmul %146, %5, %cst_189 {dimension_numbers = #tpu.dot_dimension_numbers<[1], [0], [0], [1], [0, 0, 1, 1], [], []>} : vector<8x3xf32>, vector<3x16xf32>, vector<8x16xf32> -> vector<8x16xf32>
      %155 = arith.addf %153, %154 : vector<8x16xf32>
      %cst_190 = arith.constant dense<0.000000e+00> : vector<8x16xf32>
      %156 = tpu.matmul %142, %1, %cst_190 {dimension_numbers = #tpu.dot_dimension_numbers<[1], [0], [0], [1], [0, 0, 1, 1], [], []>} : vector<8x3xf32>, vector<3x16xf32>, vector<8x16xf32> -> vector<8x16xf32>
      %cst_191 = arith.constant dense<0.000000e+00> : vector<8x16xf32>
      %157 = tpu.matmul %146, %3, %cst_191 {dimension_numbers = #tpu.dot_dimension_numbers<[1], [0], [0], [1], [0, 0, 1, 1], [], []>} : vector<8x3xf32>, vector<3x16xf32>, vector<8x16xf32> -> vector<8x16xf32>
      %158 = arith.addf %156, %157 : vector<8x16xf32>
      %cst_192 = arith.constant dense<0.000000e+00> : vector<8x16xf32>
      %159 = tpu.matmul %150, %5, %cst_192 {dimension_numbers = #tpu.dot_dimension_numbers<[1], [0], [0], [1], [0, 0, 1, 1], [], []>} : vector<8x3xf32>, vector<3x16xf32>, vector<8x16xf32> -> vector<8x16xf32>
      %160 = arith.addf %158, %159 : vector<8x16xf32>
      %161 = arith.maximumf %155, %160 : vector<8x16xf32>
      %c0_i32_193 = arith.constant 0 : i32
      %162 = arith.addi %134, %c0_i32_193 : i32
      %163 = arith.index_cast %162 : i32 to index
      %c1_194 = arith.constant 1 : index
      %c0_195 = arith.constant 0 : index
      %164 = tpu.strided_load %arg11[%163, %c1_194, %c0_195] {strides = array<i32: 1, 2, 1>} : memref<18x16x3xf32, #tpu.memory_space<vmem>>, vector<1x8x3xf32>
      %165 = vector.shape_cast %164 : vector<1x8x3xf32> to vector<8x3xf32>
      %c1_i32_196 = arith.constant 1 : i32
      %166 = arith.addi %134, %c1_i32_196 : i32
      %167 = arith.index_cast %166 : i32 to index
      %c1_197 = arith.constant 1 : index
      %c0_198 = arith.constant 0 : index
      %168 = tpu.strided_load %arg11[%167, %c1_197, %c0_198] {strides = array<i32: 1, 2, 1>} : memref<18x16x3xf32, #tpu.memory_space<vmem>>, vector<1x8x3xf32>
      %169 = vector.shape_cast %168 : vector<1x8x3xf32> to vector<8x3xf32>
      %c2_i32_199 = arith.constant 2 : i32
      %170 = arith.addi %134, %c2_i32_199 : i32
      %171 = arith.index_cast %170 : i32 to index
      %c1_200 = arith.constant 1 : index
      %c0_201 = arith.constant 0 : index
      %172 = tpu.strided_load %arg11[%171, %c1_200, %c0_201] {strides = array<i32: 1, 2, 1>} : memref<18x16x3xf32, #tpu.memory_space<vmem>>, vector<1x8x3xf32>
      %173 = vector.shape_cast %172 : vector<1x8x3xf32> to vector<8x3xf32>
      %c3_i32_202 = arith.constant 3 : i32
      %174 = arith.addi %134, %c3_i32_202 : i32
      %175 = arith.index_cast %174 : i32 to index
      %c1_203 = arith.constant 1 : index
      %c0_204 = arith.constant 0 : index
      %176 = tpu.strided_load %arg11[%175, %c1_203, %c0_204] {strides = array<i32: 1, 2, 1>} : memref<18x16x3xf32, #tpu.memory_space<vmem>>, vector<1x8x3xf32>
      %177 = vector.shape_cast %176 : vector<1x8x3xf32> to vector<8x3xf32>
      %cst_205 = arith.constant dense<0.000000e+00> : vector<8x16xf32>
      %178 = tpu.matmul %165, %1, %cst_205 {dimension_numbers = #tpu.dot_dimension_numbers<[1], [0], [0], [1], [0, 0, 1, 1], [], []>} : vector<8x3xf32>, vector<3x16xf32>, vector<8x16xf32> -> vector<8x16xf32>
      %cst_206 = arith.constant dense<0.000000e+00> : vector<8x16xf32>
      %179 = tpu.matmul %169, %3, %cst_206 {dimension_numbers = #tpu.dot_dimension_numbers<[1], [0], [0], [1], [0, 0, 1, 1], [], []>} : vector<8x3xf32>, vector<3x16xf32>, vector<8x16xf32> -> vector<8x16xf32>
      %180 = arith.addf %178, %179 : vector<8x16xf32>
      %cst_207 = arith.constant dense<0.000000e+00> : vector<8x16xf32>
      %181 = tpu.matmul %173, %5, %cst_207 {dimension_numbers = #tpu.dot_dimension_numbers<[1], [0], [0], [1], [0, 0, 1, 1], [], []>} : vector<8x3xf32>, vector<3x16xf32>, vector<8x16xf32> -> vector<8x16xf32>
      %182 = arith.addf %180, %181 : vector<8x16xf32>
      %cst_208 = arith.constant dense<0.000000e+00> : vector<8x16xf32>
      %183 = tpu.matmul %169, %1, %cst_208 {dimension_numbers = #tpu.dot_dimension_numbers<[1], [0], [0], [1], [0, 0, 1, 1], [], []>} : vector<8x3xf32>, vector<3x16xf32>, vector<8x16xf32> -> vector<8x16xf32>
      %cst_209 = arith.constant dense<0.000000e+00> : vector<8x16xf32>
      %184 = tpu.matmul %173, %3, %cst_209 {dimension_numbers = #tpu.dot_dimension_numbers<[1], [0], [0], [1], [0, 0, 1, 1], [], []>} : vector<8x3xf32>, vector<3x16xf32>, vector<8x16xf32> -> vector<8x16xf32>
      %185 = arith.addf %183, %184 : vector<8x16xf32>
      %cst_210 = arith.constant dense<0.000000e+00> : vector<8x16xf32>
      %186 = tpu.matmul %177, %5, %cst_210 {dimension_numbers = #tpu.dot_dimension_numbers<[1], [0], [0], [1], [0, 0, 1, 1], [], []>} : vector<8x3xf32>, vector<3x16xf32>, vector<8x16xf32> -> vector<8x16xf32>
      %187 = arith.addf %185, %186 : vector<8x16xf32>
      %188 = arith.maximumf %182, %187 : vector<8x16xf32>
      %189 = arith.maximumf %161, %188 : vector<8x16xf32>
      %190 = vector.broadcast %12 : vector<1x16xf32> to vector<8x16xf32>
      %191 = arith.addf %189, %190 : vector<8x16xf32>
      %cst_211 = arith.constant 0.000000e+00 : f32
      %192 = vector.broadcast %cst_211 : f32 to vector<8x16xf32>
      %193 = arith.cmpf ogt, %191, %192 : vector<8x16xf32>
      %cst_212 = arith.constant 0.00999999977 : f32
      %194 = vector.broadcast %cst_212 : f32 to vector<8x16xf32>
      %195 = arith.mulf %194, %191 : vector<8x16xf32>
      %196 = arith.select %193, %191, %195 : vector<8x16xi1>, vector<8x16xf32>
      %197 = vector.extract_strided_slice %196 {offsets = [0, 0], sizes = [7, 16], strides = [1, 1]} : vector<8x16xf32> to vector<7x16xf32>
      %c1_i32_213 = arith.constant 1 : i32
      %198 = arith.addi %133, %c1_i32_213 : i32
      %199 = arith.index_cast %198 : i32 to index
      %c1_214 = arith.constant 1 : index
      %c0_215 = arith.constant 0 : index
      %200 = vector.load %arg12[%199, %c1_214, %c0_215] : memref<10x8x48xf32, #tpu.memory_space<vmem>>, vector<1x7x16xf32>
      %201 = vector.shape_cast %200 : vector<1x7x16xf32> to vector<7x16xf32>
      %202 = vector.shape_cast %197 : vector<7x16xf32> to vector<1x7x16xf32>
      tpu.vector_store %arg12[%199, %c1_214, %c0_215], %202 {strides = array<i32>} : memref<10x8x48xf32, #tpu.memory_space<vmem>>, vector<1x7x16xf32>,
      %c1_i32_216 = arith.constant 1 : i32
      %203 = arith.addi %133, %c1_i32_216 : i32
      %204 = arith.index_cast %203 : i32 to index
      %c0_217 = arith.constant 0 : index
      %c16 = arith.constant 16 : index
      %205 = vector.load %arg12[%204, %c0_217, %c16] : memref<10x8x48xf32, #tpu.memory_space<vmem>>, vector<1x8x16xf32>
      %206 = vector.shape_cast %205 : vector<1x8x16xf32> to vector<8x16xf32>
      %207 = vector.shape_cast %196 : vector<8x16xf32> to vector<1x8x16xf32>
      tpu.vector_store %arg12[%204, %c0_217, %c16], %207 {strides = array<i32>} : memref<10x8x48xf32, #tpu.memory_space<vmem>>, vector<1x8x16xf32>,
      %208 = vector.extract_strided_slice %196 {offsets = [1, 0], sizes = [7, 16], strides = [1, 1]} : vector<8x16xf32> to vector<7x16xf32>
      %c1_i32_218 = arith.constant 1 : i32
      %209 = arith.addi %133, %c1_i32_218 : i32
      %210 = arith.index_cast %209 : i32 to index
      %c0_219 = arith.constant 0 : index
      %c32 = arith.constant 32 : index
      %211 = vector.load %arg12[%210, %c0_219, %c32] : memref<10x8x48xf32, #tpu.memory_space<vmem>>, vector<1x7x16xf32>
      %212 = vector.shape_cast %211 : vector<1x7x16xf32> to vector<7x16xf32>
      %213 = vector.shape_cast %208 : vector<7x16xf32> to vector<1x7x16xf32>
      tpu.vector_store %arg12[%210, %c0_219, %c32], %213 {strides = array<i32>} : memref<10x8x48xf32, #tpu.memory_space<vmem>>, vector<1x7x16xf32>,
    }
    %c8_i32_47 = arith.constant 8 : i32
    %c0_i32_48 = arith.constant 0 : i32
    %c4_i32 = arith.constant 4 : i32
    %28 = arith.addi %c0_i32_48, %c4_i32 : i32
    %c1_i32_49 = arith.constant 1 : i32
    scf.for %arg14 = %c0_i32_48 to %28 step %c1_i32_49  : i32 {
      %c1_i32_174 = arith.constant 1 : i32
      %132 = arith.muli %arg14, %c1_i32_174 : i32
      %c0_i32_175 = arith.constant 0 : i32
      %133 = arith.addi %c0_i32_175, %132 : i32
      %c2_i32 = arith.constant 2 : i32
      %134 = arith.muli %c2_i32, %133 : i32
      %c0_i32_176 = arith.constant 0 : i32
      %135 = arith.addi %134, %c0_i32_176 : i32
      %136 = arith.index_cast %135 : i32 to index
      %c0_177 = arith.constant 0 : index
      %c0_178 = arith.constant 0 : index
      %137 = tpu.strided_load %arg12[%136, %c0_177, %c0_178] {strides = array<i32: 1, 2, 1>} : memref<10x8x48xf32, #tpu.memory_space<vmem>>, vector<1x4x48xf32>
      %138 = vector.shape_cast %137 : vector<1x4x48xf32> to vector<4x48xf32>
      %c1_i32_179 = arith.constant 1 : i32
      %139 = arith.addi %134, %c1_i32_179 : i32
      %140 = arith.index_cast %139 : i32 to index
      %c0_180 = arith.constant 0 : index
      %c0_181 = arith.constant 0 : index
      %141 = tpu.strided_load %arg12[%140, %c0_180, %c0_181] {strides = array<i32: 1, 2, 1>} : memref<10x8x48xf32, #tpu.memory_space<vmem>>, vector<1x4x48xf32>
      %142 = vector.shape_cast %141 : vector<1x4x48xf32> to vector<4x48xf32>
      %c2_i32_182 = arith.constant 2 : i32
      %143 = arith.addi %134, %c2_i32_182 : i32
      %144 = arith.index_cast %143 : i32 to index
      %c0_183 = arith.constant 0 : index
      %c0_184 = arith.constant 0 : index
      %145 = tpu.strided_load %arg12[%144, %c0_183, %c0_184] {strides = array<i32: 1, 2, 1>} : memref<10x8x48xf32, #tpu.memory_space<vmem>>, vector<1x4x48xf32>
      %146 = vector.shape_cast %145 : vector<1x4x48xf32> to vector<4x48xf32>
      %c3_i32 = arith.constant 3 : i32
      %147 = arith.addi %134, %c3_i32 : i32
      %148 = arith.index_cast %147 : i32 to index
      %c0_185 = arith.constant 0 : index
      %c0_186 = arith.constant 0 : index
      %149 = tpu.strided_load %arg12[%148, %c0_185, %c0_186] {strides = array<i32: 1, 2, 1>} : memref<10x8x48xf32, #tpu.memory_space<vmem>>, vector<1x4x48xf32>
      %150 = vector.shape_cast %149 : vector<1x4x48xf32> to vector<4x48xf32>
      %cst_187 = arith.constant dense<0.000000e+00> : vector<4x32xf32>
      %151 = tpu.matmul %138, %7, %cst_187 {dimension_numbers = #tpu.dot_dimension_numbers<[1], [0], [0], [1], [0, 0, 1, 1], [], []>} : vector<4x48xf32>, vector<48x32xf32>, vector<4x32xf32> -> vector<4x32xf32>
      %cst_188 = arith.constant dense<0.000000e+00> : vector<4x32xf32>
      %152 = tpu.matmul %142, %9, %cst_188 {dimension_numbers = #tpu.dot_dimension_numbers<[1], [0], [0], [1], [0, 0, 1, 1], [], []>} : vector<4x48xf32>, vector<48x32xf32>, vector<4x32xf32> -> vector<4x32xf32>
      %153 = arith.addf %151, %152 : vector<4x32xf32>
      %cst_189 = arith.constant dense<0.000000e+00> : vector<4x32xf32>
      %154 = tpu.matmul %146, %11, %cst_189 {dimension_numbers = #tpu.dot_dimension_numbers<[1], [0], [0], [1], [0, 0, 1, 1], [], []>} : vector<4x48xf32>, vector<48x32xf32>, vector<4x32xf32> -> vector<4x32xf32>
      %155 = arith.addf %153, %154 : vector<4x32xf32>
      %cst_190 = arith.constant dense<0.000000e+00> : vector<4x32xf32>
      %156 = tpu.matmul %142, %7, %cst_190 {dimension_numbers = #tpu.dot_dimension_numbers<[1], [0], [0], [1], [0, 0, 1, 1], [], []>} : vector<4x48xf32>, vector<48x32xf32>, vector<4x32xf32> -> vector<4x32xf32>
      %cst_191 = arith.constant dense<0.000000e+00> : vector<4x32xf32>
      %157 = tpu.matmul %146, %9, %cst_191 {dimension_numbers = #tpu.dot_dimension_numbers<[1], [0], [0], [1], [0, 0, 1, 1], [], []>} : vector<4x48xf32>, vector<48x32xf32>, vector<4x32xf32> -> vector<4x32xf32>
      %158 = arith.addf %156, %157 : vector<4x32xf32>
      %cst_192 = arith.constant dense<0.000000e+00> : vector<4x32xf32>
      %159 = tpu.matmul %150, %11, %cst_192 {dimension_numbers = #tpu.dot_dimension_numbers<[1], [0], [0], [1], [0, 0, 1, 1], [], []>} : vector<4x48xf32>, vector<48x32xf32>, vector<4x32xf32> -> vector<4x32xf32>
      %160 = arith.addf %158, %159 : vector<4x32xf32>
      %161 = arith.maximumf %155, %160 : vector<4x32xf32>
      %c0_i32_193 = arith.constant 0 : i32
      %162 = arith.addi %134, %c0_i32_193 : i32
      %163 = arith.index_cast %162 : i32 to index
      %c1_194 = arith.constant 1 : index
      %c0_195 = arith.constant 0 : index
      %164 = tpu.strided_load %arg12[%163, %c1_194, %c0_195] {strides = array<i32: 1, 2, 1>} : memref<10x8x48xf32, #tpu.memory_space<vmem>>, vector<1x4x48xf32>
      %165 = vector.shape_cast %164 : vector<1x4x48xf32> to vector<4x48xf32>
      %c1_i32_196 = arith.constant 1 : i32
      %166 = arith.addi %134, %c1_i32_196 : i32
      %167 = arith.index_cast %166 : i32 to index
      %c1_197 = arith.constant 1 : index
      %c0_198 = arith.constant 0 : index
      %168 = tpu.strided_load %arg12[%167, %c1_197, %c0_198] {strides = array<i32: 1, 2, 1>} : memref<10x8x48xf32, #tpu.memory_space<vmem>>, vector<1x4x48xf32>
      %169 = vector.shape_cast %168 : vector<1x4x48xf32> to vector<4x48xf32>
      %c2_i32_199 = arith.constant 2 : i32
      %170 = arith.addi %134, %c2_i32_199 : i32
      %171 = arith.index_cast %170 : i32 to index
      %c1_200 = arith.constant 1 : index
      %c0_201 = arith.constant 0 : index
      %172 = tpu.strided_load %arg12[%171, %c1_200, %c0_201] {strides = array<i32: 1, 2, 1>} : memref<10x8x48xf32, #tpu.memory_space<vmem>>, vector<1x4x48xf32>
      %173 = vector.shape_cast %172 : vector<1x4x48xf32> to vector<4x48xf32>
      %c3_i32_202 = arith.constant 3 : i32
      %174 = arith.addi %134, %c3_i32_202 : i32
      %175 = arith.index_cast %174 : i32 to index
      %c1_203 = arith.constant 1 : index
      %c0_204 = arith.constant 0 : index
      %176 = tpu.strided_load %arg12[%175, %c1_203, %c0_204] {strides = array<i32: 1, 2, 1>} : memref<10x8x48xf32, #tpu.memory_space<vmem>>, vector<1x4x48xf32>
      %177 = vector.shape_cast %176 : vector<1x4x48xf32> to vector<4x48xf32>
      %cst_205 = arith.constant dense<0.000000e+00> : vector<4x32xf32>
      %178 = tpu.matmul %165, %7, %cst_205 {dimension_numbers = #tpu.dot_dimension_numbers<[1], [0], [0], [1], [0, 0, 1, 1], [], []>} : vector<4x48xf32>, vector<48x32xf32>, vector<4x32xf32> -> vector<4x32xf32>
      %cst_206 = arith.constant dense<0.000000e+00> : vector<4x32xf32>
      %179 = tpu.matmul %169, %9, %cst_206 {dimension_numbers = #tpu.dot_dimension_numbers<[1], [0], [0], [1], [0, 0, 1, 1], [], []>} : vector<4x48xf32>, vector<48x32xf32>, vector<4x32xf32> -> vector<4x32xf32>
      %180 = arith.addf %178, %179 : vector<4x32xf32>
      %cst_207 = arith.constant dense<0.000000e+00> : vector<4x32xf32>
      %181 = tpu.matmul %173, %11, %cst_207 {dimension_numbers = #tpu.dot_dimension_numbers<[1], [0], [0], [1], [0, 0, 1, 1], [], []>} : vector<4x48xf32>, vector<48x32xf32>, vector<4x32xf32> -> vector<4x32xf32>
      %182 = arith.addf %180, %181 : vector<4x32xf32>
      %cst_208 = arith.constant dense<0.000000e+00> : vector<4x32xf32>
      %183 = tpu.matmul %169, %7, %cst_208 {dimension_numbers = #tpu.dot_dimension_numbers<[1], [0], [0], [1], [0, 0, 1, 1], [], []>} : vector<4x48xf32>, vector<48x32xf32>, vector<4x32xf32> -> vector<4x32xf32>
      %cst_209 = arith.constant dense<0.000000e+00> : vector<4x32xf32>
      %184 = tpu.matmul %173, %9, %cst_209 {dimension_numbers = #tpu.dot_dimension_numbers<[1], [0], [0], [1], [0, 0, 1, 1], [], []>} : vector<4x48xf32>, vector<48x32xf32>, vector<4x32xf32> -> vector<4x32xf32>
      %185 = arith.addf %183, %184 : vector<4x32xf32>
      %cst_210 = arith.constant dense<0.000000e+00> : vector<4x32xf32>
      %186 = tpu.matmul %177, %11, %cst_210 {dimension_numbers = #tpu.dot_dimension_numbers<[1], [0], [0], [1], [0, 0, 1, 1], [], []>} : vector<4x48xf32>, vector<48x32xf32>, vector<4x32xf32> -> vector<4x32xf32>
      %187 = arith.addf %185, %186 : vector<4x32xf32>
      %188 = arith.maximumf %182, %187 : vector<4x32xf32>
      %189 = arith.maximumf %161, %188 : vector<4x32xf32>
      %190 = vector.broadcast %13 : vector<1x32xf32> to vector<4x32xf32>
      %191 = arith.addf %189, %190 : vector<4x32xf32>
      %cst_211 = arith.constant 0.000000e+00 : f32
      %192 = vector.broadcast %cst_211 : f32 to vector<4x32xf32>
      %193 = arith.cmpf ogt, %191, %192 : vector<4x32xf32>
      %cst_212 = arith.constant 0.00999999977 : f32
      %194 = vector.broadcast %cst_212 : f32 to vector<4x32xf32>
      %195 = arith.mulf %194, %191 : vector<4x32xf32>
      %196 = arith.select %193, %191, %195 : vector<4x32xi1>, vector<4x32xf32>
      %c4_i32_213 = arith.constant 4 : i32
      %197 = arith.muli %133, %c4_i32_213 : i32
      %c0_i32_214 = arith.constant 0 : i32
      %198 = arith.addi %c0_i32_214, %197 : i32
      %199 = tpu.assume_multiple %198, 4 : i32
      %200 = arith.index_cast %199 : i32 to index
      %c0_215 = arith.constant 0 : index
      %201 = vector.load %arg13[%200, %c0_215] : memref<32x32xf32, #tpu.memory_space<vmem>>, vector<4x32xf32>
      tpu.vector_store %arg13[%200, %c0_215], %196 {strides = array<i32>} : memref<32x32xf32, #tpu.memory_space<vmem>>, vector<4x32xf32>,
    }
    %c4_i32_50 = arith.constant 4 : i32
    %c1_51 = arith.constant 1 : index
    %c0_52 = arith.constant 0 : index
    %c0_53 = arith.constant 0 : index
    %c0_54 = arith.constant 0 : index
    %29 = vector.load %arg1[%c1_51, %c0_52, %c0_53, %c0_54] : memref<2x16x16x1xf32, #tpu.memory_space<vmem>>, vector<1x16x15x1xf32>
    %30 = vector.shape_cast %29 : vector<1x16x15x1xf32> to vector<16x15x1xf32>
    %c1_55 = arith.constant 1 : index
    %c1_56 = arith.constant 1 : index
    %c0_57 = arith.constant 0 : index
    %31 = vector.load %arg11[%c1_55, %c1_56, %c0_57] : memref<18x16x3xf32, #tpu.memory_space<vmem>>, vector<16x15x1xf32>
    tpu.vector_store %arg11[%c1_55, %c1_56, %c0_57], %30 {strides = array<i32>} : memref<18x16x3xf32, #tpu.memory_space<vmem>>, vector<16x15x1xf32>,
    %c1_58 = arith.constant 1 : index
    %c0_59 = arith.constant 0 : index
    %c0_60 = arith.constant 0 : index
    %c0_61 = arith.constant 0 : index
    %32 = vector.load %arg1[%c1_58, %c0_59, %c0_60, %c0_61] : memref<2x16x16x1xf32, #tpu.memory_space<vmem>>, vector<1x16x16x1xf32>
    %33 = vector.shape_cast %32 : vector<1x16x16x1xf32> to vector<16x16x1xf32>
    %c1_62 = arith.constant 1 : index
    %c0_63 = arith.constant 0 : index
    %c1_64 = arith.constant 1 : index
    %34 = vector.load %arg11[%c1_62, %c0_63, %c1_64] : memref<18x16x3xf32, #tpu.memory_space<vmem>>, vector<16x16x1xf32>
    tpu.vector_store %arg11[%c1_62, %c0_63, %c1_64], %33 {strides = array<i32>} : memref<18x16x3xf32, #tpu.memory_space<vmem>>, vector<16x16x1xf32>,
    %c1_65 = arith.constant 1 : index
    %c0_66 = arith.constant 0 : index
    %c1_67 = arith.constant 1 : index
    %c0_68 = arith.constant 0 : index
    %35 = vector.load %arg1[%c1_65, %c0_66, %c1_67, %c0_68] : memref<2x16x16x1xf32, #tpu.memory_space<vmem>>, vector<1x16x15x1xf32>
    %36 = vector.shape_cast %35 : vector<1x16x15x1xf32> to vector<16x15x1xf32>
    %c1_69 = arith.constant 1 : index
    %c0_70 = arith.constant 0 : index
    %c2_71 = arith.constant 2 : index
    %37 = vector.load %arg11[%c1_69, %c0_70, %c2_71] : memref<18x16x3xf32, #tpu.memory_space<vmem>>, vector<16x15x1xf32>
    tpu.vector_store %arg11[%c1_69, %c0_70, %c2_71], %36 {strides = array<i32>} : memref<18x16x3xf32, #tpu.memory_space<vmem>>, vector<16x15x1xf32>,
    %c0_i32_72 = arith.constant 0 : i32
    %c8_i32_73 = arith.constant 8 : i32
    %38 = arith.addi %c0_i32_72, %c8_i32_73 : i32
    %c1_i32_74 = arith.constant 1 : i32
    scf.for %arg14 = %c0_i32_72 to %38 step %c1_i32_74  : i32 {
      %c1_i32_174 = arith.constant 1 : i32
      %132 = arith.muli %arg14, %c1_i32_174 : i32
      %c0_i32_175 = arith.constant 0 : i32
      %133 = arith.addi %c0_i32_175, %132 : i32
      %c2_i32 = arith.constant 2 : i32
      %134 = arith.muli %c2_i32, %133 : i32
      %c0_i32_176 = arith.constant 0 : i32
      %135 = arith.addi %134, %c0_i32_176 : i32
      %136 = arith.index_cast %135 : i32 to index
      %c0_177 = arith.constant 0 : index
      %c0_178 = arith.constant 0 : index
      %137 = tpu.strided_load %arg11[%136, %c0_177, %c0_178] {strides = array<i32: 1, 2, 1>} : memref<18x16x3xf32, #tpu.memory_space<vmem>>, vector<1x8x3xf32>
      %138 = vector.shape_cast %137 : vector<1x8x3xf32> to vector<8x3xf32>
      %c1_i32_179 = arith.constant 1 : i32
      %139 = arith.addi %134, %c1_i32_179 : i32
      %140 = arith.index_cast %139 : i32 to index
      %c0_180 = arith.constant 0 : index
      %c0_181 = arith.constant 0 : index
      %141 = tpu.strided_load %arg11[%140, %c0_180, %c0_181] {strides = array<i32: 1, 2, 1>} : memref<18x16x3xf32, #tpu.memory_space<vmem>>, vector<1x8x3xf32>
      %142 = vector.shape_cast %141 : vector<1x8x3xf32> to vector<8x3xf32>
      %c2_i32_182 = arith.constant 2 : i32
      %143 = arith.addi %134, %c2_i32_182 : i32
      %144 = arith.index_cast %143 : i32 to index
      %c0_183 = arith.constant 0 : index
      %c0_184 = arith.constant 0 : index
      %145 = tpu.strided_load %arg11[%144, %c0_183, %c0_184] {strides = array<i32: 1, 2, 1>} : memref<18x16x3xf32, #tpu.memory_space<vmem>>, vector<1x8x3xf32>
      %146 = vector.shape_cast %145 : vector<1x8x3xf32> to vector<8x3xf32>
      %c3_i32 = arith.constant 3 : i32
      %147 = arith.addi %134, %c3_i32 : i32
      %148 = arith.index_cast %147 : i32 to index
      %c0_185 = arith.constant 0 : index
      %c0_186 = arith.constant 0 : index
      %149 = tpu.strided_load %arg11[%148, %c0_185, %c0_186] {strides = array<i32: 1, 2, 1>} : memref<18x16x3xf32, #tpu.memory_space<vmem>>, vector<1x8x3xf32>
      %150 = vector.shape_cast %149 : vector<1x8x3xf32> to vector<8x3xf32>
      %cst_187 = arith.constant dense<0.000000e+00> : vector<8x16xf32>
      %151 = tpu.matmul %138, %1, %cst_187 {dimension_numbers = #tpu.dot_dimension_numbers<[1], [0], [0], [1], [0, 0, 1, 1], [], []>} : vector<8x3xf32>, vector<3x16xf32>, vector<8x16xf32> -> vector<8x16xf32>
      %cst_188 = arith.constant dense<0.000000e+00> : vector<8x16xf32>
      %152 = tpu.matmul %142, %3, %cst_188 {dimension_numbers = #tpu.dot_dimension_numbers<[1], [0], [0], [1], [0, 0, 1, 1], [], []>} : vector<8x3xf32>, vector<3x16xf32>, vector<8x16xf32> -> vector<8x16xf32>
      %153 = arith.addf %151, %152 : vector<8x16xf32>
      %cst_189 = arith.constant dense<0.000000e+00> : vector<8x16xf32>
      %154 = tpu.matmul %146, %5, %cst_189 {dimension_numbers = #tpu.dot_dimension_numbers<[1], [0], [0], [1], [0, 0, 1, 1], [], []>} : vector<8x3xf32>, vector<3x16xf32>, vector<8x16xf32> -> vector<8x16xf32>
      %155 = arith.addf %153, %154 : vector<8x16xf32>
      %cst_190 = arith.constant dense<0.000000e+00> : vector<8x16xf32>
      %156 = tpu.matmul %142, %1, %cst_190 {dimension_numbers = #tpu.dot_dimension_numbers<[1], [0], [0], [1], [0, 0, 1, 1], [], []>} : vector<8x3xf32>, vector<3x16xf32>, vector<8x16xf32> -> vector<8x16xf32>
      %cst_191 = arith.constant dense<0.000000e+00> : vector<8x16xf32>
      %157 = tpu.matmul %146, %3, %cst_191 {dimension_numbers = #tpu.dot_dimension_numbers<[1], [0], [0], [1], [0, 0, 1, 1], [], []>} : vector<8x3xf32>, vector<3x16xf32>, vector<8x16xf32> -> vector<8x16xf32>
      %158 = arith.addf %156, %157 : vector<8x16xf32>
      %cst_192 = arith.constant dense<0.000000e+00> : vector<8x16xf32>
      %159 = tpu.matmul %150, %5, %cst_192 {dimension_numbers = #tpu.dot_dimension_numbers<[1], [0], [0], [1], [0, 0, 1, 1], [], []>} : vector<8x3xf32>, vector<3x16xf32>, vector<8x16xf32> -> vector<8x16xf32>
      %160 = arith.addf %158, %159 : vector<8x16xf32>
      %161 = arith.maximumf %155, %160 : vector<8x16xf32>
      %c0_i32_193 = arith.constant 0 : i32
      %162 = arith.addi %134, %c0_i32_193 : i32
      %163 = arith.index_cast %162 : i32 to index
      %c1_194 = arith.constant 1 : index
      %c0_195 = arith.constant 0 : index
      %164 = tpu.strided_load %arg11[%163, %c1_194, %c0_195] {strides = array<i32: 1, 2, 1>} : memref<18x16x3xf32, #tpu.memory_space<vmem>>, vector<1x8x3xf32>
      %165 = vector.shape_cast %164 : vector<1x8x3xf32> to vector<8x3xf32>
      %c1_i32_196 = arith.constant 1 : i32
      %166 = arith.addi %134, %c1_i32_196 : i32
      %167 = arith.index_cast %166 : i32 to index
      %c1_197 = arith.constant 1 : index
      %c0_198 = arith.constant 0 : index
      %168 = tpu.strided_load %arg11[%167, %c1_197, %c0_198] {strides = array<i32: 1, 2, 1>} : memref<18x16x3xf32, #tpu.memory_space<vmem>>, vector<1x8x3xf32>
      %169 = vector.shape_cast %168 : vector<1x8x3xf32> to vector<8x3xf32>
      %c2_i32_199 = arith.constant 2 : i32
      %170 = arith.addi %134, %c2_i32_199 : i32
      %171 = arith.index_cast %170 : i32 to index
      %c1_200 = arith.constant 1 : index
      %c0_201 = arith.constant 0 : index
      %172 = tpu.strided_load %arg11[%171, %c1_200, %c0_201] {strides = array<i32: 1, 2, 1>} : memref<18x16x3xf32, #tpu.memory_space<vmem>>, vector<1x8x3xf32>
      %173 = vector.shape_cast %172 : vector<1x8x3xf32> to vector<8x3xf32>
      %c3_i32_202 = arith.constant 3 : i32
      %174 = arith.addi %134, %c3_i32_202 : i32
      %175 = arith.index_cast %174 : i32 to index
      %c1_203 = arith.constant 1 : index
      %c0_204 = arith.constant 0 : index
      %176 = tpu.strided_load %arg11[%175, %c1_203, %c0_204] {strides = array<i32: 1, 2, 1>} : memref<18x16x3xf32, #tpu.memory_space<vmem>>, vector<1x8x3xf32>
      %177 = vector.shape_cast %176 : vector<1x8x3xf32> to vector<8x3xf32>
      %cst_205 = arith.constant dense<0.000000e+00> : vector<8x16xf32>
      %178 = tpu.matmul %165, %1, %cst_205 {dimension_numbers = #tpu.dot_dimension_numbers<[1], [0], [0], [1], [0, 0, 1, 1], [], []>} : vector<8x3xf32>, vector<3x16xf32>, vector<8x16xf32> -> vector<8x16xf32>
      %cst_206 = arith.constant dense<0.000000e+00> : vector<8x16xf32>
      %179 = tpu.matmul %169, %3, %cst_206 {dimension_numbers = #tpu.dot_dimension_numbers<[1], [0], [0], [1], [0, 0, 1, 1], [], []>} : vector<8x3xf32>, vector<3x16xf32>, vector<8x16xf32> -> vector<8x16xf32>
      %180 = arith.addf %178, %179 : vector<8x16xf32>
      %cst_207 = arith.constant dense<0.000000e+00> : vector<8x16xf32>
      %181 = tpu.matmul %173, %5, %cst_207 {dimension_numbers = #tpu.dot_dimension_numbers<[1], [0], [0], [1], [0, 0, 1, 1], [], []>} : vector<8x3xf32>, vector<3x16xf32>, vector<8x16xf32> -> vector<8x16xf32>
      %182 = arith.addf %180, %181 : vector<8x16xf32>
      %cst_208 = arith.constant dense<0.000000e+00> : vector<8x16xf32>
      %183 = tpu.matmul %169, %1, %cst_208 {dimension_numbers = #tpu.dot_dimension_numbers<[1], [0], [0], [1], [0, 0, 1, 1], [], []>} : vector<8x3xf32>, vector<3x16xf32>, vector<8x16xf32> -> vector<8x16xf32>
      %cst_209 = arith.constant dense<0.000000e+00> : vector<8x16xf32>
      %184 = tpu.matmul %173, %3, %cst_209 {dimension_numbers = #tpu.dot_dimension_numbers<[1], [0], [0], [1], [0, 0, 1, 1], [], []>} : vector<8x3xf32>, vector<3x16xf32>, vector<8x16xf32> -> vector<8x16xf32>
      %185 = arith.addf %183, %184 : vector<8x16xf32>
      %cst_210 = arith.constant dense<0.000000e+00> : vector<8x16xf32>
      %186 = tpu.matmul %177, %5, %cst_210 {dimension_numbers = #tpu.dot_dimension_numbers<[1], [0], [0], [1], [0, 0, 1, 1], [], []>} : vector<8x3xf32>, vector<3x16xf32>, vector<8x16xf32> -> vector<8x16xf32>
      %187 = arith.addf %185, %186 : vector<8x16xf32>
      %188 = arith.maximumf %182, %187 : vector<8x16xf32>
      %189 = arith.maximumf %161, %188 : vector<8x16xf32>
      %190 = vector.broadcast %12 : vector<1x16xf32> to vector<8x16xf32>
      %191 = arith.addf %189, %190 : vector<8x16xf32>
      %cst_211 = arith.constant 0.000000e+00 : f32
      %192 = vector.broadcast %cst_211 : f32 to vector<8x16xf32>
      %193 = arith.cmpf ogt, %191, %192 : vector<8x16xf32>
      %cst_212 = arith.constant 0.00999999977 : f32
      %194 = vector.broadcast %cst_212 : f32 to vector<8x16xf32>
      %195 = arith.mulf %194, %191 : vector<8x16xf32>
      %196 = arith.select %193, %191, %195 : vector<8x16xi1>, vector<8x16xf32>
      %197 = vector.extract_strided_slice %196 {offsets = [0, 0], sizes = [7, 16], strides = [1, 1]} : vector<8x16xf32> to vector<7x16xf32>
      %c1_i32_213 = arith.constant 1 : i32
      %198 = arith.addi %133, %c1_i32_213 : i32
      %199 = arith.index_cast %198 : i32 to index
      %c1_214 = arith.constant 1 : index
      %c0_215 = arith.constant 0 : index
      %200 = vector.load %arg12[%199, %c1_214, %c0_215] : memref<10x8x48xf32, #tpu.memory_space<vmem>>, vector<1x7x16xf32>
      %201 = vector.shape_cast %200 : vector<1x7x16xf32> to vector<7x16xf32>
      %202 = vector.shape_cast %197 : vector<7x16xf32> to vector<1x7x16xf32>
      tpu.vector_store %arg12[%199, %c1_214, %c0_215], %202 {strides = array<i32>} : memref<10x8x48xf32, #tpu.memory_space<vmem>>, vector<1x7x16xf32>,
      %c1_i32_216 = arith.constant 1 : i32
      %203 = arith.addi %133, %c1_i32_216 : i32
      %204 = arith.index_cast %203 : i32 to index
      %c0_217 = arith.constant 0 : index
      %c16 = arith.constant 16 : index
      %205 = vector.load %arg12[%204, %c0_217, %c16] : memref<10x8x48xf32, #tpu.memory_space<vmem>>, vector<1x8x16xf32>
      %206 = vector.shape_cast %205 : vector<1x8x16xf32> to vector<8x16xf32>
      %207 = vector.shape_cast %196 : vector<8x16xf32> to vector<1x8x16xf32>
      tpu.vector_store %arg12[%204, %c0_217, %c16], %207 {strides = array<i32>} : memref<10x8x48xf32, #tpu.memory_space<vmem>>, vector<1x8x16xf32>,
      %208 = vector.extract_strided_slice %196 {offsets = [1, 0], sizes = [7, 16], strides = [1, 1]} : vector<8x16xf32> to vector<7x16xf32>
      %c1_i32_218 = arith.constant 1 : i32
      %209 = arith.addi %133, %c1_i32_218 : i32
      %210 = arith.index_cast %209 : i32 to index
      %c0_219 = arith.constant 0 : index
      %c32 = arith.constant 32 : index
      %211 = vector.load %arg12[%210, %c0_219, %c32] : memref<10x8x48xf32, #tpu.memory_space<vmem>>, vector<1x7x16xf32>
      %212 = vector.shape_cast %211 : vector<1x7x16xf32> to vector<7x16xf32>
      %213 = vector.shape_cast %208 : vector<7x16xf32> to vector<1x7x16xf32>
      tpu.vector_store %arg12[%210, %c0_219, %c32], %213 {strides = array<i32>} : memref<10x8x48xf32, #tpu.memory_space<vmem>>, vector<1x7x16xf32>,
    }
    %c8_i32_75 = arith.constant 8 : i32
    %c0_i32_76 = arith.constant 0 : i32
    %c4_i32_77 = arith.constant 4 : i32
    %39 = arith.addi %c0_i32_76, %c4_i32_77 : i32
    %c1_i32_78 = arith.constant 1 : i32
    scf.for %arg14 = %c0_i32_76 to %39 step %c1_i32_78  : i32 {
      %c1_i32_174 = arith.constant 1 : i32
      %132 = arith.muli %arg14, %c1_i32_174 : i32
      %c0_i32_175 = arith.constant 0 : i32
      %133 = arith.addi %c0_i32_175, %132 : i32
      %c2_i32 = arith.constant 2 : i32
      %134 = arith.muli %c2_i32, %133 : i32
      %c0_i32_176 = arith.constant 0 : i32
      %135 = arith.addi %134, %c0_i32_176 : i32
      %136 = arith.index_cast %135 : i32 to index
      %c0_177 = arith.constant 0 : index
      %c0_178 = arith.constant 0 : index
      %137 = tpu.strided_load %arg12[%136, %c0_177, %c0_178] {strides = array<i32: 1, 2, 1>} : memref<10x8x48xf32, #tpu.memory_space<vmem>>, vector<1x4x48xf32>
      %138 = vector.shape_cast %137 : vector<1x4x48xf32> to vector<4x48xf32>
      %c1_i32_179 = arith.constant 1 : i32
      %139 = arith.addi %134, %c1_i32_179 : i32
      %140 = arith.index_cast %139 : i32 to index
      %c0_180 = arith.constant 0 : index
      %c0_181 = arith.constant 0 : index
      %141 = tpu.strided_load %arg12[%140, %c0_180, %c0_181] {strides = array<i32: 1, 2, 1>} : memref<10x8x48xf32, #tpu.memory_space<vmem>>, vector<1x4x48xf32>
      %142 = vector.shape_cast %141 : vector<1x4x48xf32> to vector<4x48xf32>
      %c2_i32_182 = arith.constant 2 : i32
      %143 = arith.addi %134, %c2_i32_182 : i32
      %144 = arith.index_cast %143 : i32 to index
      %c0_183 = arith.constant 0 : index
      %c0_184 = arith.constant 0 : index
      %145 = tpu.strided_load %arg12[%144, %c0_183, %c0_184] {strides = array<i32: 1, 2, 1>} : memref<10x8x48xf32, #tpu.memory_space<vmem>>, vector<1x4x48xf32>
      %146 = vector.shape_cast %145 : vector<1x4x48xf32> to vector<4x48xf32>
      %c3_i32 = arith.constant 3 : i32
      %147 = arith.addi %134, %c3_i32 : i32
      %148 = arith.index_cast %147 : i32 to index
      %c0_185 = arith.constant 0 : index
      %c0_186 = arith.constant 0 : index
      %149 = tpu.strided_load %arg12[%148, %c0_185, %c0_186] {strides = array<i32: 1, 2, 1>} : memref<10x8x48xf32, #tpu.memory_space<vmem>>, vector<1x4x48xf32>
      %150 = vector.shape_cast %149 : vector<1x4x48xf32> to vector<4x48xf32>
      %cst_187 = arith.constant dense<0.000000e+00> : vector<4x32xf32>
      %151 = tpu.matmul %138, %7, %cst_187 {dimension_numbers = #tpu.dot_dimension_numbers<[1], [0], [0], [1], [0, 0, 1, 1], [], []>} : vector<4x48xf32>, vector<48x32xf32>, vector<4x32xf32> -> vector<4x32xf32>
      %cst_188 = arith.constant dense<0.000000e+00> : vector<4x32xf32>
      %152 = tpu.matmul %142, %9, %cst_188 {dimension_numbers = #tpu.dot_dimension_numbers<[1], [0], [0], [1], [0, 0, 1, 1], [], []>} : vector<4x48xf32>, vector<48x32xf32>, vector<4x32xf32> -> vector<4x32xf32>
      %153 = arith.addf %151, %152 : vector<4x32xf32>
      %cst_189 = arith.constant dense<0.000000e+00> : vector<4x32xf32>
      %154 = tpu.matmul %146, %11, %cst_189 {dimension_numbers = #tpu.dot_dimension_numbers<[1], [0], [0], [1], [0, 0, 1, 1], [], []>} : vector<4x48xf32>, vector<48x32xf32>, vector<4x32xf32> -> vector<4x32xf32>
      %155 = arith.addf %153, %154 : vector<4x32xf32>
      %cst_190 = arith.constant dense<0.000000e+00> : vector<4x32xf32>
      %156 = tpu.matmul %142, %7, %cst_190 {dimension_numbers = #tpu.dot_dimension_numbers<[1], [0], [0], [1], [0, 0, 1, 1], [], []>} : vector<4x48xf32>, vector<48x32xf32>, vector<4x32xf32> -> vector<4x32xf32>
      %cst_191 = arith.constant dense<0.000000e+00> : vector<4x32xf32>
      %157 = tpu.matmul %146, %9, %cst_191 {dimension_numbers = #tpu.dot_dimension_numbers<[1], [0], [0], [1], [0, 0, 1, 1], [], []>} : vector<4x48xf32>, vector<48x32xf32>, vector<4x32xf32> -> vector<4x32xf32>
      %158 = arith.addf %156, %157 : vector<4x32xf32>
      %cst_192 = arith.constant dense<0.000000e+00> : vector<4x32xf32>
      %159 = tpu.matmul %150, %11, %cst_192 {dimension_numbers = #tpu.dot_dimension_numbers<[1], [0], [0], [1], [0, 0, 1, 1], [], []>} : vector<4x48xf32>, vector<48x32xf32>, vector<4x32xf32> -> vector<4x32xf32>
      %160 = arith.addf %158, %159 : vector<4x32xf32>
      %161 = arith.maximumf %155, %160 : vector<4x32xf32>
      %c0_i32_193 = arith.constant 0 : i32
      %162 = arith.addi %134, %c0_i32_193 : i32
      %163 = arith.index_cast %162 : i32 to index
      %c1_194 = arith.constant 1 : index
      %c0_195 = arith.constant 0 : index
      %164 = tpu.strided_load %arg12[%163, %c1_194, %c0_195] {strides = array<i32: 1, 2, 1>} : memref<10x8x48xf32, #tpu.memory_space<vmem>>, vector<1x4x48xf32>
      %165 = vector.shape_cast %164 : vector<1x4x48xf32> to vector<4x48xf32>
      %c1_i32_196 = arith.constant 1 : i32
      %166 = arith.addi %134, %c1_i32_196 : i32
      %167 = arith.index_cast %166 : i32 to index
      %c1_197 = arith.constant 1 : index
      %c0_198 = arith.constant 0 : index
      %168 = tpu.strided_load %arg12[%167, %c1_197, %c0_198] {strides = array<i32: 1, 2, 1>} : memref<10x8x48xf32, #tpu.memory_space<vmem>>, vector<1x4x48xf32>
      %169 = vector.shape_cast %168 : vector<1x4x48xf32> to vector<4x48xf32>
      %c2_i32_199 = arith.constant 2 : i32
      %170 = arith.addi %134, %c2_i32_199 : i32
      %171 = arith.index_cast %170 : i32 to index
      %c1_200 = arith.constant 1 : index
      %c0_201 = arith.constant 0 : index
      %172 = tpu.strided_load %arg12[%171, %c1_200, %c0_201] {strides = array<i32: 1, 2, 1>} : memref<10x8x48xf32, #tpu.memory_space<vmem>>, vector<1x4x48xf32>
      %173 = vector.shape_cast %172 : vector<1x4x48xf32> to vector<4x48xf32>
      %c3_i32_202 = arith.constant 3 : i32
      %174 = arith.addi %134, %c3_i32_202 : i32
      %175 = arith.index_cast %174 : i32 to index
      %c1_203 = arith.constant 1 : index
      %c0_204 = arith.constant 0 : index
      %176 = tpu.strided_load %arg12[%175, %c1_203, %c0_204] {strides = array<i32: 1, 2, 1>} : memref<10x8x48xf32, #tpu.memory_space<vmem>>, vector<1x4x48xf32>
      %177 = vector.shape_cast %176 : vector<1x4x48xf32> to vector<4x48xf32>
      %cst_205 = arith.constant dense<0.000000e+00> : vector<4x32xf32>
      %178 = tpu.matmul %165, %7, %cst_205 {dimension_numbers = #tpu.dot_dimension_numbers<[1], [0], [0], [1], [0, 0, 1, 1], [], []>} : vector<4x48xf32>, vector<48x32xf32>, vector<4x32xf32> -> vector<4x32xf32>
      %cst_206 = arith.constant dense<0.000000e+00> : vector<4x32xf32>
      %179 = tpu.matmul %169, %9, %cst_206 {dimension_numbers = #tpu.dot_dimension_numbers<[1], [0], [0], [1], [0, 0, 1, 1], [], []>} : vector<4x48xf32>, vector<48x32xf32>, vector<4x32xf32> -> vector<4x32xf32>
      %180 = arith.addf %178, %179 : vector<4x32xf32>
      %cst_207 = arith.constant dense<0.000000e+00> : vector<4x32xf32>
      %181 = tpu.matmul %173, %11, %cst_207 {dimension_numbers = #tpu.dot_dimension_numbers<[1], [0], [0], [1], [0, 0, 1, 1], [], []>} : vector<4x48xf32>, vector<48x32xf32>, vector<4x32xf32> -> vector<4x32xf32>
      %182 = arith.addf %180, %181 : vector<4x32xf32>
      %cst_208 = arith.constant dense<0.000000e+00> : vector<4x32xf32>
      %183 = tpu.matmul %169, %7, %cst_208 {dimension_numbers = #tpu.dot_dimension_numbers<[1], [0], [0], [1], [0, 0, 1, 1], [], []>} : vector<4x48xf32>, vector<48x32xf32>, vector<4x32xf32> -> vector<4x32xf32>
      %cst_209 = arith.constant dense<0.000000e+00> : vector<4x32xf32>
      %184 = tpu.matmul %173, %9, %cst_209 {dimension_numbers = #tpu.dot_dimension_numbers<[1], [0], [0], [1], [0, 0, 1, 1], [], []>} : vector<4x48xf32>, vector<48x32xf32>, vector<4x32xf32> -> vector<4x32xf32>
      %185 = arith.addf %183, %184 : vector<4x32xf32>
      %cst_210 = arith.constant dense<0.000000e+00> : vector<4x32xf32>
      %186 = tpu.matmul %177, %11, %cst_210 {dimension_numbers = #tpu.dot_dimension_numbers<[1], [0], [0], [1], [0, 0, 1, 1], [], []>} : vector<4x48xf32>, vector<48x32xf32>, vector<4x32xf32> -> vector<4x32xf32>
      %187 = arith.addf %185, %186 : vector<4x32xf32>
      %188 = arith.maximumf %182, %187 : vector<4x32xf32>
      %189 = arith.maximumf %161, %188 : vector<4x32xf32>
      %190 = vector.broadcast %13 : vector<1x32xf32> to vector<4x32xf32>
      %191 = arith.addf %189, %190 : vector<4x32xf32>
      %cst_211 = arith.constant 0.000000e+00 : f32
      %192 = vector.broadcast %cst_211 : f32 to vector<4x32xf32>
      %193 = arith.cmpf ogt, %191, %192 : vector<4x32xf32>
      %cst_212 = arith.constant 0.00999999977 : f32
      %194 = vector.broadcast %cst_212 : f32 to vector<4x32xf32>
      %195 = arith.mulf %194, %191 : vector<4x32xf32>
      %196 = arith.select %193, %191, %195 : vector<4x32xi1>, vector<4x32xf32>
      %c4_i32_213 = arith.constant 4 : i32
      %197 = arith.muli %133, %c4_i32_213 : i32
      %c16_i32 = arith.constant 16 : i32
      %198 = arith.addi %c16_i32, %197 : i32
      %199 = tpu.assume_multiple %198, 4 : i32
      %200 = arith.index_cast %199 : i32 to index
      %c0_214 = arith.constant 0 : index
      %201 = vector.load %arg13[%200, %c0_214] : memref<32x32xf32, #tpu.memory_space<vmem>>, vector<4x32xf32>
      tpu.vector_store %arg13[%200, %c0_214], %196 {strides = array<i32>} : memref<32x32xf32, #tpu.memory_space<vmem>>, vector<4x32xf32>,
    }
    %c4_i32_79 = arith.constant 4 : i32
    %cst_80 = arith.constant 0.000000e+00 : f32
    %40 = vector.broadcast %cst_80 : f32 to vector<2x128xf32>
    %c0_81 = arith.constant 0 : index
    %c0_82 = arith.constant 0 : index
    %41 = tpu.strided_load %arg13[%c0_81, %c0_82] {strides = array<i32: 16, 1>} : memref<32x32xf32, #tpu.memory_space<vmem>>, vector<2x32xf32>
    %c0_83 = arith.constant 0 : index
    %c0_84 = arith.constant 0 : index
    %c0_85 = arith.constant 0 : index
    %42 = vector.load %arg6[%c0_83, %c0_84, %c0_85] : memref<16x32x128xf32, #tpu.memory_space<vmem>>, vector<1x32x128xf32>
    %43 = vector.shape_cast %42 : vector<1x32x128xf32> to vector<32x128xf32>
    %cst_86 = arith.constant dense<0.000000e+00> : vector<2x128xf32>
    %44 = tpu.matmul %41, %43, %cst_86 {dimension_numbers = #tpu.dot_dimension_numbers<[1], [0], [0], [1], [0, 0, 1, 1], [], []>} : vector<2x32xf32>, vector<32x128xf32>, vector<2x128xf32> -> vector<2x128xf32>
    %45 = arith.addf %40, %44 : vector<2x128xf32>
    %c1_87 = arith.constant 1 : index
    %c0_88 = arith.constant 0 : index
    %46 = tpu.strided_load %arg13[%c1_87, %c0_88] {strides = array<i32: 16, 1>} : memref<32x32xf32, #tpu.memory_space<vmem>>, vector<2x32xf32>
    %c1_89 = arith.constant 1 : index
    %c0_90 = arith.constant 0 : index
    %c0_91 = arith.constant 0 : index
    %47 = vector.load %arg6[%c1_89, %c0_90, %c0_91] : memref<16x32x128xf32, #tpu.memory_space<vmem>>, vector<1x32x128xf32>
    %48 = vector.shape_cast %47 : vector<1x32x128xf32> to vector<32x128xf32>
    %cst_92 = arith.constant dense<0.000000e+00> : vector<2x128xf32>
    %49 = tpu.matmul %46, %48, %cst_92 {dimension_numbers = #tpu.dot_dimension_numbers<[1], [0], [0], [1], [0, 0, 1, 1], [], []>} : vector<2x32xf32>, vector<32x128xf32>, vector<2x128xf32> -> vector<2x128xf32>
    %50 = arith.addf %45, %49 : vector<2x128xf32>
    %c2_93 = arith.constant 2 : index
    %c0_94 = arith.constant 0 : index
    %51 = tpu.strided_load %arg13[%c2_93, %c0_94] {strides = array<i32: 16, 1>} : memref<32x32xf32, #tpu.memory_space<vmem>>, vector<2x32xf32>
    %c2_95 = arith.constant 2 : index
    %c0_96 = arith.constant 0 : index
    %c0_97 = arith.constant 0 : index
    %52 = vector.load %arg6[%c2_95, %c0_96, %c0_97] : memref<16x32x128xf32, #tpu.memory_space<vmem>>, vector<1x32x128xf32>
    %53 = vector.shape_cast %52 : vector<1x32x128xf32> to vector<32x128xf32>
    %cst_98 = arith.constant dense<0.000000e+00> : vector<2x128xf32>
    %54 = tpu.matmul %51, %53, %cst_98 {dimension_numbers = #tpu.dot_dimension_numbers<[1], [0], [0], [1], [0, 0, 1, 1], [], []>} : vector<2x32xf32>, vector<32x128xf32>, vector<2x128xf32> -> vector<2x128xf32>
    %55 = arith.addf %50, %54 : vector<2x128xf32>
    %c3 = arith.constant 3 : index
    %c0_99 = arith.constant 0 : index
    %56 = tpu.strided_load %arg13[%c3, %c0_99] {strides = array<i32: 16, 1>} : memref<32x32xf32, #tpu.memory_space<vmem>>, vector<2x32xf32>
    %c3_100 = arith.constant 3 : index
    %c0_101 = arith.constant 0 : index
    %c0_102 = arith.constant 0 : index
    %57 = vector.load %arg6[%c3_100, %c0_101, %c0_102] : memref<16x32x128xf32, #tpu.memory_space<vmem>>, vector<1x32x128xf32>
    %58 = vector.shape_cast %57 : vector<1x32x128xf32> to vector<32x128xf32>
    %cst_103 = arith.constant dense<0.000000e+00> : vector<2x128xf32>
    %59 = tpu.matmul %56, %58, %cst_103 {dimension_numbers = #tpu.dot_dimension_numbers<[1], [0], [0], [1], [0, 0, 1, 1], [], []>} : vector<2x32xf32>, vector<32x128xf32>, vector<2x128xf32> -> vector<2x128xf32>
    %60 = arith.addf %55, %59 : vector<2x128xf32>
    %c4 = arith.constant 4 : index
    %c0_104 = arith.constant 0 : index
    %61 = tpu.strided_load %arg13[%c4, %c0_104] {strides = array<i32: 16, 1>} : memref<32x32xf32, #tpu.memory_space<vmem>>, vector<2x32xf32>
    %c4_105 = arith.constant 4 : index
    %c0_106 = arith.constant 0 : index
    %c0_107 = arith.constant 0 : index
    %62 = vector.load %arg6[%c4_105, %c0_106, %c0_107] : memref<16x32x128xf32, #tpu.memory_space<vmem>>, vector<1x32x128xf32>
    %63 = vector.shape_cast %62 : vector<1x32x128xf32> to vector<32x128xf32>
    %cst_108 = arith.constant dense<0.000000e+00> : vector<2x128xf32>
    %64 = tpu.matmul %61, %63, %cst_108 {dimension_numbers = #tpu.dot_dimension_numbers<[1], [0], [0], [1], [0, 0, 1, 1], [], []>} : vector<2x32xf32>, vector<32x128xf32>, vector<2x128xf32> -> vector<2x128xf32>
    %65 = arith.addf %60, %64 : vector<2x128xf32>
    %c5 = arith.constant 5 : index
    %c0_109 = arith.constant 0 : index
    %66 = tpu.strided_load %arg13[%c5, %c0_109] {strides = array<i32: 16, 1>} : memref<32x32xf32, #tpu.memory_space<vmem>>, vector<2x32xf32>
    %c5_110 = arith.constant 5 : index
    %c0_111 = arith.constant 0 : index
    %c0_112 = arith.constant 0 : index
    %67 = vector.load %arg6[%c5_110, %c0_111, %c0_112] : memref<16x32x128xf32, #tpu.memory_space<vmem>>, vector<1x32x128xf32>
    %68 = vector.shape_cast %67 : vector<1x32x128xf32> to vector<32x128xf32>
    %cst_113 = arith.constant dense<0.000000e+00> : vector<2x128xf32>
    %69 = tpu.matmul %66, %68, %cst_113 {dimension_numbers = #tpu.dot_dimension_numbers<[1], [0], [0], [1], [0, 0, 1, 1], [], []>} : vector<2x32xf32>, vector<32x128xf32>, vector<2x128xf32> -> vector<2x128xf32>
    %70 = arith.addf %65, %69 : vector<2x128xf32>
    %c6 = arith.constant 6 : index
    %c0_114 = arith.constant 0 : index
    %71 = tpu.strided_load %arg13[%c6, %c0_114] {strides = array<i32: 16, 1>} : memref<32x32xf32, #tpu.memory_space<vmem>>, vector<2x32xf32>
    %c6_115 = arith.constant 6 : index
    %c0_116 = arith.constant 0 : index
    %c0_117 = arith.constant 0 : index
    %72 = vector.load %arg6[%c6_115, %c0_116, %c0_117] : memref<16x32x128xf32, #tpu.memory_space<vmem>>, vector<1x32x128xf32>
    %73 = vector.shape_cast %72 : vector<1x32x128xf32> to vector<32x128xf32>
    %cst_118 = arith.constant dense<0.000000e+00> : vector<2x128xf32>
    %74 = tpu.matmul %71, %73, %cst_118 {dimension_numbers = #tpu.dot_dimension_numbers<[1], [0], [0], [1], [0, 0, 1, 1], [], []>} : vector<2x32xf32>, vector<32x128xf32>, vector<2x128xf32> -> vector<2x128xf32>
    %75 = arith.addf %70, %74 : vector<2x128xf32>
    %c7 = arith.constant 7 : index
    %c0_119 = arith.constant 0 : index
    %76 = tpu.strided_load %arg13[%c7, %c0_119] {strides = array<i32: 16, 1>} : memref<32x32xf32, #tpu.memory_space<vmem>>, vector<2x32xf32>
    %c7_120 = arith.constant 7 : index
    %c0_121 = arith.constant 0 : index
    %c0_122 = arith.constant 0 : index
    %77 = vector.load %arg6[%c7_120, %c0_121, %c0_122] : memref<16x32x128xf32, #tpu.memory_space<vmem>>, vector<1x32x128xf32>
    %78 = vector.shape_cast %77 : vector<1x32x128xf32> to vector<32x128xf32>
    %cst_123 = arith.constant dense<0.000000e+00> : vector<2x128xf32>
    %79 = tpu.matmul %76, %78, %cst_123 {dimension_numbers = #tpu.dot_dimension_numbers<[1], [0], [0], [1], [0, 0, 1, 1], [], []>} : vector<2x32xf32>, vector<32x128xf32>, vector<2x128xf32> -> vector<2x128xf32>
    %80 = arith.addf %75, %79 : vector<2x128xf32>
    %c8 = arith.constant 8 : index
    %c0_124 = arith.constant 0 : index
    %81 = tpu.strided_load %arg13[%c8, %c0_124] {strides = array<i32: 16, 1>} : memref<32x32xf32, #tpu.memory_space<vmem>>, vector<2x32xf32>
    %c8_125 = arith.constant 8 : index
    %c0_126 = arith.constant 0 : index
    %c0_127 = arith.constant 0 : index
    %82 = vector.load %arg6[%c8_125, %c0_126, %c0_127] : memref<16x32x128xf32, #tpu.memory_space<vmem>>, vector<1x32x128xf32>
    %83 = vector.shape_cast %82 : vector<1x32x128xf32> to vector<32x128xf32>
    %cst_128 = arith.constant dense<0.000000e+00> : vector<2x128xf32>
    %84 = tpu.matmul %81, %83, %cst_128 {dimension_numbers = #tpu.dot_dimension_numbers<[1], [0], [0], [1], [0, 0, 1, 1], [], []>} : vector<2x32xf32>, vector<32x128xf32>, vector<2x128xf32> -> vector<2x128xf32>
    %85 = arith.addf %80, %84 : vector<2x128xf32>
    %c9 = arith.constant 9 : index
    %c0_129 = arith.constant 0 : index
    %86 = tpu.strided_load %arg13[%c9, %c0_129] {strides = array<i32: 16, 1>} : memref<32x32xf32, #tpu.memory_space<vmem>>, vector<2x32xf32>
    %c9_130 = arith.constant 9 : index
    %c0_131 = arith.constant 0 : index
    %c0_132 = arith.constant 0 : index
    %87 = vector.load %arg6[%c9_130, %c0_131, %c0_132] : memref<16x32x128xf32, #tpu.memory_space<vmem>>, vector<1x32x128xf32>
    %88 = vector.shape_cast %87 : vector<1x32x128xf32> to vector<32x128xf32>
    %cst_133 = arith.constant dense<0.000000e+00> : vector<2x128xf32>
    %89 = tpu.matmul %86, %88, %cst_133 {dimension_numbers = #tpu.dot_dimension_numbers<[1], [0], [0], [1], [0, 0, 1, 1], [], []>} : vector<2x32xf32>, vector<32x128xf32>, vector<2x128xf32> -> vector<2x128xf32>
    %90 = arith.addf %85, %89 : vector<2x128xf32>
    %c10 = arith.constant 10 : index
    %c0_134 = arith.constant 0 : index
    %91 = tpu.strided_load %arg13[%c10, %c0_134] {strides = array<i32: 16, 1>} : memref<32x32xf32, #tpu.memory_space<vmem>>, vector<2x32xf32>
    %c10_135 = arith.constant 10 : index
    %c0_136 = arith.constant 0 : index
    %c0_137 = arith.constant 0 : index
    %92 = vector.load %arg6[%c10_135, %c0_136, %c0_137] : memref<16x32x128xf32, #tpu.memory_space<vmem>>, vector<1x32x128xf32>
    %93 = vector.shape_cast %92 : vector<1x32x128xf32> to vector<32x128xf32>
    %cst_138 = arith.constant dense<0.000000e+00> : vector<2x128xf32>
    %94 = tpu.matmul %91, %93, %cst_138 {dimension_numbers = #tpu.dot_dimension_numbers<[1], [0], [0], [1], [0, 0, 1, 1], [], []>} : vector<2x32xf32>, vector<32x128xf32>, vector<2x128xf32> -> vector<2x128xf32>
    %95 = arith.addf %90, %94 : vector<2x128xf32>
    %c11 = arith.constant 11 : index
    %c0_139 = arith.constant 0 : index
    %96 = tpu.strided_load %arg13[%c11, %c0_139] {strides = array<i32: 16, 1>} : memref<32x32xf32, #tpu.memory_space<vmem>>, vector<2x32xf32>
    %c11_140 = arith.constant 11 : index
    %c0_141 = arith.constant 0 : index
    %c0_142 = arith.constant 0 : index
    %97 = vector.load %arg6[%c11_140, %c0_141, %c0_142] : memref<16x32x128xf32, #tpu.memory_space<vmem>>, vector<1x32x128xf32>
    %98 = vector.shape_cast %97 : vector<1x32x128xf32> to vector<32x128xf32>
    %cst_143 = arith.constant dense<0.000000e+00> : vector<2x128xf32>
    %99 = tpu.matmul %96, %98, %cst_143 {dimension_numbers = #tpu.dot_dimension_numbers<[1], [0], [0], [1], [0, 0, 1, 1], [], []>} : vector<2x32xf32>, vector<32x128xf32>, vector<2x128xf32> -> vector<2x128xf32>
    %100 = arith.addf %95, %99 : vector<2x128xf32>
    %c12 = arith.constant 12 : index
    %c0_144 = arith.constant 0 : index
    %101 = tpu.strided_load %arg13[%c12, %c0_144] {strides = array<i32: 16, 1>} : memref<32x32xf32, #tpu.memory_space<vmem>>, vector<2x32xf32>
    %c12_145 = arith.constant 12 : index
    %c0_146 = arith.constant 0 : index
    %c0_147 = arith.constant 0 : index
    %102 = vector.load %arg6[%c12_145, %c0_146, %c0_147] : memref<16x32x128xf32, #tpu.memory_space<vmem>>, vector<1x32x128xf32>
    %103 = vector.shape_cast %102 : vector<1x32x128xf32> to vector<32x128xf32>
    %cst_148 = arith.constant dense<0.000000e+00> : vector<2x128xf32>
    %104 = tpu.matmul %101, %103, %cst_148 {dimension_numbers = #tpu.dot_dimension_numbers<[1], [0], [0], [1], [0, 0, 1, 1], [], []>} : vector<2x32xf32>, vector<32x128xf32>, vector<2x128xf32> -> vector<2x128xf32>
    %105 = arith.addf %100, %104 : vector<2x128xf32>
    %c13 = arith.constant 13 : index
    %c0_149 = arith.constant 0 : index
    %106 = tpu.strided_load %arg13[%c13, %c0_149] {strides = array<i32: 16, 1>} : memref<32x32xf32, #tpu.memory_space<vmem>>, vector<2x32xf32>
    %c13_150 = arith.constant 13 : index
    %c0_151 = arith.constant 0 : index
    %c0_152 = arith.constant 0 : index
    %107 = vector.load %arg6[%c13_150, %c0_151, %c0_152] : memref<16x32x128xf32, #tpu.memory_space<vmem>>, vector<1x32x128xf32>
    %108 = vector.shape_cast %107 : vector<1x32x128xf32> to vector<32x128xf32>
    %cst_153 = arith.constant dense<0.000000e+00> : vector<2x128xf32>
    %109 = tpu.matmul %106, %108, %cst_153 {dimension_numbers = #tpu.dot_dimension_numbers<[1], [0], [0], [1], [0, 0, 1, 1], [], []>} : vector<2x32xf32>, vector<32x128xf32>, vector<2x128xf32> -> vector<2x128xf32>
    %110 = arith.addf %105, %109 : vector<2x128xf32>
    %c14 = arith.constant 14 : index
    %c0_154 = arith.constant 0 : index
    %111 = tpu.strided_load %arg13[%c14, %c0_154] {strides = array<i32: 16, 1>} : memref<32x32xf32, #tpu.memory_space<vmem>>, vector<2x32xf32>
    %c14_155 = arith.constant 14 : index
    %c0_156 = arith.constant 0 : index
    %c0_157 = arith.constant 0 : index
    %112 = vector.load %arg6[%c14_155, %c0_156, %c0_157] : memref<16x32x128xf32, #tpu.memory_space<vmem>>, vector<1x32x128xf32>
    %113 = vector.shape_cast %112 : vector<1x32x128xf32> to vector<32x128xf32>
    %cst_158 = arith.constant dense<0.000000e+00> : vector<2x128xf32>
    %114 = tpu.matmul %111, %113, %cst_158 {dimension_numbers = #tpu.dot_dimension_numbers<[1], [0], [0], [1], [0, 0, 1, 1], [], []>} : vector<2x32xf32>, vector<32x128xf32>, vector<2x128xf32> -> vector<2x128xf32>
    %115 = arith.addf %110, %114 : vector<2x128xf32>
    %c15 = arith.constant 15 : index
    %c0_159 = arith.constant 0 : index
    %116 = tpu.strided_load %arg13[%c15, %c0_159] {strides = array<i32: 16, 1>} : memref<32x32xf32, #tpu.memory_space<vmem>>, vector<2x32xf32>
    %c15_160 = arith.constant 15 : index
    %c0_161 = arith.constant 0 : index
    %c0_162 = arith.constant 0 : index
    %117 = vector.load %arg6[%c15_160, %c0_161, %c0_162] : memref<16x32x128xf32, #tpu.memory_space<vmem>>, vector<1x32x128xf32>
    %118 = vector.shape_cast %117 : vector<1x32x128xf32> to vector<32x128xf32>
    %cst_163 = arith.constant dense<0.000000e+00> : vector<2x128xf32>
    %119 = tpu.matmul %116, %118, %cst_163 {dimension_numbers = #tpu.dot_dimension_numbers<[1], [0], [0], [1], [0, 0, 1, 1], [], []>} : vector<2x32xf32>, vector<32x128xf32>, vector<2x128xf32> -> vector<2x128xf32>
    %120 = arith.addf %115, %119 : vector<2x128xf32>
    %c0_164 = arith.constant 0 : index
    %c0_165 = arith.constant 0 : index
    %121 = vector.load %arg7[%c0_164, %c0_165] : memref<1x128xf32, #tpu.memory_space<vmem>>, vector<1x128xf32>
    %122 = vector.broadcast %121 : vector<1x128xf32> to vector<2x128xf32>
    %123 = arith.addf %120, %122 : vector<2x128xf32>
    %cst_166 = arith.constant 0.000000e+00 : f32
    %124 = vector.broadcast %cst_166 : f32 to vector<2x128xf32>
    %125 = arith.maximumf %123, %124 : vector<2x128xf32>
    %c0_167 = arith.constant 0 : index
    %c0_168 = arith.constant 0 : index
    %126 = vector.load %arg8[%c0_167, %c0_168] : memref<128x10xf32, #tpu.memory_space<vmem>>, vector<128x10xf32>
    %cst_169 = arith.constant dense<0.000000e+00> : vector<2x10xf32>
    %127 = tpu.matmul %125, %126, %cst_169 {dimension_numbers = #tpu.dot_dimension_numbers<[1], [0], [0], [1], [0, 0, 1, 1], [], []>} : vector<2x128xf32>, vector<128x10xf32>, vector<2x10xf32> -> vector<2x10xf32>
    %c0_170 = arith.constant 0 : index
    %c0_171 = arith.constant 0 : index
    %128 = vector.load %arg9[%c0_170, %c0_171] : memref<1x10xf32, #tpu.memory_space<vmem>>, vector<1x10xf32>
    %129 = vector.broadcast %128 : vector<1x10xf32> to vector<2x10xf32>
    %130 = arith.addf %127, %129 : vector<2x10xf32>
    %c0_172 = arith.constant 0 : index
    %c0_173 = arith.constant 0 : index
    %131 = vector.load %arg10[%c0_172, %c0_173] : memref<2x10xf32, #tpu.memory_space<vmem>>, vector<2x10xf32>
    tpu.vector_store %arg10[%c0_172, %c0_173], %130 {strides = array<i32>} : memref<2x10xf32, #tpu.memory_space<vmem>>, vector<2x10xf32>,
    return
  }
  func.func @transform_0(%arg0: i32) -> (i32, i32, i32, i32) {
    %c0_i32 = arith.constant 0 : i32
    %c0_i32_0 = arith.constant 0 : i32
    %c0_i32_1 = arith.constant 0 : i32
    %c0_i32_2 = arith.constant 0 : i32
    return %arg0, %c0_i32, %c0_i32_0, %c0_i32_1 : i32, i32, i32, i32
  }
  func.func @transform_1(%arg0: i32) -> (i32, i32, i32) {
    %c0_i32 = arith.constant 0 : i32
    %c0_i32_0 = arith.constant 0 : i32
    %c0_i32_1 = arith.constant 0 : i32
    %c0_i32_2 = arith.constant 0 : i32
    return %c0_i32, %c0_i32_0, %c0_i32_1 : i32, i32, i32
  }
  func.func @transform_2(%arg0: i32) -> (i32, i32) {
    %c0_i32 = arith.constant 0 : i32
    %c0_i32_0 = arith.constant 0 : i32
    %c0_i32_1 = arith.constant 0 : i32
    return %c0_i32, %c0_i32_0 : i32, i32
  }
  func.func @transform_3(%arg0: i32) -> (i32, i32, i32) {
    %c0_i32 = arith.constant 0 : i32
    %c0_i32_0 = arith.constant 0 : i32
    %c0_i32_1 = arith.constant 0 : i32
    %c0_i32_2 = arith.constant 0 : i32
    return %c0_i32, %c0_i32_0, %c0_i32_1 : i32, i32, i32
  }
  func.func @transform_4(%arg0: i32) -> (i32, i32) {
    %c0_i32 = arith.constant 0 : i32
    %c0_i32_0 = arith.constant 0 : i32
    %c0_i32_1 = arith.constant 0 : i32
    return %c0_i32, %c0_i32_0 : i32, i32
  }
  func.func @transform_5(%arg0: i32) -> (i32, i32, i32) {
    %c0_i32 = arith.constant 0 : i32
    %c0_i32_0 = arith.constant 0 : i32
    %c0_i32_1 = arith.constant 0 : i32
    %c0_i32_2 = arith.constant 0 : i32
    return %c0_i32, %c0_i32_0, %c0_i32_1 : i32, i32, i32
  }
  func.func @transform_6(%arg0: i32) -> (i32, i32) {
    %c0_i32 = arith.constant 0 : i32
    %c0_i32_0 = arith.constant 0 : i32
    %c0_i32_1 = arith.constant 0 : i32
    return %c0_i32, %c0_i32_0 : i32, i32
  }
  func.func @transform_7(%arg0: i32) -> (i32, i32) {
    %c0_i32 = arith.constant 0 : i32
    %c0_i32_0 = arith.constant 0 : i32
    %c0_i32_1 = arith.constant 0 : i32
    return %c0_i32, %c0_i32_0 : i32, i32
  }
  func.func @transform_8(%arg0: i32) -> (i32, i32) {
    %c0_i32 = arith.constant 0 : i32
    %c0_i32_0 = arith.constant 0 : i32
    %c0_i32_1 = arith.constant 0 : i32
    return %c0_i32, %c0_i32_0 : i32, i32
  }
  func.func @transform_9(%arg0: i32) -> (i32, i32) {
    %c0_i32 = arith.constant 0 : i32
    %c0_i32_0 = arith.constant 0 : i32
    return %arg0, %c0_i32 : i32, i32
  }
}

</mosaic_0001>

<bundles_post_ra>
// kernel: custom_cnn_forward.1
= control target key start
LH: loop header
LB: loop body
LE: loop exit
PB: predicated region body
PF: predicated region fallthrough
CT: control target
= control target key end

     0   :  { %s8087_s13 = smov 1   ;;  %vm60_vm0 = vcmask 23552   ;;  %vm141_vm1 = vcmask 7168   ;;  %v8088_v6 = vmov 0.0   ;;  %vm143_vm2 = vcmask 6144   ;;  %s10008_s0 = inlined_call_operand.vmem [shape: f32[2,16,16,1], index: 0, kind: input, shape index: {}]   ;;  %s10009_s1 = inlined_call_operand.vmem [shape: f32[3,3,16], index: 1, kind: input, shape index: {}]   ;;  %s10010_s2 = inlined_call_operand.vmem [shape: f32[1,16], index: 2, kind: input, shape index: {}]   ;;  %s10011_s3 = inlined_call_operand.vmem [shape: f32[3,48,32], index: 3, kind: input, shape index: {}]   ;;  %s10012_s4 = inlined_call_operand.vmem [shape: f32[1,32], index: 4, kind: input, shape index: {}]   ;;  %s10013_s5 = inlined_call_operand.vmem [shape: f32[16,32,128], index: 5, kind: input, shape index: {}]   ;;  %s10014_s6 = inlined_call_operand.vmem [shape: f32[1,128], index: 6, kind: input, shape index: {}]   ;;  %s10015_s7 = inlined_call_operand.vmem [shape: f32[128,10], index: 7, kind: input, shape index: {}]   ;;  %s10016_s8 = inlined_call_operand.vmem [shape: f32[1,10], index: 8, kind: input, shape index: {}]   ;;  %s10017_s9 = inlined_call_operand.hbm [shape: f32[2,10], index: 9, kind: output, shape index: {}]  }
   0x1   :  { %v177_v0 = vld [vmem:[%s10008_s0 + $0x10] sm:$0xff]  ;;  %v175_v1 = vld [vmem:[%s10008_s0] sm:$0xff]  ;;  %v178_v2 = vld [vmem:[%s10008_s0 + $0x18] sm:$0xff]  ;;  %65 = vst.msk [vmem:[#allocation2 + $0x20] sm:$0xff] %vm60_vm0, %v8088_v6 }
   0x2   :  { %243 = vrot.lane.b32.xlu1 %v177_v0, %s8087_s13  ;;  %239 = vrot.lane.b32.xlu0 %v175_v1, %s8087_s13  ;;  %v176_v3 = vld [vmem:[%s10008_s0 + $0x8] sm:$0xff]  ;;  %v179_v4 = vld [vmem:[%s10008_s0 + $0x20] sm:$0xff]  ;;  %66 = vst.msk [vmem:[#allocation2 + $0x28] sm:$0xff] %vm60_vm0, %v8088_v6  ;;  %61 = vst.msk [vmem:[#allocation2] sm:$0xff] %vm60_vm0, %v8088_v6 }
   0x3   :  { %v8177_v5 = vld [vmem:[%s10008_s0 + $0x30] sm:$0xff]  ;;  %62 = vst.msk [vmem:[#allocation2 + $0x8] sm:$0xff] %vm60_vm0, %v8088_v6  ;;  %63 = vst.msk [vmem:[#allocation2 + $0x10] sm:$0xff] %vm60_vm0, %v8088_v6  ;;  %v183_v7 = vld [vmem:[%s10008_s0 + $0x40] sm:$0xff] }
   0x4   :  { %64 = vst.msk [vmem:[#allocation2 + $0x18] sm:$0xff] %vm60_vm0, %v8088_v6  ;;  %67 = vst.msk [vmem:[#allocation2 + $0x30] sm:$0xff] %vm60_vm0, %v8088_v6  ;;  %v185_v8 = vld [vmem:[%s10008_s0 + $0x50] sm:$0xff]  ;;  %v187_v9 = vld [vmem:[%s10008_s0 + $0x60] sm:$0xff] }
   0x5   :  { %68 = vst.msk [vmem:[#allocation2 + $0x38] sm:$0xff] %vm60_vm0, %v8088_v6  ;;  %69 = vst.msk [vmem:[#allocation2 + $0x40] sm:$0xff] %vm60_vm0, %v8088_v6  ;;  %v189_v10 = vld [vmem:[%s10008_s0 + $0x70] sm:$0xff]  ;;  %v180_v11 = vld [vmem:[%s10008_s0 + $0x28] sm:$0xff] }
   0x6   :  { %70 = vst.msk [vmem:[#allocation2 + $0x48] sm:$0xff] %vm60_vm0, %v8088_v6  ;;  %71 = vst.msk [vmem:[#allocation2 + $0x50] sm:$0xff] %vm60_vm0, %v8088_v6  ;;  %245 = vrot.lane.b32.xlu1 %v178_v2, %s8087_s13  ;;  %241 = vrot.lane.b32.xlu0 %v176_v3, %s8087_s13  ;;  %v191_v12 = vld [vmem:[%s10008_s0 + $0x80] sm:$0xff]  ;;  %v8283_v13 = vld [vmem:[%s10008_s0 + $0x90] sm:$0xff] }
   0x7   :  { %72 = vst.msk [vmem:[#allocation2 + $0x58] sm:$0xff] %vm60_vm0, %v8088_v6  ;;  %73 = vst.msk [vmem:[#allocation2 + $0x60] sm:$0xff] %vm60_vm0, %v8088_v6  ;;  %v8288_v14 = vld [vmem:[%s10008_s0 + $0xa0] sm:$0xff]  ;;  %v8294_v15 = vld [vmem:[%s10008_s0 + $0xb0] sm:$0xff] }
   0x8   :  { %74 = vst.msk [vmem:[#allocation2 + $0x68] sm:$0xff] %vm60_vm0, %v8088_v6  ;;  %75 = vst.msk [vmem:[#allocation2 + $0x70] sm:$0xff] %vm60_vm0, %v8088_v6  ;;  %v8305_v16 = vld [vmem:[%s10008_s0 + $0xc0] sm:$0xff]  ;;  %v182_v17 = vld [vmem:[%s10008_s0 + $0x38] sm:$0xff] }
   0x9   :  { %76 = vst.msk [vmem:[#allocation2 + $0x78] sm:$0xff] %vm60_vm0, %v8088_v6  ;;  %77 = vst.msk [vmem:[#allocation2 + $0x80] sm:$0xff] %vm60_vm0, %v8088_v6  ;;  %v8315_v18 = vld [vmem:[%s10008_s0 + $0xd0] sm:$0xff]  ;;  %v8320_v19 = vld [vmem:[%s10008_s0 + $0xe0] sm:$0xff] }
   0xa   :  { %78 = vst.msk [vmem:[#allocation2 + $0x88] sm:$0xff] %vm60_vm0, %v8088_v6  ;;  %79 = vst.msk [vmem:[#allocation2 + $0x90] sm:$0xff] %vm60_vm0, %v8088_v6  ;;  %249 = vrot.lane.b32.xlu1 %v180_v11, %s8087_s13  ;;  %247 = vrot.lane.b32.xlu0 %v179_v4, %s8087_s13  ;;  %v8327_v20 = vld [vmem:[%s10008_s0 + $0xf0] sm:$0xff]  ;;  %v184_v21 = vld [vmem:[%s10008_s0 + $0x48] sm:$0xff] }
   0xb   :  { %80 = vst.msk [vmem:[#allocation2 + $0x98] sm:$0xff] %vm60_vm0, %v8088_v6  ;;  %81 = vst.msk [vmem:[#allocation2 + $0xa0] sm:$0xff] %vm60_vm0, %v8088_v6  ;;  %v186_v22 = vld [vmem:[%s10008_s0 + $0x58] sm:$0xff]  ;;  %v188_v23 = vld [vmem:[%s10008_s0 + $0x68] sm:$0xff] }
   0xc   :  { %82 = vst.msk [vmem:[#allocation2 + $0xa8] sm:$0xff] %vm60_vm0, %v8088_v6  ;;  %83 = vst.msk [vmem:[#allocation2 + $0xb0] sm:$0xff] %vm60_vm0, %v8088_v6  ;;  %v111_v24 = vld [vmem:[%s10008_s0 + $0x18] sm:$0x7f]  ;;  %v109_v25 = vld [vmem:[%s10008_s0 + $0x8] sm:$0x7f] }
   0xd   :  { %84 = vst.msk [vmem:[#allocation2 + $0xb8] sm:$0xff] %vm60_vm0, %v8088_v6  ;;  %85 = vst.msk [vmem:[#allocation2 + $0xc0] sm:$0xff] %vm60_vm0, %v8088_v6  ;;  %v113_v26 = vld [vmem:[%s10008_s0 + $0x28] sm:$0x7f]  ;;  %v190_v27 = vld [vmem:[%s10008_s0 + $0x78] sm:$0xff] }
   0xe   :  { %86 = vst.msk [vmem:[#allocation2 + $0xc8] sm:$0xff] %vm60_vm0, %v8088_v6  ;;  %87 = vst.msk [vmem:[#allocation2 + $0xd0] sm:$0xff] %vm60_vm0, %v8088_v6  ;;  %253 = vrot.lane.b32.xlu1 %v182_v17, %s8087_s13  ;;  %251 = vrot.lane.b32.xlu0 %v8177_v5, %s8087_s13  ;;  %v115_v28 = vld [vmem:[%s10008_s0 + $0x38] sm:$0x7f]  ;;  %v117_v29 = vld [vmem:[%s10008_s0 + $0x48] sm:$0x7f] }
   0xf   :  { %88 = vst.msk [vmem:[#allocation2 + $0xd8] sm:$0xff] %vm60_vm0, %v8088_v6  ;;  %89 = vst.msk [vmem:[#allocation2 + $0xe0] sm:$0xff] %vm60_vm0, %v8088_v6  ;;  %v119_v30 = vld [vmem:[%s10008_s0 + $0x58] sm:$0x7f]  ;;  %v121_v31 = vld [vmem:[%s10008_s0 + $0x68] sm:$0x7f] }
  0x10   :  { %90 = vst.msk [vmem:[#allocation2 + $0xe8] sm:$0xff] %vm60_vm0, %v8088_v6  ;;  %91 = vst.msk [vmem:[#allocation2 + $0xf0] sm:$0xff] %vm60_vm0, %v8088_v6  ;;  %v123_v32 = vld [vmem:[%s10008_s0 + $0x78] sm:$0x7f]  ;;  %v125_v33 = vld [vmem:[%s10008_s0 + $0x88] sm:$0x7f] }
  0x11   :  { %92 = vst.msk [vmem:[#allocation2 + $0xf8] sm:$0xff] %vm60_vm0, %v8088_v6  ;;  %93 = vst.msk [vmem:[#allocation2 + $0x100] sm:$0xff] %vm60_vm0, %v8088_v6  ;;  %v127_v34 = vld [vmem:[%s10008_s0 + $0x98] sm:$0x7f]  ;;  %v129_v35 = vld [vmem:[%s10008_s0 + $0xa8] sm:$0x7f] }
  0x12   :  { %94 = vst.msk [vmem:[#allocation2 + $0x108] sm:$0xff] %vm60_vm0, %v8088_v6  ;;  %95 = vst.msk [vmem:[#allocation2 + $0x110] sm:$0xff] %vm60_vm0, %v8088_v6  ;;  %257 = vrot.lane.b32.xlu1 %v184_v21, %s8087_s13  ;;  %255 = vrot.lane.b32.xlu0 %v183_v7, %s8087_s13 }
  0x13   :  { %96 = vst.msk [vmem:[#allocation2 + $0x118] sm:$0xff] %vm60_vm0, %v8088_v6 }
  0x14   :  { %145 = vst.msk [vmem:[#allocation2 + $0x21] sm:$0xff] %vm141_vm1, %v177_v0  ;;  %142 = vst.msk [vmem:[#allocation2 + $0x11] sm:$0xff] %vm141_vm1, %v175_v1 }
  0x15   :  { %147 = vst.msk [vmem:[#allocation2 + $0x31] sm:$0xff] %vm141_vm1, %v179_v4  ;;  %149 = vst.msk [vmem:[#allocation2 + $0x41] sm:$0xff] %vm141_vm1, %v8177_v5 }
  0x16   :  { %151 = vst.msk [vmem:[#allocation2 + $0x51] sm:$0xff] %vm141_vm1, %v183_v7  ;;  %153 = vst.msk [vmem:[#allocation2 + $0x61] sm:$0xff] %vm141_vm1, %v185_v8  ;;  %261 = vrot.lane.b32.xlu1 %v186_v22, %s8087_s13  ;;  %259 = vrot.lane.b32.xlu0 %v185_v8, %s8087_s13 }
  0x17   :  { %155 = vst.msk [vmem:[#allocation2 + $0x71] sm:$0xff] %vm141_vm1, %v187_v9  ;;  %157 = vst.msk [vmem:[#allocation2 + $0x81] sm:$0xff] %vm141_vm1, %v189_v10 }
  0x18   :  { %159 = vst.msk [vmem:[#allocation2 + $0x91] sm:$0xff] %vm141_vm1, %v191_v12  ;;  %161 = vst.msk [vmem:[#allocation2 + $0xa1] sm:$0xff] %vm141_vm1, %v8283_v13 }
  0x19   :  { %163 = vst.msk [vmem:[#allocation2 + $0xb1] sm:$0xff] %vm141_vm1, %v8288_v14  ;;  %165 = vst.msk [vmem:[#allocation2 + $0xc1] sm:$0xff] %vm141_vm1, %v8294_v15 }
  0x1a   :  { %167 = vst.msk [vmem:[#allocation2 + $0xd1] sm:$0xff] %vm141_vm1, %v8305_v16  ;;  %169 = vst.msk [vmem:[#allocation2 + $0xe1] sm:$0xff] %vm141_vm1, %v8315_v18  ;;  %265 = vrot.lane.b32.xlu1 %v188_v23, %s8087_s13  ;;  %263 = vrot.lane.b32.xlu0 %v187_v9, %s8087_s13 }
  0x1b   :  { %171 = vst.msk [vmem:[#allocation2 + $0xf1] sm:$0xff] %vm141_vm1, %v8320_v19  ;;  %173 = vst.msk [vmem:[#allocation2 + $0x101] sm:$0xff] %vm141_vm1, %v8327_v20 }
  0x1c   :  { %146 = vst.msk [vmem:[#allocation2 + $0x29] sm:$0x7f] %vm143_vm2, %v111_v24  ;;  %144 = vst.msk [vmem:[#allocation2 + $0x19] sm:$0x7f] %vm143_vm2, %v109_v25 }
  0x1d   :  { %148 = vst.msk [vmem:[#allocation2 + $0x39] sm:$0x7f] %vm143_vm2, %v113_v26  ;;  %150 = vst.msk [vmem:[#allocation2 + $0x49] sm:$0x7f] %vm143_vm2, %v115_v28 }
  0x1e   :  { %152 = vst.msk [vmem:[#allocation2 + $0x59] sm:$0x7f] %vm143_vm2, %v117_v29  ;;  %154 = vst.msk [vmem:[#allocation2 + $0x69] sm:$0x7f] %vm143_vm2, %v119_v30 }
  0x1f   :  { %156 = vst.msk [vmem:[#allocation2 + $0x79] sm:$0x7f] %vm143_vm2, %v121_v31  ;;  %158 = vst.msk [vmem:[#allocation2 + $0x89] sm:$0x7f] %vm143_vm2, %v123_v32 }
  0x20   :  { %160 = vst.msk [vmem:[#allocation2 + $0x99] sm:$0x7f] %vm143_vm2, %v125_v33  ;;  %162 = vst.msk [vmem:[#allocation2 + $0xa9] sm:$0x7f] %vm143_vm2, %v127_v34 }
  0x21   :  { %14 = vsyncpa [#allocation6], 0  ;;  %164 = vst.msk [vmem:[#allocation2 + $0xb9] sm:$0x7f] %vm143_vm2, %v129_v35  ;;  %269 = vrot.lane.b32.xlu1 %v190_v27, %s8087_s13  ;;  %267 = vrot.lane.b32.xlu0 %v189_v10, %s8087_s13  ;;  %v192_v36 = vld [vmem:[%s10008_s0 + $0x88] sm:$0xff]  ;;  %v194_v38 = vld [vmem:[%s10008_s0 + $0x98] sm:$0xff] }
  0x22   :  { %v131_v37 = vld [vmem:[%s10008_s0 + $0xb8] sm:$0x7f]  ;;  %v133_v39 = vld [vmem:[%s10008_s0 + $0xc8] sm:$0x7f]  ;;  %s8089_s30 = smov 2   ;;  %vm97_vm3 = vcmask 392192  }
  0x23   :  { %166 = vst.msk [vmem:[#allocation2 + $0xc9] sm:$0x7f] %vm143_vm2, %v131_v37  ;;  %168 = vst.msk [vmem:[#allocation2 + $0xd9] sm:$0x7f] %vm143_vm2, %v133_v39  ;;  %v196_v40 = vld [vmem:[%s10008_s0 + $0xa8] sm:$0xff]  ;;  %v198_v42 = vld [vmem:[%s10008_s0 + $0xb8] sm:$0xff] }
  0x24   :  { %v135_v41 = vld [vmem:[%s10008_s0 + $0xd8] sm:$0x7f]  ;;  %v137_v43 = vld [vmem:[%s10008_s0 + $0xe8] sm:$0x7f]  ;;  %98 = vst.msk [vmem:[#allocation3] sm:$0xff] %vm97_vm3, %v8088_v6  ;;  %99 = vst.msk [vmem:[#allocation3 + $0x8] sm:$0xff] %vm97_vm3, %v8088_v6 }
  0x25   :  { %273 = vrot.lane.b32.xlu1 %v192_v36, %s8087_s13  ;;  %271 = vrot.lane.b32.xlu0 %v191_v12, %s8087_s13  ;;  %170 = vst.msk [vmem:[#allocation2 + $0xe9] sm:$0x7f] %vm143_vm2, %v135_v41  ;;  %172 = vst.msk [vmem:[#allocation2 + $0xf9] sm:$0x7f] %vm143_vm2, %v137_v43  ;;  %v200_v44 = vld [vmem:[%s10008_s0 + $0xc8] sm:$0xff]  ;;  %v202_v46 = vld [vmem:[%s10008_s0 + $0xd8] sm:$0xff] }
  0x26   :  { %v139_v45 = vld [vmem:[%s10008_s0 + $0xf8] sm:$0x7f]  ;;  %v204_v47 = vld [vmem:[%s10008_s0 + $0xe8] sm:$0xff]  ;;  %100 = vst.msk [vmem:[#allocation3 + $0x10] sm:$0xff] %vm97_vm3, %v8088_v6  ;;  %101 = vst.msk [vmem:[#allocation3 + $0x18] sm:$0xff] %vm97_vm3, %v8088_v6  ;;  %vm335_vm4 = vcmask 15368  }
  0x27   :  { %174 = vst.msk [vmem:[#allocation2 + $0x109] sm:$0x7f] %vm143_vm2, %v139_v45  ;;  %v206_v48 = vld [vmem:[%s10008_s0 + $0xf8] sm:$0xff]  ;;  %v369_v49 = vld [vmem:[%s10008_s0 + $0x9] sm:$0x7f]  ;;  %v368_v50 = vld [vmem:[%s10008_s0 + $0x1] sm:$0xff] }
  0x28   :  { %v371_v51 = vld [vmem:[%s10008_s0 + $0x19] sm:$0x7f]  ;;  %v370_v52 = vld [vmem:[%s10008_s0 + $0x11] sm:$0xff]  ;;  %v373_v53 = vld [vmem:[%s10008_s0 + $0x29] sm:$0x7f]  ;;  %102 = vst.msk [vmem:[#allocation3 + $0x20] sm:$0xff] %vm97_vm3, %v8088_v6 }
  0x29   :  { %277 = vrot.lane.b32.xlu1 %v194_v38, %s8087_s13  ;;  %275 = vrot.lane.b32.xlu0 %v8283_v13, %s8087_s13  ;;  %v372_v54 = vld [vmem:[%s10008_s0 + $0x21] sm:$0xff]  ;;  %v375_v55 = vld [vmem:[%s10008_s0 + $0x39] sm:$0x7f]  ;;  %103 = vst.msk [vmem:[#allocation3 + $0x28] sm:$0xff] %vm97_vm3, %v8088_v6  ;;  %104 = vst.msk [vmem:[#allocation3 + $0x30] sm:$0xff] %vm97_vm3, %v8088_v6  ;;  %vm530_vm5 = vcmask 22544  }
  0x2a   :  { %v374_v56 = vld [vmem:[%s10008_s0 + $0x31] sm:$0xff]  ;;  %v377_v57 = vld [vmem:[%s10008_s0 + $0x49] sm:$0x7f]  ;;  %v376_v58 = vld [vmem:[%s10008_s0 + $0x41] sm:$0xff]  ;;  %105 = vst.msk [vmem:[#allocation3 + $0x38] sm:$0xff] %vm97_vm3, %v8088_v6  ;;  %vm528_vm6 = vcmask 23568  }
  0x2b   :  { %v379_v59 = vld [vmem:[%s10008_s0 + $0x59] sm:$0x7f]  ;;  %v378_v60 = vld [vmem:[%s10008_s0 + $0x51] sm:$0xff]  ;;  %v381_v61 = vld [vmem:[%s10008_s0 + $0x69] sm:$0x7f]  ;;  %106 = vst.msk [vmem:[#allocation3 + $0x40] sm:$0xff] %vm97_vm3, %v8088_v6 }
  0x2c   :  { %v380_v62 = vld [vmem:[%s10008_s0 + $0x61] sm:$0xff]  ;;  %v383_v63 = vld [vmem:[%s10008_s0 + $0x79] sm:$0x7f]  ;;  %v382_v0 = vld [vmem:[%s10008_s0 + $0x71] sm:$0xff]  ;;  %107 = vst.msk [vmem:[#allocation3 + $0x48] sm:$0xff] %vm97_vm3, %v8088_v6 }
  0x2d   :  { %281 = vrot.lane.b32.xlu1 %v196_v40, %s8087_s13  ;;  %279 = vrot.lane.b32.xlu0 %v8288_v14, %s8087_s13  ;;  %v385_v1 = vld [vmem:[%s10008_s0 + $0x89] sm:$0x7f]  ;;  %v384_v2 = vld [vmem:[%s10008_s0 + $0x81] sm:$0xff] }
  0x2e   :  { %v387_v3 = vld [vmem:[%s10008_s0 + $0x99] sm:$0x7f]  ;;  %v386_v4 = vld [vmem:[%s10008_s0 + $0x91] sm:$0xff]  ;;  %v389_v5 = vld [vmem:[%s10008_s0 + $0xa9] sm:$0x7f] }
  0x2f   :  { %v388_v7 = vld [vmem:[%s10008_s0 + $0xa1] sm:$0xff]  ;;  %v391_v8 = vld [vmem:[%s10008_s0 + $0xb9] sm:$0x7f]  ;;  %v390_v9 = vld [vmem:[%s10008_s0 + $0xb1] sm:$0xff] }
  0x30   :  { %v393_v10 = vld [vmem:[%s10008_s0 + $0xc9] sm:$0x7f]  ;;  %v392_v11 = vld [vmem:[%s10008_s0 + $0xc1] sm:$0xff]  ;;  %v395_v12 = vld [vmem:[%s10008_s0 + $0xd9] sm:$0x7f] }
  0x31   :  { %285 = vrot.lane.b32.xlu1 %v198_v42, %s8087_s13  ;;  %283 = vrot.lane.b32.xlu0 %v8294_v15, %s8087_s13  ;;  %v394_v13 = vld [vmem:[%s10008_s0 + $0xd1] sm:$0xff]  ;;  %v8580_v14 = vld [vmem:[%s10009_s1] sm:$0x7] }
  0x32   :  { %v8585_v15 = vld [vmem:[%s10009_s1 + $0x4] sm:$0x7]  ;;  %v8642_v24 = vld [vmem:[%s10011_s3 + $0x28] sm:$0xff]  ;;  %v8647_v25 = vld [vmem:[%s10011_s3 + $0x30] sm:$0xff] }
  0x33   :  { %v8617_v17 = vld [vmem:[%s10011_s3] sm:$0xff]  ;;  %v8652_v26 = vld [vmem:[%s10011_s3 + $0x38] sm:$0xff]  ;;  %v397_v27 = vld [vmem:[%s10008_s0 + $0xe9] sm:$0x7f] }
  0x34   :  { %v8637_v21 = vld [vmem:[%s10011_s3 + $0x20] sm:$0xff]  ;;  %v8670_v30 = vld [vmem:[%s10011_s3 + $0x48] sm:$0xff]  ;;  %v8675_v31 = vld [vmem:[%s10011_s3 + $0x50] sm:$0xff] }
  0x35   :  { %289 = vrot.lane.b32.xlu1 %v200_v44, %s8087_s13  ;;  %287 = vrot.lane.b32.xlu0 %v8305_v16, %s8087_s13  ;;  %v8590_v16 = vld [vmem:[%s10009_s1 + $0x8] sm:$0x7]  ;;  %v8665_v29 = vld [vmem:[%s10011_s3 + $0x40] sm:$0xff] }
  0x36   :  { %v396_v28 = vld [vmem:[%s10008_s0 + $0xe1] sm:$0xff]  ;;  %v8682_v32 = vld [vmem:[%s10011_s3 + $0x58] sm:$0xff]  ;;  %v8697_v35 = vld [vmem:[%s10011_s3 + $0x70] sm:$0xff] }
  0x37   :  { %v8687_v33 = vld [vmem:[%s10011_s3 + $0x60] sm:$0xff]  ;;  %v8692_v34 = vld [vmem:[%s10011_s3 + $0x68] sm:$0xff]  ;;  %v8702_v36 = vld [vmem:[%s10011_s3 + $0x78] sm:$0xff] }
  0x38   :  { %v8707_v39 = vld [vmem:[%s10011_s3 + $0x80] sm:$0xff]  ;;  %v8712_v40 = vld [vmem:[%s10011_s3 + $0x88] sm:$0xff]  ;;  %v399_v43 = vld [vmem:[%s10008_s0 + $0xf9] sm:$0x7f] }
  0x39   :  { %293 = vrot.lane.b32.xlu1 %v202_v46, %s8087_s13  ;;  %291 = vrot.lane.b32.xlu0 %v8315_v18, %s8087_s13  ;;  %v8622_v18 = vld [vmem:[%s10011_s3 + $0x8] sm:$0xff]  ;;  %v8717_v41 = vld [vmem:[%s10010_s2] ss:$0 sm:$0xff] }
  0x3a   :  { %v8724_v42 = vld [vmem:[%s10012_s4] ss:$0 sm:$0xff]  ;;  %v398_v44 = vld [vmem:[%s10008_s0 + $0xf1] sm:$0xff]  ;;  %s8796_s4 = smov 0  }
  0x3d   :  { %297 = vrot.lane.b32.xlu1 %v204_v47, %s8087_s13  ;;  %295 = vrot.lane.b32.xlu0 %v8320_v19, %s8087_s13  ;;  %v8627_v19 = vld [vmem:[%s10011_s3 + $0x10] sm:$0xff] }
  0x41   :  { %301 = vrot.lane.b32.xlu1 %v206_v48, %s8087_s13  ;;  %299 = vrot.lane.b32.xlu0 %v8327_v20, %s8087_s13  ;;  %v8632_v20 = vld [vmem:[%s10011_s3 + $0x18] sm:$0xff] }
  0x45   :  { %434 = vrot.lane.b32.xlu1 %v369_v49, %s8089_s30  ;;  %432 = vrot.lane.b32.xlu0 %v368_v50, %s8089_s30 }
  0x49   :  { %438 = vrot.lane.b32.xlu1 %v371_v51, %s8089_s30  ;;  %436 = vrot.lane.b32.xlu0 %v370_v52, %s8089_s30 }
  0x4d   :  { %442 = vrot.lane.b32.xlu1 %v373_v53, %s8089_s30  ;;  %440 = vrot.lane.b32.xlu0 %v372_v54, %s8089_s30 }
  0x51   :  { %446 = vrot.lane.b32.xlu1 %v375_v55, %s8089_s30  ;;  %444 = vrot.lane.b32.xlu0 %v374_v56, %s8089_s30 }
  0x55   :  { %450 = vrot.lane.b32.xlu1 %v377_v57, %s8089_s30  ;;  %448 = vrot.lane.b32.xlu0 %v376_v58, %s8089_s30 }
  0x59   :  { %454 = vrot.lane.b32.xlu1 %v379_v59, %s8089_s30  ;;  %452 = vrot.lane.b32.xlu0 %v378_v60, %s8089_s30 }
  0x5d   :  { %458 = vrot.lane.b32.xlu1 %v381_v61, %s8089_s30  ;;  %456 = vrot.lane.b32.xlu0 %v380_v62, %s8089_s30 }
  0x61   :  { %462 = vrot.lane.b32.xlu1 %v383_v63, %s8089_s30  ;;  %460 = vrot.lane.b32.xlu0 %v382_v0, %s8089_s30 }
  0x65   :  { %466 = vrot.lane.b32.xlu1 %v385_v1, %s8089_s30  ;;  %464 = vrot.lane.b32.xlu0 %v384_v2, %s8089_s30 }
  0x69   :  { %470 = vrot.lane.b32.xlu1 %v387_v3, %s8089_s30  ;;  %468 = vrot.lane.b32.xlu0 %v386_v4, %s8089_s30 }
  0x6d   :  { %474 = vrot.lane.b32.xlu1 %v389_v5, %s8089_s30  ;;  %472 = vrot.lane.b32.xlu0 %v388_v7, %s8089_s30 }
  0x71   :  { %478 = vrot.lane.b32.xlu1 %v391_v8, %s8089_s30  ;;  %476 = vrot.lane.b32.xlu0 %v390_v9, %s8089_s30 }
  0x74   :  { %v244_v22 = vpop.permute.xlu1 %243  ;;  %v240_v23 = vpop.permute.xlu0 %239 }
  0x75   :  { %482 = vrot.lane.b32.xlu1 %v393_v10, %s8089_s30  ;;  %480 = vrot.lane.b32.xlu0 %v392_v11, %s8089_s30  ;;  %338 = vst.msk [vmem:[#allocation2 + $0x20] sm:$0xff] %vm335_vm4, %v244_v22  ;;  %336 = vst.msk [vmem:[#allocation2 + $0x10] sm:$0xff] %vm335_vm4, %v240_v23 }
  0x78   :  { %v246_v37 = vpop.permute.xlu1 %245  ;;  %v242_v38 = vpop.permute.xlu0 %241 }
  0x79   :  { %486 = vrot.lane.b32.xlu1 %v395_v12, %s8089_s30  ;;  %484 = vrot.lane.b32.xlu0 %v394_v13, %s8089_s30  ;;  %339 = vst.msk [vmem:[#allocation2 + $0x28] sm:$0xff] %vm335_vm4, %v246_v37  ;;  %337 = vst.msk [vmem:[#allocation2 + $0x18] sm:$0xff] %vm335_vm4, %v242_v38 }
  0x7c   :  { %v250_v45 = vpop.permute.xlu1 %249  ;;  %v248_v46 = vpop.permute.xlu0 %247 }
  0x7d   :  { %490 = vrot.lane.b32.xlu1 %v397_v27, %s8089_s30  ;;  %488 = vrot.lane.b32.xlu0 %v396_v28, %s8089_s30  ;;  %341 = vst.msk [vmem:[#allocation2 + $0x38] sm:$0xff] %vm335_vm4, %v250_v45  ;;  %340 = vst.msk [vmem:[#allocation2 + $0x30] sm:$0xff] %vm335_vm4, %v248_v46 }
  0x80   :  { %v254_v47 = vpop.permute.xlu1 %253  ;;  %v252_v48 = vpop.permute.xlu0 %251 }
  0x81   :  { %494 = vrot.lane.b32.xlu1 %v399_v43, %s8089_s30  ;;  %492 = vrot.lane.b32.xlu0 %v398_v44, %s8089_s30  ;;  %343 = vst.msk [vmem:[#allocation2 + $0x48] sm:$0xff] %vm335_vm4, %v254_v47  ;;  %342 = vst.msk [vmem:[#allocation2 + $0x40] sm:$0xff] %vm335_vm4, %v252_v48 }
  0x84   :  { %v258_v49 = vpop.permute.xlu1 %257  ;;  %v256_v50 = vpop.permute.xlu0 %255 }
  0x85   :  { %345 = vst.msk [vmem:[#allocation2 + $0x58] sm:$0xff] %vm335_vm4, %v258_v49  ;;  %344 = vst.msk [vmem:[#allocation2 + $0x50] sm:$0xff] %vm335_vm4, %v256_v50 }
  0x88   :  { %v262_v51 = vpop.permute.xlu1 %261  ;;  %v260_v52 = vpop.permute.xlu0 %259 }
  0x89   :  { %347 = vst.msk [vmem:[#allocation2 + $0x68] sm:$0xff] %vm335_vm4, %v262_v51  ;;  %346 = vst.msk [vmem:[#allocation2 + $0x60] sm:$0xff] %vm335_vm4, %v260_v52 }
  0x8c   :  { %v266_v53 = vpop.permute.xlu1 %265  ;;  %v264_v54 = vpop.permute.xlu0 %263 }
  0x8d   :  { %349 = vst.msk [vmem:[#allocation2 + $0x78] sm:$0xff] %vm335_vm4, %v266_v53  ;;  %348 = vst.msk [vmem:[#allocation2 + $0x70] sm:$0xff] %vm335_vm4, %v264_v54 }
  0x93   :  { %v270_v55 = vpop.permute.xlu1 %269  ;;  %v268_v56 = vpop.permute.xlu0 %267 }
  0x94   :  { %351 = vst.msk [vmem:[#allocation2 + $0x88] sm:$0xff] %vm335_vm4, %v270_v55  ;;  %350 = vst.msk [vmem:[#allocation2 + $0x80] sm:$0xff] %vm335_vm4, %v268_v56 }
  0x97   :  { %v274_v57 = vpop.permute.xlu1 %273  ;;  %v272_v58 = vpop.permute.xlu0 %271 }
  0x98   :  { %353 = vst.msk [vmem:[#allocation2 + $0x98] sm:$0xff] %vm335_vm4, %v274_v57  ;;  %352 = vst.msk [vmem:[#allocation2 + $0x90] sm:$0xff] %vm335_vm4, %v272_v58 }
  0x9b   :  { %v278_v59 = vpop.permute.xlu1 %277  ;;  %v276_v60 = vpop.permute.xlu0 %275 }
  0x9c   :  { %355 = vst.msk [vmem:[#allocation2 + $0xa8] sm:$0xff] %vm335_vm4, %v278_v59  ;;  %354 = vst.msk [vmem:[#allocation2 + $0xa0] sm:$0xff] %vm335_vm4, %v276_v60 }
  0x9f   :  { %v282_v61 = vpop.permute.xlu1 %281  ;;  %v280_v62 = vpop.permute.xlu0 %279 }
  0xa0   :  { %357 = vst.msk [vmem:[#allocation2 + $0xb8] sm:$0xff] %vm335_vm4, %v282_v61  ;;  %356 = vst.msk [vmem:[#allocation2 + $0xb0] sm:$0xff] %vm335_vm4, %v280_v62 }
  0xa3   :  { %v286_v63 = vpop.permute.xlu1 %285  ;;  %v284_v0 = vpop.permute.xlu0 %283 }
  0xa4   :  { %359 = vst.msk [vmem:[#allocation2 + $0xc8] sm:$0xff] %vm335_vm4, %v286_v63  ;;  %358 = vst.msk [vmem:[#allocation2 + $0xc0] sm:$0xff] %vm335_vm4, %v284_v0 }
  0xa7   :  { %v290_v1 = vpop.permute.xlu1 %289  ;;  %v288_v2 = vpop.permute.xlu0 %287 }
  0xa8   :  { %361 = vst.msk [vmem:[#allocation2 + $0xd8] sm:$0xff] %vm335_vm4, %v290_v1  ;;  %360 = vst.msk [vmem:[#allocation2 + $0xd0] sm:$0xff] %vm335_vm4, %v288_v2 }
  0xab   :  { %v294_v3 = vpop.permute.xlu1 %293  ;;  %v292_v4 = vpop.permute.xlu0 %291 }
  0xac   :  { %363 = vst.msk [vmem:[#allocation2 + $0xe8] sm:$0xff] %vm335_vm4, %v294_v3  ;;  %362 = vst.msk [vmem:[#allocation2 + $0xe0] sm:$0xff] %vm335_vm4, %v292_v4 }
  0xaf   :  { %v298_v5 = vpop.permute.xlu1 %297  ;;  %v296_v7 = vpop.permute.xlu0 %295 }
  0xb0   :  { %365 = vst.msk [vmem:[#allocation2 + $0xf8] sm:$0xff] %vm335_vm4, %v298_v5  ;;  %364 = vst.msk [vmem:[#allocation2 + $0xf0] sm:$0xff] %vm335_vm4, %v296_v7 }
  0xb3   :  { %v302_v8 = vpop.permute.xlu1 %301  ;;  %v300_v9 = vpop.permute.xlu0 %299 }
  0xb4   :  { %367 = vst.msk [vmem:[#allocation2 + $0x108] sm:$0xff] %vm335_vm4, %v302_v8  ;;  %366 = vst.msk [vmem:[#allocation2 + $0x100] sm:$0xff] %vm335_vm4, %v300_v9 }
  0xb7   :  { %v435_v10 = vpop.permute.xlu1 %434  ;;  %v433_v11 = vpop.permute.xlu0 %432 }
  0xb8   :  { %531 = vst.msk [vmem:[#allocation2 + $0x18] sm:$0x7f] %vm530_vm5, %v435_v10 }
  0xb9   :  { %529 = vst.msk [vmem:[#allocation2 + $0x10] sm:$0xff] %vm528_vm6, %v433_v11 }
  0xbb   :  { %v439_v12 = vpop.permute.xlu1 %438  ;;  %v437_v13 = vpop.permute.xlu0 %436 }
  0xbc   :  { %533 = vst.msk [vmem:[#allocation2 + $0x28] sm:$0x7f] %vm530_vm5, %v439_v12 }
  0xbd   :  { %532 = vst.msk [vmem:[#allocation2 + $0x20] sm:$0xff] %vm528_vm6, %v437_v13 }
  0xbf   :  { %v443_v22 = vpop.permute.xlu1 %442  ;;  %v441_v23 = vpop.permute.xlu0 %440 }
  0xc0   :  { %535 = vst.msk [vmem:[#allocation2 + $0x38] sm:$0x7f] %vm530_vm5, %v443_v22 }
  0xc1   :  { %534 = vst.msk [vmem:[#allocation2 + $0x30] sm:$0xff] %vm528_vm6, %v441_v23 }
  0xc3   :  { %v447_v27 = vpop.permute.xlu1 %446  ;;  %v445_v28 = vpop.permute.xlu0 %444 }
  0xc4   :  { %537 = vst.msk [vmem:[#allocation2 + $0x48] sm:$0x7f] %vm530_vm5, %v447_v27 }
  0xc5   :  { %536 = vst.msk [vmem:[#allocation2 + $0x40] sm:$0xff] %vm528_vm6, %v445_v28 }
  0xc7   :  { %v451_v37 = vpop.permute.xlu1 %450  ;;  %v449_v38 = vpop.permute.xlu0 %448 }
  0xc8   :  { %539 = vst.msk [vmem:[#allocation2 + $0x58] sm:$0x7f] %vm530_vm5, %v451_v37 }
  0xc9   :  { %538 = vst.msk [vmem:[#allocation2 + $0x50] sm:$0xff] %vm528_vm6, %v449_v38 }
  0xcb   :  { %v455_v43 = vpop.permute.xlu1 %454  ;;  %v453_v44 = vpop.permute.xlu0 %452 }
  0xcc   :  { %541 = vst.msk [vmem:[#allocation2 + $0x68] sm:$0x7f] %vm530_vm5, %v455_v43 }
  0xcd   :  { %540 = vst.msk [vmem:[#allocation2 + $0x60] sm:$0xff] %vm528_vm6, %v453_v44 }
  0xcf   :  { %v459_v45 = vpop.permute.xlu1 %458  ;;  %v457_v46 = vpop.permute.xlu0 %456 }
  0xd0   :  { %543 = vst.msk [vmem:[#allocation2 + $0x78] sm:$0x7f] %vm530_vm5, %v459_v45 }
  0xd1   :  { %542 = vst.msk [vmem:[#allocation2 + $0x70] sm:$0xff] %vm528_vm6, %v457_v46 }
  0xd3   :  { %v463_v47 = vpop.permute.xlu1 %462  ;;  %v461_v48 = vpop.permute.xlu0 %460 }
  0xd4   :  { %545 = vst.msk [vmem:[#allocation2 + $0x88] sm:$0x7f] %vm530_vm5, %v463_v47 }
  0xd5   :  { %544 = vst.msk [vmem:[#allocation2 + $0x80] sm:$0xff] %vm528_vm6, %v461_v48 }
  0xd7   :  { %v467_v49 = vpop.permute.xlu1 %466  ;;  %v465_v50 = vpop.permute.xlu0 %464 }
  0xd8   :  { %547 = vst.msk [vmem:[#allocation2 + $0x98] sm:$0x7f] %vm530_vm5, %v467_v49 }
  0xd9   :  { %546 = vst.msk [vmem:[#allocation2 + $0x90] sm:$0xff] %vm528_vm6, %v465_v50 }
  0xdb   :  { %v471_v51 = vpop.permute.xlu1 %470  ;;  %v469_v52 = vpop.permute.xlu0 %468 }
  0xdc   :  { %549 = vst.msk [vmem:[#allocation2 + $0xa8] sm:$0x7f] %vm530_vm5, %v471_v51 }
  0xdd   :  { %548 = vst.msk [vmem:[#allocation2 + $0xa0] sm:$0xff] %vm528_vm6, %v469_v52 }
  0xdf   :  { %v475_v53 = vpop.permute.xlu1 %474  ;;  %v473_v54 = vpop.permute.xlu0 %472 }
  0xe0   :  { %551 = vst.msk [vmem:[#allocation2 + $0xb8] sm:$0x7f] %vm530_vm5, %v475_v53 }
  0xe1   :  { %550 = vst.msk [vmem:[#allocation2 + $0xb0] sm:$0xff] %vm528_vm6, %v473_v54 }
  0xe3   :  { %v479_v55 = vpop.permute.xlu1 %478  ;;  %v477_v56 = vpop.permute.xlu0 %476 }
  0xe4   :  { %553 = vst.msk [vmem:[#allocation2 + $0xc8] sm:$0x7f] %vm530_vm5, %v479_v55 }
  0xe5   :  { %552 = vst.msk [vmem:[#allocation2 + $0xc0] sm:$0xff] %vm528_vm6, %v477_v56 }
  0xe7   :  { %v483_v57 = vpop.permute.xlu1 %482  ;;  %v481_v58 = vpop.permute.xlu0 %480 }
  0xe8   :  { %555 = vst.msk [vmem:[#allocation2 + $0xd8] sm:$0x7f] %vm530_vm5, %v483_v57 }
  0xe9   :  { %554 = vst.msk [vmem:[#allocation2 + $0xd0] sm:$0xff] %vm528_vm6, %v481_v58 }
  0xeb   :  { %v487_v59 = vpop.permute.xlu1 %486  ;;  %v485_v60 = vpop.permute.xlu0 %484 }
  0xec   :  { %557 = vst.msk [vmem:[#allocation2 + $0xe8] sm:$0x7f] %vm530_vm5, %v487_v59 }
  0xed   :  { %556 = vst.msk [vmem:[#allocation2 + $0xe0] sm:$0xff] %vm528_vm6, %v485_v60 }
  0xef   :  { %v491_v61 = vpop.permute.xlu1 %490  ;;  %v489_v62 = vpop.permute.xlu0 %488 }
  0xf0   :  { %559 = vst.msk [vmem:[#allocation2 + $0xf8] sm:$0x7f] %vm530_vm5, %v491_v61 }
  0xf1   :  { %558 = vst.msk [vmem:[#allocation2 + $0xf0] sm:$0xff] %vm528_vm6, %v489_v62 }
  0xf3   :  { %v495_v63 = vpop.permute.xlu1 %494  ;;  %v493_v0 = vpop.permute.xlu0 %492 }
  0xf4   :  { %561 = vst.msk [vmem:[#allocation2 + $0x108] sm:$0x7f] %vm530_vm5, %v495_v63 }
  0xf5   :  { %560 = vst.msk [vmem:[#allocation2 + $0x100] sm:$0xff] %vm528_vm6, %v493_v0 }
  0xf6 LB: > { %vm587_vm7 = vcmask 1042432   ;;  %v8090_v1 = vmov 0.0   ;;  %s6557_s17 = sshll.u32 %s8073_s4, 5  ;;  %vm8091_vm8 = vmmov 0   ;;  %s6279_s19 = sshll.u32 %s8073_s4, 3  ;;  %vm1486_vm10 = vcmask 129024   ;;  %s8073_s4 = sphi %s8796_s4, %s567_s4  }
  0xf7   : > { %6888 = vmatprep.subr.mxu0 %v8090_v1  ;;  %6903 = vmatprep.subr.mxu1 %v8090_v1  ;;  %s8808_s18 = scalar_lea.vmem [#allocation2], %s6557_s17  ;;  %s8092_s20 = smov 16   ;;  %vm1492_vm11 = vcmask 261248   ;;  %vm1497_vm12 = vcmask 392449  }
  0xf8   : > { %6889 = vmatpush3.msk.msra.mxu0 %vm587_vm7, %v8585_v15  ;;  %6904 = vmatpush3.msk.msra.mxu1 %vm587_vm7, %v8585_v15  ;;  %s6145_s21 = scalar_lea.vmem [#allocation3], %s6279_s19  ;;  %s8093_s22 = smov 32  }
  0xf9   : > { %6890 = vmatprep.mubr.msk.f32.mxu0 %vm8091_vm8, %v8090_v1  ;;  %6893 = vmatprep.subr.mxu0 %v8090_v1  ;;  %s567_s4 = sadd.s32 1, %s8073_s4  }
  0xfa   : > { %6905 = vmatprep.mubr.msk.f32.mxu1 %vm8091_vm8, %v8090_v1  ;;  %6908 = vmatprep.subr.mxu1 %v8090_v1  ;;  %p564_p0 = scmp.ge.s32.totalorder %s567_s4, 8  }
  0xfb   :  { %s8868_s23 = smov (%p564_p0), 0  }
  0xfc   : > { %v6244_v2 = vld [vmem:[%s8808_s18 + $0x10] ss:$2 sm:$0xff]  ;;  %v6247_v3 = vld [vmem:[%s8808_s18 + $0x20] ss:$2 sm:$0xff]  ;;  %v6264_v7 = vld [vmem:[%s8808_s18 + $0x11] ss:$2 sm:$0xff] }
  0xfd   : > { %6891 = vmatmul.mubr.msk.f32.vlgmr.msra.gmra.mrb[0].mxu0 %vm60_vm0, %v6244_v2  ;;  %6906 = vmatmul.mubr.msk.f32.vlgmr.msra.gmra.mrb[0].mxu1 %vm60_vm0, %v6247_v3  ;;  %v571_v4 = vld [vmem:[%s8808_s18] ss:$2 sm:$0xff]  ;;  %v6250_v5 = vld [vmem:[%s8808_s18 + $0x30] ss:$2 sm:$0xff]  ;;  %v6265_v8 = vld [vmem:[%s8808_s18 + $0x21] ss:$2 sm:$0xff] }
  0xfe   : > { %6894 = vmatpush3.msk.msra.mxu0 %vm587_vm7, %v8580_v14  ;;  %6909 = vmatpush3.msk.msra.mxu1 %vm587_vm7, %v8580_v14  ;;  %v6263_v9 = vld [vmem:[%s8808_s18 + $0x1] ss:$2 sm:$0xff]  ;;  %v6266_v10 = vld [vmem:[%s8808_s18 + $0x31] ss:$2 sm:$0xff] }
  0xff   : > { %6895 = vmatprep.mubr.msk.f32.mxu0 %vm8091_vm8, %v8090_v1  ;;  %6898 = vmatprep.subr.mxu0 %v8090_v1 }
 0x100   : > { %6910 = vmatprep.mubr.msk.f32.mxu1 %vm8091_vm8, %v8090_v1  ;;  %6913 = vmatprep.subr.mxu1 %v8090_v1 }
 0x105   : > { %6896 = vmatmul.mubr.msk.f32.vlgmr.msra.gmra.mrb[0].mxu0 %vm60_vm0, %v571_v4  ;;  %6911 = vmatmul.mubr.msk.f32.vlgmr.msra.gmra.mrb[0].mxu1 %vm60_vm0, %v6244_v2 }
 0x106   : > { %6899 = vmatpush3.msk.msra.mxu0 %vm587_vm7, %v8590_v16  ;;  %6914 = vmatpush3.msk.msra.mxu1 %vm587_vm7, %v8590_v16 }
 0x107   : > { %6900 = vmatprep.mubr.msk.f32.mxu0 %vm8091_vm8, %v8090_v1  ;;  %6915 = vmatprep.mubr.msk.f32.mxu1 %vm8091_vm8, %v8090_v1 }
 0x108   : > { %6918 = vmatprep.subr.mxu0 %v8090_v1  ;;  %6933 = vmatprep.subr.mxu1 %v8090_v1 }
 0x10d   : > { %6901 = vmatmul.mubr.msk.f32.vlgmr.msra.gmra.mrb[0].mxu0 %vm60_vm0, %v6247_v3  ;;  %6916 = vmatmul.mubr.msk.f32.vlgmr.msra.gmra.mrb[0].mxu1 %vm60_vm0, %v6250_v5 }
 0x10e   : > { %6919 = vmatpush3.msk.msra.mxu0 %vm587_vm7, %v8585_v15  ;;  %6934 = vmatpush3.msk.msra.mxu1 %vm587_vm7, %v8585_v15 }
 0x10f   : > { %6920 = vmatprep.mubr.msk.f32.mxu0 %vm8091_vm8, %v8090_v1  ;;  %6923 = vmatprep.subr.mxu0 %v8090_v1 }
 0x110   : > { %6935 = vmatprep.mubr.msk.f32.mxu1 %vm8091_vm8, %v8090_v1  ;;  %6938 = vmatprep.subr.mxu1 %v8090_v1 }
 0x111   : > { %6921 = vmatmul.mubr.msk.f32.vlgmr.msra.gmra.mrb[2].mxu0 %vm60_vm0, %v6264_v7  ;;  %6936 = vmatmul.mubr.msk.f32.vlgmr.msra.gmra.mrb[2].mxu1 %vm60_vm0, %v6265_v8 }
 0x112   : > { %6924 = vmatpush3.msk.msra.mxu0 %vm587_vm7, %v8580_v14  ;;  %6939 = vmatpush3.msk.msra.mxu1 %vm587_vm7, %v8580_v14 }
 0x113   : > { %6925 = vmatprep.mubr.msk.f32.mxu0 %vm8091_vm8, %v8090_v1  ;;  %6928 = vmatprep.subr.mxu0 %v8090_v1 }
 0x114   : > { %6940 = vmatprep.mubr.msk.f32.mxu1 %vm8091_vm8, %v8090_v1  ;;  %6943 = vmatprep.subr.mxu1 %v8090_v1 }
 0x119   : > { %6926 = vmatmul.mubr.msk.f32.vlgmr.msra.gmra.mrb[2].mxu0 %vm60_vm0, %v6263_v9  ;;  %6941 = vmatmul.mubr.msk.f32.vlgmr.msra.gmra.mrb[2].mxu1 %vm60_vm0, %v6264_v7 }
 0x11a   : > { %6929 = vmatpush3.msk.msra.mxu0 %vm587_vm7, %v8590_v16  ;;  %6944 = vmatpush3.msk.msra.mxu1 %vm587_vm7, %v8590_v16 }
 0x11b   : > { %6930 = vmatprep.mubr.msk.f32.mxu0 %vm8091_vm8, %v8090_v1  ;;  %6945 = vmatprep.mubr.msk.f32.mxu1 %vm8091_vm8, %v8090_v1 }
 0x121   : > { %6931 = vmatmul.mubr.msk.f32.vlgmr.msra.gmra.mrb[2].mxu0 %vm60_vm0, %v6265_v8  ;;  %6946 = vmatmul.mubr.msk.f32.vlgmr.msra.gmra.mrb[2].mxu1 %vm60_vm0, %v6266_v10 }
 0x1e0   : > { %v809_v11 = vpop.f32.mrb[0].mxu0  ;;  %v1023_v12 = vpop.f32.mrb[0].mxu1 }
 0x1e1   : > { %v1028_v13 = vmax.f32 %v809_v11, %v1023_v12  ;;  %v6902_v22 = vpop.f32.mrb[1].mxu0  ;;  %v6917_v23 = vpop.f32.mrb[1].mxu1 }
 0x1f4   : > { %v1252_v27 = vpop.f32.mrb[2].mxu0  ;;  %v1466_v28 = vpop.f32.mrb[2].mxu1 }
 0x1f5   : > { %v1471_v37 = vmax.f32 %v1252_v27, %v1466_v28  ;;  %v6932_v38 = vpop.f32.mrb[3].mxu0  ;;  %v6947_v43 = vpop.f32.mrb[3].mxu1 }
 0x1f7   : > { %v1472_v44 = vmax.f32 %v1028_v13, %v1471_v37 }
 0x1f9   : > { %v1479_v45 = vadd.f32 %v8717_v41, %v1472_v44 }
 0x1fb   : > { %vm1480_vm9 = vcmp.gt.f32.partialorder %v1479_v45, 0.0  ;;  %v1481_v46 = vmul.f32 0.01, %v1479_v45 }
 0x1fd   : > { %v1482_v47 = vsel %vm1480_vm9, %v1479_v45, %v1481_v46 }
 0x1fe   : > { %1489 = vrot.lane.b32.xlu0 %v1482_v47, %s8092_s20  ;;  %6280 = vst.msk [vmem:[%s6145_s21 + $0x9] sm:$0x7f] %vm1486_vm10, %v1482_v47 }
 0x202   : > { %1494 = vrot.lane.b32.xlu0 %v1482_v47, %s8093_s22 }
 0x26f   :  { %566 = sbr.rel (!%p564_p0) target bundleno = 246 (0xf6), region = 156 }
 0x270   : > { %v1490_v48 = vpop.permute.xlu0 %1489 }
 0x271   : > { %6281 = vst.msk [vmem:[%s6145_s21 + $0x8] sm:$0xff] %vm1492_vm11, %v1490_v48 }
 0x274   : > { %v1495_v49 = vpop.permute.xlu0 %1494 }
 0x275   : > { %6282 = vst.msk [vmem:[%s6145_s21 + $0x7] sm:$0xfe] %vm1497_vm12, %v1495_v49 }
 0x276 LB: > { %v8875_v50 = vpack.c.bf16 %v8652_v26, %v8647_v25  ;;  %v8094_v51 = vmov 0.0|0.0   ;;  %v8883_v52 = vpack.c.bf16 %v8670_v30, %v8665_v29  ;;  %vm8095_vm13 = vmmov 0   ;;  %s6561_s24 = sshll.u32 %s8077_s23, 4  ;;  %s6310_s26 = sshll.u32 %s8077_s23, 2  ;;  %s8077_s23 = sphi %s8868_s23, %s1504_s23  }
 0x277   : > { %7579 = vmatprep.subr.bf16.mxu0 %v8094_v51  ;;  %7606 = vmatprep.subr.bf16.mxu1 %v8094_v51  ;;  %v8096_v53 = vmov 0.0   ;;  %v8896_v54 = vpack.c.bf16 %v8682_v32, %v8675_v31  ;;  %s8902_s25 = scalar_lea.vmem [#allocation3], %s6561_s24  ;;  %v8907_v56 = vpack.c.bf16 %v8622_v18, %v8617_v17  ;;  %v8918_v58 = vpack.c.bf16 %v8632_v20, %v8627_v19  ;;  %s2411_s27 = scalar_lea.vmem [#allocation4], %s6310_s26 }
 0x278   : > { %7581 = vmatpush3.bf16.msra.mxu0 %v8875_v50  ;;  %7608 = vmatpush3.bf16.msra.mxu1 %v8875_v50  ;;  %v8930_v59 = vpack.c.bf16 %v8642_v24, %v8637_v21  ;;  %v8939_v61 = vpack.c.bf16 %v8692_v34, %v8687_v33  ;;  %v8949_v62 = vpack.c.bf16 %v8702_v36, %v8697_v35  ;;  %vm2412_vm15 = vcmask 257024   ;;  %s1504_s23 = sadd.s32 1, %s8077_s23  }
 0x279   : > { %7582 = vmatprep.subr.bf16.mxu0 %v8094_v51  ;;  %7609 = vmatprep.subr.bf16.mxu1 %v8094_v51  ;;  %v8961_v63 = vpack.c.bf16 %v8712_v40, %v8707_v39  ;;  %p1501_p1 = scmp.ge.s32.totalorder %s1504_s23, 4  }
 0x27a   : > { %6960 = vmatprep.mubr.msk.f32.mxu0 %vm8095_vm13, %v8096_v53  ;;  %7005 = vmatprep.mubr.msk.f32.mxu1 %vm8095_vm13, %v8096_v53  ;;  %v6345_v43 = vld [vmem:[%s10008_s0 + $0x110] sm:$0xff] (%p1501_p1)  ;;  %v6343_v44 = vld [vmem:[%s10008_s0 + $0x100] sm:$0xff] (%p1501_p1)  ;;  %v6346_v45 = vld [vmem:[%s10008_s0 + $0x118] sm:$0xff] (%p1501_p1) }
 0x27b   :  { %2547 = vrot.lane.b32.xlu1 (%p1501_p1), %v6345_v43, %s8087_s13  ;;  %2543 = vrot.lane.b32.xlu0 (%p1501_p1), %v6343_v44, %s8087_s13  ;;  %2449 = vst.msk [vmem:[#allocation2 + $0x21] sm:$0xff] (%p1501_p1), %vm141_vm1, %v6345_v43  ;;  %2447 = vst.msk [vmem:[#allocation2 + $0x11] sm:$0xff] (%p1501_p1), %vm141_vm1, %v6343_v44  ;;  %v6344_v17 = vld [vmem:[%s10008_s0 + $0x108] sm:$0xff] (%p1501_p1)  ;;  %v6347_v18 = vld [vmem:[%s10008_s0 + $0x120] sm:$0xff] (%p1501_p1) }
 0x27c   : > { %7584 = vmatpush3.bf16.msra.mxu0 %v8883_v52  ;;  %7611 = vmatpush3.bf16.msra.mxu1 %v8883_v52  ;;  %v6287_v55 = vld [vmem:[%s8902_s25 + $0x8] ss:$2 sm:$0xf]  ;;  %v6290_v57 = vld [vmem:[%s8902_s25 + $0x10] ss:$2 sm:$0xf] }
 0x27d   : > { %7585 = vmatprep.subr.bf16.mxu0 %v8094_v51  ;;  %7612 = vmatprep.subr.bf16.mxu1 %v8094_v51  ;;  %v1508_v60 = vld [vmem:[%s8902_s25] ss:$2 sm:$0xf]  ;;  %v6293_v0 = vld [vmem:[%s8902_s25 + $0x18] ss:$2 sm:$0xf] }
 0x27e   : > { %v6301_v1 = vld [vmem:[%s8902_s25 + $0x9] ss:$2 sm:$0xf]  ;;  %v6302_v2 = vld [vmem:[%s8902_s25 + $0x11] ss:$2 sm:$0xf] }
 0x27f   : > { %v6300_v3 = vld [vmem:[%s8902_s25 + $0x1] ss:$2 sm:$0xf]  ;;  %v6303_v4 = vld [vmem:[%s8902_s25 + $0x19] ss:$2 sm:$0xf]  ;;  %2549 = vrot.lane.b32.xlu1 (%p1501_p1), %v6346_v45, %s8087_s13  ;;  %2545 = vrot.lane.b32.xlu0 (%p1501_p1), %v6344_v17, %s8087_s13 }
 0x280   : > { %7587 = vmatpush3.bf16.msra.mxu0 %v8896_v54  ;;  %7614 = vmatpush3.bf16.msra.mxu1 %v8896_v54  ;;  %v6349_v19 = vld [vmem:[%s10008_s0 + $0x130] sm:$0xff] (%p1501_p1)  ;;  %v6351_v20 = vld [vmem:[%s10008_s0 + $0x140] sm:$0xff] (%p1501_p1)  ;;  %2451 = vst.msk [vmem:[#allocation2 + $0x31] sm:$0xff] (%p1501_p1), %vm141_vm1, %v6347_v18  ;;  %v6348_v26 = vld [vmem:[%s10008_s0 + $0x128] sm:$0xff] (%p1501_p1) }
 0x281   : > { %7588 = vmatprep.subr.bf16.mxu0 %v8094_v51  ;;  %7615 = vmatprep.subr.bf16.mxu1 %v8094_v51  ;;  %2453 = vst.msk [vmem:[#allocation2 + $0x41] sm:$0xff] (%p1501_p1), %vm141_vm1, %v6349_v19  ;;  %v6353_v21 = vld [vmem:[%s10008_s0 + $0x150] sm:$0xff] (%p1501_p1)  ;;  %v6355_v24 = vld [vmem:[%s10008_s0 + $0x160] sm:$0xff] (%p1501_p1)  ;;  %2455 = vst.msk [vmem:[#allocation2 + $0x51] sm:$0xff] (%p1501_p1), %vm141_vm1, %v6351_v20 }
 0x282   :  { %v6357_v25 = vld [vmem:[%s10008_s0 + $0x170] sm:$0xff] (%p1501_p1)  ;;  %2457 = vst.msk [vmem:[#allocation2 + $0x61] sm:$0xff] (%p1501_p1), %vm141_vm1, %v6353_v21  ;;  %2459 = vst.msk [vmem:[#allocation2 + $0x71] sm:$0xff] (%p1501_p1), %vm141_vm1, %v6355_v24  ;;  %v6359_v29 = vld [vmem:[%s10008_s0 + $0x180] sm:$0xff] (%p1501_p1) }
 0x283   : > { %6961 = vmatmul.mubr.msk.f32.vlgmr.msra.gmra.mrb[0].mxu0 %vm97_vm3, %v6287_v55  ;;  %7006 = vmatmul.mubr.msk.f32.vlgmr.msra.gmra.mrb[0].mxu1 %vm97_vm3, %v6290_v57  ;;  %2461 = vst.msk [vmem:[#allocation2 + $0x81] sm:$0xff] (%p1501_p1), %vm141_vm1, %v6357_v25  ;;  %v6361_v30 = vld [vmem:[%s10008_s0 + $0x190] sm:$0xff] (%p1501_p1)  ;;  %v9088_v31 = vld [vmem:[%s10008_s0 + $0x1a0] sm:$0xff] (%p1501_p1)  ;;  %2463 = vst.msk [vmem:[#allocation2 + $0x91] sm:$0xff] (%p1501_p1), %vm141_vm1, %v6359_v29 }
 0x284   : > { %7590 = vmatpush3.bf16.msra.mxu0 %v8907_v56  ;;  %7617 = vmatpush3.bf16.msra.mxu1 %v8907_v56  ;;  %v9094_v32 = vld [vmem:[%s10008_s0 + $0x1b0] sm:$0xff] (%p1501_p1)  ;;  %2465 = vst.msk [vmem:[#allocation2 + $0xa1] sm:$0xff] (%p1501_p1), %vm141_vm1, %v6361_v30  ;;  %2467 = vst.msk [vmem:[#allocation2 + $0xb1] sm:$0xff] (%p1501_p1), %vm141_vm1, %v9088_v31  ;;  %v9104_v33 = vld [vmem:[%s10008_s0 + $0x1c0] sm:$0xff] (%p1501_p1) }
 0x285   : > { %7591 = vmatprep.subr.bf16.mxu0 %v8094_v51  ;;  %7618 = vmatprep.subr.bf16.mxu1 %v8094_v51  ;;  %2469 = vst.msk [vmem:[#allocation2 + $0xc1] sm:$0xff] (%p1501_p1), %vm141_vm1, %v9094_v32  ;;  %v6350_v34 = vld [vmem:[%s10008_s0 + $0x138] sm:$0xff] (%p1501_p1)  ;;  %v9114_v35 = vld [vmem:[%s10008_s0 + $0x1d0] sm:$0xff] (%p1501_p1)  ;;  %v9119_v36 = vld [vmem:[%s10008_s0 + $0x1e0] sm:$0xff] (%p1501_p1) }
 0x286   : > { %6975 = vmatprep.mubr.msk.f32.mxu0 %vm8095_vm13, %v8096_v53  ;;  %7020 = vmatprep.mubr.msk.f32.mxu1 %vm8095_vm13, %v8096_v53  ;;  %2471 = vst.msk [vmem:[#allocation2 + $0xd1] sm:$0xff] (%p1501_p1), %vm141_vm1, %v9104_v33  ;;  %v9126_v39 = vld [vmem:[%s10008_s0 + $0x1f0] sm:$0xff] (%p1501_p1)  ;;  %2473 = vst.msk [vmem:[#allocation2 + $0xe1] sm:$0xff] (%p1501_p1), %vm141_vm1, %v9114_v35  ;;  %v6352_v40 = vld [vmem:[%s10008_s0 + $0x148] sm:$0xff] (%p1501_p1) }
 0x287   :  { %2553 = vrot.lane.b32.xlu1 (%p1501_p1), %v6348_v26, %s8087_s13  ;;  %2551 = vrot.lane.b32.xlu0 (%p1501_p1), %v6347_v18, %s8087_s13  ;;  %2475 = vst.msk [vmem:[#allocation2 + $0xf1] sm:$0xff] (%p1501_p1), %vm141_vm1, %v9119_v36  ;;  %2477 = vst.msk [vmem:[#allocation2 + $0x101] sm:$0xff] (%p1501_p1), %vm141_vm1, %v9126_v39  ;;  %v6354_v46 = vld [vmem:[%s10008_s0 + $0x158] sm:$0xff] (%p1501_p1)  ;;  %v6356_v47 = vld [vmem:[%s10008_s0 + $0x168] sm:$0xff] (%p1501_p1) }
 0x288   : > { %7593 = vmatpush3.bf16.msra.mxu0 %v8918_v58  ;;  %7620 = vmatpush3.bf16.msra.mxu1 %v8918_v58  ;;  %v6312_v48 = vld [vmem:[%s10008_s0 + $0x108] sm:$0x7f] (%p1501_p1)  ;;  %v6314_v49 = vld [vmem:[%s10008_s0 + $0x118] sm:$0x7f] (%p1501_p1) }
 0x289   : > { %7594 = vmatprep.subr.bf16.mxu0 %v8094_v51  ;;  %7621 = vmatprep.subr.bf16.mxu1 %v8094_v51  ;;  %2448 = vst.msk [vmem:[#allocation2 + $0x19] sm:$0x7f] (%p1501_p1), %vm143_vm2, %v6312_v48  ;;  %2450 = vst.msk [vmem:[#allocation2 + $0x29] sm:$0x7f] (%p1501_p1), %vm143_vm2, %v6314_v49  ;;  %v6375_v43 = vld [vmem:[%s10008_s0 + $0x101] sm:$0xff] (%p1501_p1)  ;;  %v6377_v45 = vld [vmem:[%s10008_s0 + $0x111] sm:$0xff] (%p1501_p1) }
 0x28a   :  { %v6378_v44 = vld [vmem:[%s10008_s0 + $0x119] sm:$0x7f] (%p1501_p1)  ;;  %v6380_v17 = vld [vmem:[%s10008_s0 + $0x129] sm:$0x7f] (%p1501_p1)  ;;  %v6379_v18 = vld [vmem:[%s10008_s0 + $0x121] sm:$0xff] (%p1501_p1) }
 0x28b   :  { %2557 = vrot.lane.b32.xlu1 (%p1501_p1), %v6350_v34, %s8087_s13  ;;  %2555 = vrot.lane.b32.xlu0 (%p1501_p1), %v6349_v19, %s8087_s13  ;;  %v6382_v19 = vld [vmem:[%s10008_s0 + $0x139] sm:$0x7f] (%p1501_p1)  ;;  %v6385_v26 = vld [vmem:[%s10008_s0 + $0x151] sm:$0xff] (%p1501_p1) }
 0x28c   : > { %7596 = vmatpush3.bf16.msra.mxu0 %v8930_v59  ;;  %7623 = vmatpush3.bf16.msra.mxu1 %v8930_v59  ;;  %v6391_v34 = vld [vmem:[%s10008_s0 + $0x181] sm:$0xff] (%p1501_p1)  ;;  %v6400_v48 = vld [vmem:[%s10008_s0 + $0x1c9] sm:$0x7f] (%p1501_p1) }
 0x28d   : > { %7597 = vmatprep.subr.bf16.mxu0 %v8094_v51  ;;  %7624 = vmatprep.subr.bf16.mxu1 %v8094_v51  ;;  %v6399_v49 = vld [vmem:[%s10008_s0 + $0x1c1] sm:$0xff] (%p1501_p1) }
 0x28f   : > { %6976 = vmatmul.mubr.msk.f32.vlgmr.msra.gmra.mrb[0].mxu0 %vm97_vm3, %v1508_v60  ;;  %7021 = vmatmul.mubr.msk.f32.vlgmr.msra.gmra.mrb[0].mxu1 %vm97_vm3, %v6287_v55  ;;  %v6318_v55 = vld [vmem:[%s10008_s0 + $0x138] sm:$0x7f] (%p1501_p1) }
 0x290   : > { %7599 = vmatpush3.bf16.msra.mxu0 %v8939_v61  ;;  %7626 = vmatpush3.bf16.msra.mxu1 %v8939_v61  ;;  %2454 = vst.msk [vmem:[#allocation2 + $0x49] sm:$0x7f] (%p1501_p1), %vm143_vm2, %v6318_v55  ;;  %v6322_v60 = vld [vmem:[%s10008_s0 + $0x158] sm:$0x7f] (%p1501_p1) }
 0x291   : > { %7600 = vmatprep.subr.bf16.mxu0 %v8094_v51  ;;  %7627 = vmatprep.subr.bf16.mxu1 %v8094_v51  ;;  %2458 = vst.msk [vmem:[#allocation2 + $0x69] sm:$0x7f] (%p1501_p1), %vm143_vm2, %v6322_v60  ;;  %v6404_v60 = vld [vmem:[%s10008_s0 + $0x1e9] sm:$0x7f] (%p1501_p1) }
 0x292   : > { %6990 = vmatprep.mubr.msk.f32.mxu0 %vm8095_vm13, %v8096_v53  ;;  %7035 = vmatprep.mubr.msk.f32.mxu1 %vm8095_vm13, %v8096_v53 }
 0x293   :  { %2561 = vrot.lane.b32.xlu1 (%p1501_p1), %v6352_v40, %s8087_s13  ;;  %2559 = vrot.lane.b32.xlu0 (%p1501_p1), %v6351_v20, %s8087_s13  ;;  %v6381_v20 = vld [vmem:[%s10008_s0 + $0x131] sm:$0xff] (%p1501_p1)  ;;  %v6395_v40 = vld [vmem:[%s10008_s0 + $0x1a1] sm:$0xff] (%p1501_p1) }
 0x294   : > { %7602 = vmatpush3.bf16.msra.mxu0 %v8949_v62  ;;  %7629 = vmatpush3.bf16.msra.mxu1 %v8949_v62 }
 0x295   : > { %7603 = vmatprep.subr.bf16.mxu0 %v8094_v51  ;;  %7630 = vmatprep.subr.bf16.mxu1 %v8094_v51 }
 0x297   :  { %2565 = vrot.lane.b32.xlu1 (%p1501_p1), %v6354_v46, %s8087_s13  ;;  %2563 = vrot.lane.b32.xlu0 (%p1501_p1), %v6353_v21, %s8087_s13  ;;  %v6384_v21 = vld [vmem:[%s10008_s0 + $0x149] sm:$0x7f] (%p1501_p1)  ;;  %v6398_v46 = vld [vmem:[%s10008_s0 + $0x1b9] sm:$0x7f] (%p1501_p1) }
 0x298   : > { %7605 = vmatpush3.bf16.msra.mxu0 %v8961_v63  ;;  %7632 = vmatpush3.bf16.msra.mxu1 %v8961_v63 }
 0x299   : > { %7633 = vmatprep.subr.bf16.mxu0 %v8094_v51  ;;  %7660 = vmatprep.subr.bf16.mxu1 %v8094_v51 }
 0x29b   : > { %6991 = vmatmul.mubr.msk.f32.vlgmr.msra.gmra.mrb[0].mxu0 %vm97_vm3, %v6290_v57  ;;  %7036 = vmatmul.mubr.msk.f32.vlgmr.msra.gmra.mrb[0].mxu1 %vm97_vm3, %v6293_v0  ;;  %v6320_v57 = vld [vmem:[%s10008_s0 + $0x148] sm:$0x7f] (%p1501_p1) }
 0x29c   : > { %7635 = vmatpush3.bf16.msra.mxu0 %v8875_v50  ;;  %7662 = vmatpush3.bf16.msra.mxu1 %v8875_v50  ;;  %2456 = vst.msk [vmem:[#allocation2 + $0x59] sm:$0x7f] (%p1501_p1), %vm143_vm2, %v6320_v57  ;;  %v6324_v0 = vld [vmem:[%s10008_s0 + $0x168] sm:$0x7f] (%p1501_p1) }
 0x29d   : > { %7636 = vmatprep.subr.bf16.mxu0 %v8094_v51  ;;  %7663 = vmatprep.subr.bf16.mxu1 %v8094_v51  ;;  %2460 = vst.msk [vmem:[#allocation2 + $0x79] sm:$0x7f] (%p1501_p1), %vm143_vm2, %v6324_v0  ;;  %v6403_v0 = vld [vmem:[%s10008_s0 + $0x1e1] sm:$0xff] (%p1501_p1) }
 0x29e   : > { %7050 = vmatprep.mubr.msk.f32.mxu0 %vm8095_vm13, %v8096_v53  ;;  %7095 = vmatprep.mubr.msk.f32.mxu1 %vm8095_vm13, %v8096_v53 }
 0x29f   :  { %2569 = vrot.lane.b32.xlu1 (%p1501_p1), %v6356_v47, %s8087_s13  ;;  %2567 = vrot.lane.b32.xlu0 (%p1501_p1), %v6355_v24, %s8087_s13  ;;  %v6383_v24 = vld [vmem:[%s10008_s0 + $0x141] sm:$0xff] (%p1501_p1)  ;;  %v6397_v47 = vld [vmem:[%s10008_s0 + $0x1b1] sm:$0xff] (%p1501_p1) }
 0x2a0   : > { %7638 = vmatpush3.bf16.msra.mxu0 %v8883_v52  ;;  %7665 = vmatpush3.bf16.msra.mxu1 %v8883_v52 }
 0x2a1   : > { %7639 = vmatprep.subr.bf16.mxu0 %v8094_v51  ;;  %7666 = vmatprep.subr.bf16.mxu1 %v8094_v51 }
 0x2a3   :  { %2571 = vrot.lane.b32.xlu0 (%p1501_p1), %v6357_v25, %s8087_s13  ;;  %v6386_v25 = vld [vmem:[%s10008_s0 + $0x159] sm:$0x7f] (%p1501_p1) }
 0x2a4   : > { %7641 = vmatpush3.bf16.msra.mxu0 %v8896_v54  ;;  %7668 = vmatpush3.bf16.msra.mxu1 %v8896_v54 }
 0x2a5   : > { %7642 = vmatprep.subr.bf16.mxu0 %v8094_v51  ;;  %7669 = vmatprep.subr.bf16.mxu1 %v8094_v51 }
 0x2a7   : > { %7051 = vmatmul.mubr.msk.f32.vlgmr.msra.gmra.mrb[2].mxu0 %vm97_vm3, %v6301_v1  ;;  %7096 = vmatmul.mubr.msk.f32.vlgmr.msra.gmra.mrb[2].mxu1 %vm97_vm3, %v6302_v2 }
 0x2a8   : > { %7644 = vmatpush3.bf16.msra.mxu0 %v8907_v56  ;;  %7671 = vmatpush3.bf16.msra.mxu1 %v8907_v56 }
 0x2a9   : > { %7645 = vmatprep.subr.bf16.mxu0 %v8094_v51  ;;  %7672 = vmatprep.subr.bf16.mxu1 %v8094_v51 }
 0x2aa   : > { %7065 = vmatprep.mubr.msk.f32.mxu0 %vm8095_vm13, %v8096_v53  ;;  %7110 = vmatprep.mubr.msk.f32.mxu1 %vm8095_vm13, %v8096_v53 }
 0x2ab   :  { %2575 = vrot.lane.b32.xlu0 (%p1501_p1), %v6359_v29, %s8087_s13  ;;  %v6388_v29 = vld [vmem:[%s10008_s0 + $0x169] sm:$0x7f] (%p1501_p1) }
 0x2ac   : > { %7647 = vmatpush3.bf16.msra.mxu0 %v8918_v58  ;;  %7674 = vmatpush3.bf16.msra.mxu1 %v8918_v58 }
 0x2ad   : > { %7648 = vmatprep.subr.bf16.mxu0 %v8094_v51  ;;  %7675 = vmatprep.subr.bf16.mxu1 %v8094_v51 }
 0x2af   :  { %2579 = vrot.lane.b32.xlu0 (%p1501_p1), %v6361_v30, %s8087_s13  ;;  %v6387_v30 = vld [vmem:[%s10008_s0 + $0x161] sm:$0xff] (%p1501_p1) }
 0x2b0   : > { %7650 = vmatpush3.bf16.msra.mxu0 %v8930_v59  ;;  %7677 = vmatpush3.bf16.msra.mxu1 %v8930_v59 }
 0x2b1   : > { %7651 = vmatprep.subr.bf16.mxu0 %v8094_v51  ;;  %7678 = vmatprep.subr.bf16.mxu1 %v8094_v51 }
 0x2b3   : > { %7066 = vmatmul.mubr.msk.f32.vlgmr.msra.gmra.mrb[2].mxu0 %vm97_vm3, %v6300_v3  ;;  %7111 = vmatmul.mubr.msk.f32.vlgmr.msra.gmra.mrb[2].mxu1 %vm97_vm3, %v6301_v1  ;;  %v6326_v1 = vld [vmem:[%s10008_s0 + $0x178] sm:$0x7f] (%p1501_p1) }
 0x2b4   : > { %7653 = vmatpush3.bf16.msra.mxu0 %v8939_v61  ;;  %7680 = vmatpush3.bf16.msra.mxu1 %v8939_v61  ;;  %v6330_v3 = vld [vmem:[%s10008_s0 + $0x198] sm:$0x7f] (%p1501_p1)  ;;  %2462 = vst.msk [vmem:[#allocation2 + $0x89] sm:$0x7f] (%p1501_p1), %vm143_vm2, %v6326_v1 }
 0x2b5   : > { %7654 = vmatprep.subr.bf16.mxu0 %v8094_v51  ;;  %7681 = vmatprep.subr.bf16.mxu1 %v8094_v51  ;;  %2466 = vst.msk [vmem:[#allocation2 + $0xa9] sm:$0x7f] (%p1501_p1), %vm143_vm2, %v6330_v3  ;;  %v6406_v3 = vld [vmem:[%s10008_s0 + $0x1f9] sm:$0x7f] (%p1501_p1) }
 0x2b6   : > { %7080 = vmatprep.mubr.msk.f32.mxu0 %vm8095_vm13, %v8096_v53  ;;  %7125 = vmatprep.mubr.msk.f32.mxu1 %vm8095_vm13, %v8096_v53  ;;  %v6316_v53 = vld [vmem:[%s10008_s0 + $0x128] sm:$0x7f] (%p1501_p1) }
 0x2b7   :  { %2452 = vst.msk [vmem:[#allocation2 + $0x39] sm:$0x7f] (%p1501_p1), %vm143_vm2, %v6316_v53  ;;  %2583 = vrot.lane.b32.xlu0 (%p1501_p1), %v9088_v31, %s8087_s13  ;;  %v6390_v31 = vld [vmem:[%s10008_s0 + $0x179] sm:$0x7f] (%p1501_p1)  ;;  %v6401_v53 = vld [vmem:[%s10008_s0 + $0x1d1] sm:$0xff] (%p1501_p1) }
 0x2b8   : > { %7656 = vmatpush3.bf16.msra.mxu0 %v8949_v62  ;;  %7683 = vmatpush3.bf16.msra.mxu1 %v8949_v62 }
 0x2b9   : > { %7657 = vmatprep.subr.bf16.mxu0 %v8094_v51  ;;  %7684 = vmatprep.subr.bf16.mxu1 %v8094_v51  ;;  %v6358_v51 = vld [vmem:[%s10008_s0 + $0x178] sm:$0xff] (%p1501_p1) }
 0x2ba   :  { %2573 = vrot.lane.b32.xlu1 (%p1501_p1), %v6358_v51, %s8087_s13  ;;  %v6402_v51 = vld [vmem:[%s10008_s0 + $0x1d9] sm:$0x7f] (%p1501_p1) }
 0x2bb   :  { %2587 = vrot.lane.b32.xlu0 (%p1501_p1), %v9094_v32, %s8087_s13  ;;  %v6389_v32 = vld [vmem:[%s10008_s0 + $0x171] sm:$0xff] (%p1501_p1) }
 0x2bc   : > { %7659 = vmatpush3.bf16.msra.mxu0 %v8961_v63  ;;  %7686 = vmatpush3.bf16.msra.mxu1 %v8961_v63 }
 0x2bf   : > { %7081 = vmatmul.mubr.msk.f32.vlgmr.msra.gmra.mrb[2].mxu0 %vm97_vm3, %v6302_v2  ;;  %7126 = vmatmul.mubr.msk.f32.vlgmr.msra.gmra.mrb[2].mxu1 %vm97_vm3, %v6303_v4  ;;  %v6328_v2 = vld [vmem:[%s10008_s0 + $0x188] sm:$0x7f] (%p1501_p1) }
 0x2c0   :  { %2464 = vst.msk [vmem:[#allocation2 + $0x99] sm:$0x7f] (%p1501_p1), %vm143_vm2, %v6328_v2  ;;  %v6332_v4 = vld [vmem:[%s10008_s0 + $0x1a8] sm:$0x7f] (%p1501_p1)  ;;  %2591 = vrot.lane.b32.xlu0 (%p1501_p1), %v9104_v33, %s8087_s13 }
 0x2c1   :  { %2468 = vst.msk [vmem:[#allocation2 + $0xb9] sm:$0x7f] (%p1501_p1), %vm143_vm2, %v6332_v4  ;;  %v6392_v33 = vld [vmem:[%s10008_s0 + $0x189] sm:$0x7f] (%p1501_p1)  ;;  %v6405_v4 = vld [vmem:[%s10008_s0 + $0x1f1] sm:$0xff] (%p1501_p1) }
 0x2c4   :  { %2595 = vrot.lane.b32.xlu0 (%p1501_p1), %v9114_v35, %s8087_s13  ;;  %v6394_v35 = vld [vmem:[%s10008_s0 + $0x199] sm:$0x7f] (%p1501_p1) }
 0x2c8   :  { %2599 = vrot.lane.b32.xlu0 (%p1501_p1), %v9119_v36, %s8087_s13  ;;  %v6393_v36 = vld [vmem:[%s10008_s0 + $0x191] sm:$0xff] (%p1501_p1) }
 0x2cc   :  { %2603 = vrot.lane.b32.xlu0 (%p1501_p1), %v9126_v39, %s8087_s13  ;;  %v6396_v39 = vld [vmem:[%s10008_s0 + $0x1a9] sm:$0x7f] (%p1501_p1) }
 0x2d0   :  { %2735 = vrot.lane.b32.xlu0 (%p1501_p1), %v6375_v43, %s8089_s30 }
 0x2d4   :  { %2739 = vrot.lane.b32.xlu0 (%p1501_p1), %v6377_v45, %s8089_s30 }
 0x2d8   :  { %2743 = vrot.lane.b32.xlu0 (%p1501_p1), %v6379_v18, %s8089_s30 }
 0x2dc   :  { %2747 = vrot.lane.b32.xlu0 (%p1501_p1), %v6381_v20, %s8089_s30 }
 0x2e0   :  { %2751 = vrot.lane.b32.xlu0 (%p1501_p1), %v6383_v24, %s8089_s30 }
 0x2e4   :  { %2755 = vrot.lane.b32.xlu0 (%p1501_p1), %v6385_v26, %s8089_s30 }
 0x2e8   :  { %2759 = vrot.lane.b32.xlu0 (%p1501_p1), %v6387_v30, %s8089_s30 }
 0x2ec   :  { %2763 = vrot.lane.b32.xlu0 (%p1501_p1), %v6389_v32, %s8089_s30 }
 0x2ed   :  { %v2548_v55 = vpop.permute.xlu1 (%p1501_p1), %2547  ;;  %v2544_v57 = vpop.permute.xlu0 (%p1501_p1), %2543 }
 0x2ee   :  { %2641 = vst.msk [vmem:[#allocation2 + $0x20] sm:$0xff] (%p1501_p1), %vm335_vm4, %v2548_v55  ;;  %2639 = vst.msk [vmem:[#allocation2 + $0x10] sm:$0xff] (%p1501_p1), %vm335_vm4, %v2544_v57 }
 0x2f0   :  { %2767 = vrot.lane.b32.xlu0 (%p1501_p1), %v6391_v34, %s8089_s30 }
 0x2f1   :  { %v2550_v1 = vpop.permute.xlu1 (%p1501_p1), %2549  ;;  %v2546_v2 = vpop.permute.xlu0 (%p1501_p1), %2545 }
 0x2f2   :  { %2640 = vst.msk [vmem:[#allocation2 + $0x18] sm:$0xff] (%p1501_p1), %vm335_vm4, %v2546_v2  ;;  %2642 = vst.msk [vmem:[#allocation2 + $0x28] sm:$0xff] (%p1501_p1), %vm335_vm4, %v2550_v1 }
 0x2f4   :  { %2771 = vrot.lane.b32.xlu0 (%p1501_p1), %v6393_v36, %s8089_s30 }
 0x2f8   :  { %2775 = vrot.lane.b32.xlu0 (%p1501_p1), %v6395_v40, %s8089_s30 }
 0x2fc   :  { %2779 = vrot.lane.b32.xlu0 (%p1501_p1), %v6397_v47, %s8089_s30 }
 0x300   :  { %2783 = vrot.lane.b32.xlu0 (%p1501_p1), %v6399_v49, %s8089_s30 }
 0x304   :  { %2787 = vrot.lane.b32.xlu0 (%p1501_p1), %v6401_v53, %s8089_s30 }
 0x308   :  { %2791 = vrot.lane.b32.xlu0 (%p1501_p1), %v6403_v0, %s8089_s30 }
 0x30c   :  { %2795 = vrot.lane.b32.xlu0 (%p1501_p1), %v6405_v4, %s8089_s30 }
 0x36e   : > { %v1736_v5 = vpop.f32.mrb[0].mxu0  ;;  %v1950_v7 = vpop.f32.mrb[0].mxu1 }
 0x36f   : > { %v1955_v8 = vmax.f32 %v1736_v5, %v1950_v7  ;;  %v6992_v9 = vpop.f32.mrb[1].mxu0  ;;  %v7037_v10 = vpop.f32.mrb[1].mxu1  ;;  %v6360_v5 = vld [vmem:[%s10008_s0 + $0x188] sm:$0xff] (%p1501_p1)  ;;  %v6334_v7 = vld [vmem:[%s10008_s0 + $0x1b8] sm:$0x7f] (%p1501_p1) }
 0x370   :  { %2470 = vst.msk [vmem:[#allocation2 + $0xc9] sm:$0x7f] (%p1501_p1), %vm143_vm2, %v6334_v7  ;;  %2577 = vrot.lane.b32.xlu1 (%p1501_p1), %v6360_v5, %s8087_s13  ;;  %v6336_v9 = vld [vmem:[%s10008_s0 + $0x1c8] sm:$0x7f] (%p1501_p1)  ;;  %v2554_v5 = vpop.permute.xlu1 (%p1501_p1), %2553  ;;  %v2552_v7 = vpop.permute.xlu0 (%p1501_p1), %2551 }
 0x371   :  { %2472 = vst.msk [vmem:[#allocation2 + $0xd9] sm:$0x7f] (%p1501_p1), %vm143_vm2, %v6336_v9  ;;  %v6364_v10 = vld [vmem:[%s10008_s0 + $0x1a8] sm:$0xff] (%p1501_p1) }
 0x372   :  { %2643 = vst.msk [vmem:[#allocation2 + $0x30] sm:$0xff] (%p1501_p1), %vm335_vm4, %v2552_v7  ;;  %2644 = vst.msk [vmem:[#allocation2 + $0x38] sm:$0xff] (%p1501_p1), %vm335_vm4, %v2554_v5 }
 0x374   :  { %v2556_v9 = vpop.permute.xlu0 (%p1501_p1), %2555 }
 0x375   :  { %2645 = vst.msk [vmem:[#allocation2 + $0x40] sm:$0xff] (%p1501_p1), %vm335_vm4, %v2556_v9 }
 0x392   : > { %v2179_v11 = vpop.f32.mrb[2].mxu0  ;;  %v2393_v12 = vpop.f32.mrb[2].mxu1 }
 0x393   : > { %v2398_v13 = vmax.f32 %v2179_v11, %v2393_v12  ;;  %v7082_v22 = vpop.f32.mrb[3].mxu0  ;;  %v7127_v23 = vpop.f32.mrb[3].mxu1  ;;  %v6338_v11 = vld [vmem:[%s10008_s0 + $0x1d8] sm:$0x7f] (%p1501_p1) }
 0x394   :  { %2474 = vst.msk [vmem:[#allocation2 + $0xe9] sm:$0x7f] (%p1501_p1), %vm143_vm2, %v6338_v11  ;;  %v6366_v12 = vld [vmem:[%s10008_s0 + $0x1b8] sm:$0xff] (%p1501_p1)  ;;  %v6368_v22 = vld [vmem:[%s10008_s0 + $0x1c8] sm:$0xff] (%p1501_p1)  ;;  %v2560_v11 = vpop.permute.xlu0 (%p1501_p1), %2559 }
 0x395   : > { %v2399_v27 = vmax.f32 %v1955_v8, %v2398_v13  ;;  %v6362_v8 = vld [vmem:[%s10008_s0 + $0x198] sm:$0xff] (%p1501_p1)  ;;  %v6340_v13 = vld [vmem:[%s10008_s0 + $0x1e8] sm:$0x7f] (%p1501_p1)  ;;  %2647 = vst.msk [vmem:[#allocation2 + $0x50] sm:$0xff] (%p1501_p1), %vm335_vm4, %v2560_v11 }
 0x396   :  { %1503 = sbr.rel (!%p1501_p1) target bundleno = 630 (0x276), region = 167  ;;  %2581 = vrot.lane.b32.xlu1 (%p1501_p1), %v6362_v8, %s8087_s13  ;;  %2476 = vst.msk [vmem:[#allocation2 + $0xf9] sm:$0x7f] (%p1501_p1), %vm143_vm2, %v6340_v13  ;;  %v6342_v23 = vld [vmem:[%s10008_s0 + $0x1f8] sm:$0x7f] (%p1501_p1)  ;;  %v2558_v8 = vpop.permute.xlu1 (%p1501_p1), %2557 }
 0x397   : > { %v2406_v28 = vadd.f32 %v8724_v42, %v2399_v27  ;;  %2478 = vst.msk [vmem:[#allocation2 + $0x109] sm:$0x7f] (%p1501_p1), %vm143_vm2, %v6342_v23  ;;  %v6370_v27 = vld [vmem:[%s10008_s0 + $0x1d8] sm:$0xff] (%p1501_p1) }
 0x398   :  { %2646 = vst.msk [vmem:[#allocation2 + $0x48] sm:$0xff] (%p1501_p1), %vm335_vm4, %v2558_v8  ;;  %v2564_v13 = vpop.permute.xlu0 (%p1501_p1), %2563 }
 0x399   : > { %vm2407_vm14 = vcmp.gt.f32.partialorder %v2406_v28, 0.0  ;;  %v2408_v37 = vmul.f32 0.01, %v2406_v28  ;;  %2649 = vst.msk [vmem:[#allocation2 + $0x60] sm:$0xff] (%p1501_p1), %vm335_vm4, %v2564_v13 }
 0x39a   :  { %2585 = vrot.lane.b32.xlu1 (%p1501_p1), %v6364_v10, %s8087_s13  ;;  %v2562_v10 = vpop.permute.xlu1 (%p1501_p1), %2561 }
 0x39b   : > { %v2409_v38 = vsel %vm2407_vm14, %v2406_v28, %v2408_v37  ;;  %v6372_v28 = vld [vmem:[%s10008_s0 + $0x1e8] sm:$0xff] (%p1501_p1)  ;;  %v6374_v37 = vld [vmem:[%s10008_s0 + $0x1f8] sm:$0xff] (%p1501_p1)  ;;  %2648 = vst.msk [vmem:[#allocation2 + $0x58] sm:$0xff] (%p1501_p1), %vm335_vm4, %v2562_v10 }
 0x39c   : > { %2413 = vst.msk [vmem:[%s2411_s27] sm:$0xf] %vm2412_vm15, %v2409_v38  ;;  %v6376_v38 = vld [vmem:[%s10008_s0 + $0x109] sm:$0x7f] (%p1501_p1)  ;;  %v2568_v23 = vpop.permute.xlu0 (%p1501_p1), %2567  ;;  %s9458_s0 = smov (%p1501_p1), 0  }
 0x39d   :  { %2651 = vst.msk [vmem:[#allocation2 + $0x70] sm:$0xff] %vm335_vm4, %v2568_v23 }
 0x39e   :  { %2589 = vrot.lane.b32.xlu1 %v6366_v12, %s8087_s13  ;;  %v2566_v12 = vpop.permute.xlu1 %2565 }
 0x39f   :  { %2650 = vst.msk [vmem:[#allocation2 + $0x68] sm:$0xff] %vm335_vm4, %v2566_v12 }
 0x3a2   :  { %2593 = vrot.lane.b32.xlu1 %v6368_v22, %s8087_s13  ;;  %v2570_v22 = vpop.permute.xlu1 %2569 }
 0x3a3   :  { %2652 = vst.msk [vmem:[#allocation2 + $0x78] sm:$0xff] %vm335_vm4, %v2570_v22 }
 0x3a6   :  { %2597 = vrot.lane.b32.xlu1 %v6370_v27, %s8087_s13  ;;  %v2574_v27 = vpop.permute.xlu1 %2573 }
 0x3a7   :  { %2654 = vst.msk [vmem:[#allocation2 + $0x88] sm:$0xff] %vm335_vm4, %v2574_v27 }
 0x3aa   :  { %2601 = vrot.lane.b32.xlu1 %v6372_v28, %s8087_s13  ;;  %v2572_v28 = vpop.permute.xlu0 %2571 }
 0x3ab   :  { %2653 = vst.msk [vmem:[#allocation2 + $0x80] sm:$0xff] %vm335_vm4, %v2572_v28 }
 0x3ae   :  { %2605 = vrot.lane.b32.xlu1 %v6374_v37, %s8087_s13 }
 0x3b2   :  { %2737 = vrot.lane.b32.xlu1 %v6376_v38, %s8089_s30  ;;  %v2576_v38 = vpop.permute.xlu0 %2575 }
 0x3b3   :  { %2655 = vst.msk [vmem:[#allocation2 + $0x90] sm:$0xff] %vm335_vm4, %v2576_v38 }
 0x3b6   :  { %2741 = vrot.lane.b32.xlu1 %v6378_v44, %s8089_s30  ;;  %v2580_v44 = vpop.permute.xlu0 %2579 }
 0x3b7   :  { %2657 = vst.msk [vmem:[#allocation2 + $0xa0] sm:$0xff] %vm335_vm4, %v2580_v44 }
 0x3ba   :  { %2745 = vrot.lane.b32.xlu1 %v6380_v17, %s8089_s30  ;;  %v2584_v17 = vpop.permute.xlu0 %2583 }
 0x3bb   :  { %2659 = vst.msk [vmem:[#allocation2 + $0xb0] sm:$0xff] %vm335_vm4, %v2584_v17 }
 0x3be   :  { %2749 = vrot.lane.b32.xlu1 %v6382_v19, %s8089_s30  ;;  %v2588_v19 = vpop.permute.xlu0 %2587 }
 0x3bf   :  { %2661 = vst.msk [vmem:[#allocation2 + $0xc0] sm:$0xff] %vm335_vm4, %v2588_v19 }
 0x3c2   :  { %2753 = vrot.lane.b32.xlu1 %v6384_v21, %s8089_s30  ;;  %v2592_v21 = vpop.permute.xlu0 %2591 }
 0x3c3   :  { %2663 = vst.msk [vmem:[#allocation2 + $0xd0] sm:$0xff] %vm335_vm4, %v2592_v21 }
 0x3c6   :  { %2757 = vrot.lane.b32.xlu1 %v6386_v25, %s8089_s30  ;;  %v2596_v25 = vpop.permute.xlu0 %2595 }
 0x3c7   :  { %2665 = vst.msk [vmem:[#allocation2 + $0xe0] sm:$0xff] %vm335_vm4, %v2596_v25 }
 0x3ca   :  { %2761 = vrot.lane.b32.xlu1 %v6388_v29, %s8089_s30  ;;  %v2600_v29 = vpop.permute.xlu0 %2599 }
 0x3cb   :  { %2667 = vst.msk [vmem:[#allocation2 + $0xf0] sm:$0xff] %vm335_vm4, %v2600_v29 }
 0x3ce   :  { %2765 = vrot.lane.b32.xlu1 %v6390_v31, %s8089_s30  ;;  %v2604_v31 = vpop.permute.xlu0 %2603 }
 0x3cf   :  { %2669 = vst.msk [vmem:[#allocation2 + $0x100] sm:$0xff] %vm335_vm4, %v2604_v31 }
 0x3d2   :  { %2769 = vrot.lane.b32.xlu1 %v6392_v33, %s8089_s30  ;;  %v2736_v33 = vpop.permute.xlu0 %2735 }
 0x3d3   :  { %2831 = vst.msk [vmem:[#allocation2 + $0x10] sm:$0xff] %vm528_vm6, %v2736_v33 }
 0x3d6   :  { %2773 = vrot.lane.b32.xlu1 %v6394_v35, %s8089_s30  ;;  %v2740_v35 = vpop.permute.xlu0 %2739 }
 0x3d7   :  { %2833 = vst.msk [vmem:[#allocation2 + $0x20] sm:$0xff] %vm528_vm6, %v2740_v35 }
 0x3da   :  { %2777 = vrot.lane.b32.xlu1 %v6396_v39, %s8089_s30  ;;  %v2744_v39 = vpop.permute.xlu0 %2743 }
 0x3db   :  { %2835 = vst.msk [vmem:[#allocation2 + $0x30] sm:$0xff] %vm528_vm6, %v2744_v39 }
 0x3de   :  { %2781 = vrot.lane.b32.xlu1 %v6398_v46, %s8089_s30  ;;  %v2748_v46 = vpop.permute.xlu0 %2747 }
 0x3df   :  { %2837 = vst.msk [vmem:[#allocation2 + $0x40] sm:$0xff] %vm528_vm6, %v2748_v46 }
 0x3e2   :  { %2785 = vrot.lane.b32.xlu1 %v6400_v48, %s8089_s30  ;;  %v2578_v37 = vpop.permute.xlu1 %2577  ;;  %v2752_v48 = vpop.permute.xlu0 %2751 }
 0x3e3   :  { %2656 = vst.msk [vmem:[#allocation2 + $0x98] sm:$0xff] %vm335_vm4, %v2578_v37 }
 0x3e4   :  { %2839 = vst.msk [vmem:[#allocation2 + $0x50] sm:$0xff] %vm528_vm6, %v2752_v48 }
 0x3e6   :  { %2789 = vrot.lane.b32.xlu1 %v6402_v51, %s8089_s30  ;;  %v2756_v51 = vpop.permute.xlu0 %2755 }
 0x3e7   :  { %2841 = vst.msk [vmem:[#allocation2 + $0x60] sm:$0xff] %vm528_vm6, %v2756_v51 }
 0x3ea   :  { %2793 = vrot.lane.b32.xlu1 %v6404_v60, %s8089_s30  ;;  %v2760_v55 = vpop.permute.xlu0 %2759 }
 0x3eb   :  { %2843 = vst.msk [vmem:[#allocation2 + $0x70] sm:$0xff] %vm528_vm6, %v2760_v55 }
 0x3ee   :  { %2797 = vrot.lane.b32.xlu1 %v6406_v3, %s8089_s30  ;;  %v2764_v60 = vpop.permute.xlu0 %2763 }
 0x3ef   :  { %2845 = vst.msk [vmem:[#allocation2 + $0x80] sm:$0xff] %vm528_vm6, %v2764_v60 }
 0x3f2   :  { %v2768_v1 = vpop.permute.xlu0 %2767 }
 0x3f3   :  { %2847 = vst.msk [vmem:[#allocation2 + $0x90] sm:$0xff] %vm528_vm6, %v2768_v1 }
 0x3f6   :  { %v2772_v3 = vpop.permute.xlu0 %2771 }
 0x3f7   :  { %2849 = vst.msk [vmem:[#allocation2 + $0xa0] sm:$0xff] %vm528_vm6, %v2772_v3 }
 0x3fa   :  { %v2776_v5 = vpop.permute.xlu0 %2775 }
 0x3fb   :  { %2851 = vst.msk [vmem:[#allocation2 + $0xb0] sm:$0xff] %vm528_vm6, %v2776_v5 }
 0x3fe   :  { %v2780_v8 = vpop.permute.xlu0 %2779 }
 0x3ff   :  { %2853 = vst.msk [vmem:[#allocation2 + $0xc0] sm:$0xff] %vm528_vm6, %v2780_v8 }
 0x402   :  { %v2784_v10 = vpop.permute.xlu0 %2783 }
 0x403   :  { %2855 = vst.msk [vmem:[#allocation2 + $0xd0] sm:$0xff] %vm528_vm6, %v2784_v10 }
 0x406   :  { %v2788_v12 = vpop.permute.xlu0 %2787 }
 0x407   :  { %2857 = vst.msk [vmem:[#allocation2 + $0xe0] sm:$0xff] %vm528_vm6, %v2788_v12 }
 0x408   :  { %v2582_v43 = vpop.permute.xlu1 %2581 }
 0x409   :  { %2658 = vst.msk [vmem:[#allocation2 + $0xa8] sm:$0xff] %vm335_vm4, %v2582_v43 }
 0x40a   :  { %v2792_v22 = vpop.permute.xlu0 %2791 }
 0x40b   :  { %2859 = vst.msk [vmem:[#allocation2 + $0xf0] sm:$0xff] %vm528_vm6, %v2792_v22 }
 0x40c   :  { %v2586_v45 = vpop.permute.xlu1 %2585 }
 0x40d   :  { %2660 = vst.msk [vmem:[#allocation2 + $0xb8] sm:$0xff] %vm335_vm4, %v2586_v45 }
 0x40e   :  { %v2796_v27 = vpop.permute.xlu0 %2795 }
 0x40f   :  { %2861 = vst.msk [vmem:[#allocation2 + $0x100] sm:$0xff] %vm528_vm6, %v2796_v27 }
 0x410   :  { %v2590_v18 = vpop.permute.xlu1 %2589 }
 0x411   :  { %2662 = vst.msk [vmem:[#allocation2 + $0xc8] sm:$0xff] %vm335_vm4, %v2590_v18 }
 0x414   :  { %v2594_v20 = vpop.permute.xlu1 %2593 }
 0x415   :  { %2664 = vst.msk [vmem:[#allocation2 + $0xd8] sm:$0xff] %vm335_vm4, %v2594_v20 }
 0x418   :  { %v2598_v24 = vpop.permute.xlu1 %2597 }
 0x419   :  { %2666 = vst.msk [vmem:[#allocation2 + $0xe8] sm:$0xff] %vm335_vm4, %v2598_v24 }
 0x41c   :  { %v2602_v26 = vpop.permute.xlu1 %2601 }
 0x41d   :  { %2668 = vst.msk [vmem:[#allocation2 + $0xf8] sm:$0xff] %vm335_vm4, %v2602_v26 }
 0x420   :  { %v2606_v30 = vpop.permute.xlu1 %2605 }
 0x421   :  { %2670 = vst.msk [vmem:[#allocation2 + $0x108] sm:$0xff] %vm335_vm4, %v2606_v30 }
 0x424   :  { %v2738_v32 = vpop.permute.xlu1 %2737 }
 0x425   :  { %2832 = vst.msk [vmem:[#allocation2 + $0x18] sm:$0x7f] %vm530_vm5, %v2738_v32 }
 0x428   :  { %v2742_v34 = vpop.permute.xlu1 %2741 }
 0x429   :  { %2834 = vst.msk [vmem:[#allocation2 + $0x28] sm:$0x7f] %vm530_vm5, %v2742_v34 }
 0x42c   :  { %v2746_v36 = vpop.permute.xlu1 %2745 }
 0x42d   :  { %2836 = vst.msk [vmem:[#allocation2 + $0x38] sm:$0x7f] %vm530_vm5, %v2746_v36 }
 0x430   :  { %v2750_v40 = vpop.permute.xlu1 %2749 }
 0x431   :  { %2838 = vst.msk [vmem:[#allocation2 + $0x48] sm:$0x7f] %vm530_vm5, %v2750_v40 }
 0x434   :  { %v2754_v47 = vpop.permute.xlu1 %2753 }
 0x435   :  { %2840 = vst.msk [vmem:[#allocation2 + $0x58] sm:$0x7f] %vm530_vm5, %v2754_v47 }
 0x438   :  { %v2758_v49 = vpop.permute.xlu1 %2757 }
 0x439   :  { %2842 = vst.msk [vmem:[#allocation2 + $0x68] sm:$0x7f] %vm530_vm5, %v2758_v49 }
 0x43c   :  { %v2762_v53 = vpop.permute.xlu1 %2761 }
 0x43d   :  { %2844 = vst.msk [vmem:[#allocation2 + $0x78] sm:$0x7f] %vm530_vm5, %v2762_v53 }
 0x440   :  { %v2766_v57 = vpop.permute.xlu1 %2765 }
 0x441   :  { %2846 = vst.msk [vmem:[#allocation2 + $0x88] sm:$0x7f] %vm530_vm5, %v2766_v57 }
 0x444   :  { %v2770_v0 = vpop.permute.xlu1 %2769 }
 0x445   :  { %2848 = vst.msk [vmem:[#allocation2 + $0x98] sm:$0x7f] %vm530_vm5, %v2770_v0 }
 0x448   :  { %v2774_v2 = vpop.permute.xlu1 %2773 }
 0x449   :  { %2850 = vst.msk [vmem:[#allocation2 + $0xa8] sm:$0x7f] %vm530_vm5, %v2774_v2 }
 0x44c   :  { %v2778_v4 = vpop.permute.xlu1 %2777 }
 0x44d   :  { %2852 = vst.msk [vmem:[#allocation2 + $0xb8] sm:$0x7f] %vm530_vm5, %v2778_v4 }
 0x450   :  { %v2782_v7 = vpop.permute.xlu1 %2781 }
 0x451   :  { %2854 = vst.msk [vmem:[#allocation2 + $0xc8] sm:$0x7f] %vm530_vm5, %v2782_v7 }
 0x454   :  { %v2786_v9 = vpop.permute.xlu1 %2785 }
 0x455   :  { %2856 = vst.msk [vmem:[#allocation2 + $0xd8] sm:$0x7f] %vm530_vm5, %v2786_v9 }
 0x458   :  { %v2790_v11 = vpop.permute.xlu1 %2789 }
 0x459   :  { %2858 = vst.msk [vmem:[#allocation2 + $0xe8] sm:$0x7f] %vm530_vm5, %v2790_v11 }
 0x45c   :  { %v2794_v13 = vpop.permute.xlu1 %2793 }
 0x45d   :  { %2860 = vst.msk [vmem:[#allocation2 + $0xf8] sm:$0x7f] %vm530_vm5, %v2794_v13 }
 0x460   :  { %v2798_v23 = vpop.permute.xlu1 %2797 }
 0x461   :  { %2862 = vst.msk [vmem:[#allocation2 + $0x108] sm:$0x7f] %vm530_vm5, %v2798_v23 }
 0x462 LB: > { %v8097_v28 = vmov 0.0   ;;  %s6565_s30 = sshll.u32 %s8081_s0, 5  ;;  %vm8098_vm1 = vmmov 0   ;;  %s6446_s25 = sshll.u32 %s8081_s0, 3  ;;  %s8081_s0 = sphi %s9458_s0, %s2868_s0  }
 0x463   : > { %7128 = vmatprep.subr.mxu0 %v8097_v28  ;;  %7143 = vmatprep.subr.mxu1 %v8097_v28  ;;  %s9470_s24 = scalar_lea.vmem [#allocation2], %s6565_s30  ;;  %s8099_s26 = smov 16  }
 0x464   : > { %7129 = vmatpush3.msk.msra.mxu0 %vm587_vm7, %v8585_v15  ;;  %7144 = vmatpush3.msk.msra.mxu1 %vm587_vm7, %v8585_v15  ;;  %s6184_s27 = scalar_lea.vmem [#allocation3], %s6446_s25  ;;  %s8100_s28 = smov 32  }
 0x465   : > { %7130 = vmatprep.mubr.msk.f32.mxu0 %vm8098_vm1, %v8097_v28  ;;  %7133 = vmatprep.subr.mxu0 %v8097_v28  ;;  %s2868_s0 = sadd.s32 1, %s8081_s0  }
 0x466   : > { %7145 = vmatprep.mubr.msk.f32.mxu1 %vm8098_vm1, %v8097_v28  ;;  %7148 = vmatprep.subr.mxu1 %v8097_v28  ;;  %p2865_p2 = scmp.ge.s32.totalorder %s2868_s0, 8  }
 0x467   :  { %s9530_s29 = smov (%p2865_p2), 0  }
 0x468   : > { %v6411_v37 = vld [vmem:[%s9470_s24 + $0x10] ss:$2 sm:$0xff]  ;;  %v6414_v38 = vld [vmem:[%s9470_s24 + $0x20] ss:$2 sm:$0xff]  ;;  %v6431_v45 = vld [vmem:[%s9470_s24 + $0x11] ss:$2 sm:$0xff] }
 0x469   : > { %7131 = vmatmul.mubr.msk.f32.vlgmr.msra.gmra.mrb[0].mxu0 %vm60_vm0, %v6411_v37  ;;  %7146 = vmatmul.mubr.msk.f32.vlgmr.msra.gmra.mrb[0].mxu1 %vm60_vm0, %v6414_v38  ;;  %v2872_v43 = vld [vmem:[%s9470_s24] ss:$2 sm:$0xff]  ;;  %v6417_v44 = vld [vmem:[%s9470_s24 + $0x30] ss:$2 sm:$0xff]  ;;  %v6432_v17 = vld [vmem:[%s9470_s24 + $0x21] ss:$2 sm:$0xff] }
 0x46a   : > { %7134 = vmatpush3.msk.msra.mxu0 %vm587_vm7, %v8580_v14  ;;  %7149 = vmatpush3.msk.msra.mxu1 %vm587_vm7, %v8580_v14  ;;  %v6430_v18 = vld [vmem:[%s9470_s24 + $0x1] ss:$2 sm:$0xff]  ;;  %v6433_v19 = vld [vmem:[%s9470_s24 + $0x31] ss:$2 sm:$0xff] }
 0x46b   : > { %7135 = vmatprep.mubr.msk.f32.mxu0 %vm8098_vm1, %v8097_v28  ;;  %7138 = vmatprep.subr.mxu0 %v8097_v28 }
 0x46c   : > { %7150 = vmatprep.mubr.msk.f32.mxu1 %vm8098_vm1, %v8097_v28  ;;  %7153 = vmatprep.subr.mxu1 %v8097_v28 }
 0x471   : > { %7136 = vmatmul.mubr.msk.f32.vlgmr.msra.gmra.mrb[0].mxu0 %vm60_vm0, %v2872_v43  ;;  %7151 = vmatmul.mubr.msk.f32.vlgmr.msra.gmra.mrb[0].mxu1 %vm60_vm0, %v6411_v37 }
 0x472   : > { %7139 = vmatpush3.msk.msra.mxu0 %vm587_vm7, %v8590_v16  ;;  %7154 = vmatpush3.msk.msra.mxu1 %vm587_vm7, %v8590_v16 }
 0x473   : > { %7140 = vmatprep.mubr.msk.f32.mxu0 %vm8098_vm1, %v8097_v28  ;;  %7155 = vmatprep.mubr.msk.f32.mxu1 %vm8098_vm1, %v8097_v28 }
 0x474   : > { %7158 = vmatprep.subr.mxu0 %v8097_v28  ;;  %7173 = vmatprep.subr.mxu1 %v8097_v28 }
 0x479   : > { %7141 = vmatmul.mubr.msk.f32.vlgmr.msra.gmra.mrb[0].mxu0 %vm60_vm0, %v6414_v38  ;;  %7156 = vmatmul.mubr.msk.f32.vlgmr.msra.gmra.mrb[0].mxu1 %vm60_vm0, %v6417_v44 }
 0x47a   : > { %7159 = vmatpush3.msk.msra.mxu0 %vm587_vm7, %v8585_v15  ;;  %7174 = vmatpush3.msk.msra.mxu1 %vm587_vm7, %v8585_v15 }
 0x47b   : > { %7160 = vmatprep.mubr.msk.f32.mxu0 %vm8098_vm1, %v8097_v28  ;;  %7163 = vmatprep.subr.mxu0 %v8097_v28 }
 0x47c   : > { %7175 = vmatprep.mubr.msk.f32.mxu1 %vm8098_vm1, %v8097_v28  ;;  %7178 = vmatprep.subr.mxu1 %v8097_v28 }
 0x47d   : > { %7161 = vmatmul.mubr.msk.f32.vlgmr.msra.gmra.mrb[2].mxu0 %vm60_vm0, %v6431_v45  ;;  %7176 = vmatmul.mubr.msk.f32.vlgmr.msra.gmra.mrb[2].mxu1 %vm60_vm0, %v6432_v17 }
 0x47e   : > { %7164 = vmatpush3.msk.msra.mxu0 %vm587_vm7, %v8580_v14  ;;  %7179 = vmatpush3.msk.msra.mxu1 %vm587_vm7, %v8580_v14 }
 0x47f   : > { %7165 = vmatprep.mubr.msk.f32.mxu0 %vm8098_vm1, %v8097_v28  ;;  %7168 = vmatprep.subr.mxu0 %v8097_v28 }
 0x480   : > { %7180 = vmatprep.mubr.msk.f32.mxu1 %vm8098_vm1, %v8097_v28  ;;  %7183 = vmatprep.subr.mxu1 %v8097_v28 }
 0x485   : > { %7166 = vmatmul.mubr.msk.f32.vlgmr.msra.gmra.mrb[2].mxu0 %vm60_vm0, %v6430_v18  ;;  %7181 = vmatmul.mubr.msk.f32.vlgmr.msra.gmra.mrb[2].mxu1 %vm60_vm0, %v6431_v45 }
 0x486   : > { %7169 = vmatpush3.msk.msra.mxu0 %vm587_vm7, %v8590_v16  ;;  %7184 = vmatpush3.msk.msra.mxu1 %vm587_vm7, %v8590_v16 }
 0x487   : > { %7170 = vmatprep.mubr.msk.f32.mxu0 %vm8098_vm1, %v8097_v28  ;;  %7185 = vmatprep.mubr.msk.f32.mxu1 %vm8098_vm1, %v8097_v28 }
 0x48d   : > { %7171 = vmatmul.mubr.msk.f32.vlgmr.msra.gmra.mrb[2].mxu0 %vm60_vm0, %v6432_v17  ;;  %7186 = vmatmul.mubr.msk.f32.vlgmr.msra.gmra.mrb[2].mxu1 %vm60_vm0, %v6433_v19 }
 0x54c   : > { %v3110_v20 = vpop.f32.mrb[0].mxu0  ;;  %v3324_v21 = vpop.f32.mrb[0].mxu1 }
 0x54d   : > { %v3329_v24 = vmax.f32 %v3110_v20, %v3324_v21  ;;  %v7142_v25 = vpop.f32.mrb[1].mxu0  ;;  %v7157_v26 = vpop.f32.mrb[1].mxu1 }
 0x560   : > { %v3553_v29 = vpop.f32.mrb[2].mxu0  ;;  %v3767_v30 = vpop.f32.mrb[2].mxu1 }
 0x561   : > { %v3772_v31 = vmax.f32 %v3553_v29, %v3767_v30  ;;  %v7172_v32 = vpop.f32.mrb[3].mxu0  ;;  %v7187_v33 = vpop.f32.mrb[3].mxu1 }
 0x563   : > { %v3773_v34 = vmax.f32 %v3329_v24, %v3772_v31 }
 0x565   : > { %v3780_v35 = vadd.f32 %v8717_v41, %v3773_v34 }
 0x567   : > { %vm3781_vm2 = vcmp.gt.f32.partialorder %v3780_v35, 0.0  ;;  %v3782_v36 = vmul.f32 0.01, %v3780_v35 }
 0x569   : > { %v3783_v39 = vsel %vm3781_vm2, %v3780_v35, %v3782_v36 }
 0x56a   : > { %3790 = vrot.lane.b32.xlu0 %v3783_v39, %s8099_s26  ;;  %6447 = vst.msk [vmem:[%s6184_s27 + $0x9] sm:$0x7f] %vm1486_vm10, %v3783_v39 }
 0x56e   : > { %3795 = vrot.lane.b32.xlu0 %v3783_v39, %s8100_s28 }
 0x5db   :  { %2867 = sbr.rel (!%p2865_p2) target bundleno = 1122 (0x462), region = 178 }
 0x5dc   : > { %v3791_v40 = vpop.permute.xlu0 %3790 }
 0x5dd   : > { %6448 = vst.msk [vmem:[%s6184_s27 + $0x8] sm:$0xff] %vm1492_vm11, %v3791_v40 }
 0x5e0   : > { %v3796_v46 = vpop.permute.xlu0 %3795 }
 0x5e1   : > { %6449 = vst.msk [vmem:[%s6184_s27 + $0x7] sm:$0xfe] %vm1497_vm12, %v3796_v46 }
 0x5e2 LB: > { %v8101_v47 = vmov 0.0|0.0   ;;  %vm8102_vm0 = vmmov 0   ;;  %v8103_v14 = vmov 0.0   ;;  %s6569_s10 = sshll.u32 %s8085_s29, 4  ;;  %s6477_s11 = sshll.u32 %s8085_s29, 2  ;;  %s8085_s29 = sphi %s9530_s29, %s3805_s29  }
 0x5e3   : > { %7687 = vmatprep.subr.bf16.mxu0 %v8101_v47  ;;  %7714 = vmatprep.subr.bf16.mxu1 %v8101_v47  ;;  %s9552_s1 = scalar_lea.vmem [#allocation3], %s6569_s10  ;;  %s6204_s12 = scalar_lea.vmem [#allocation4], %s6477_s11 }
 0x5e4   : > { %7689 = vmatpush3.bf16.msra.mxu0 %v8875_v50  ;;  %7716 = vmatpush3.bf16.msra.mxu1 %v8875_v50  ;;  %s3805_s29 = sadd.s32 1, %s8085_s29  }
 0x5e5   : > { %7690 = vmatprep.subr.bf16.mxu0 %v8101_v47  ;;  %7717 = vmatprep.subr.bf16.mxu1 %v8101_v47  ;;  %p3802_p3 = scmp.ge.s32.totalorder %s3805_s29, 4  }
 0x5e6   : > { %7200 = vmatprep.mubr.msk.f32.mxu0 %vm8102_vm0, %v8103_v14  ;;  %7245 = vmatprep.mubr.msk.f32.mxu1 %vm8102_vm0, %v8103_v14  ;;  %v6479_v13 = vld [vmem:[%s10013_s5 + $0x20] sm:$0xff] (%p3802_p3)  ;;  %v6480_v22 = vld [vmem:[%s10013_s5 + $0x28] sm:$0xff] (%p3802_p3)  ;;  %v6481_v23 = vld [vmem:[%s10013_s5 + $0x30] sm:$0xff] (%p3802_p3)  ;;  %v8104_v27 = vmov (%p3802_p3), 0.0|0.0   ;;  %vm4728_vm5 = vcmask (%p3802_p3), 261120   ;;  %s8106_s4 = smov (%p3802_p3), [#allocation5]  }
 0x5e7   :  { %v7796_v28 = vpack.c.bf16 (%p3802_p3), %v6480_v22, %v6479_v13  ;;  %v6482_v37 = vld [vmem:[%s10013_s5 + $0x38] sm:$0xff] (%p3802_p3)  ;;  %v4719_v38 = vld [vmem:[%s10013_s5 + $0x10] sm:$0xff] (%p3802_p3)  ;;  %v6505_v45 = vld [vmem:[%s10013_s5 + $0xc0] sm:$0xff] (%p3802_p3)  ;;  %s6119_s13 = sshll.u32 (%p3802_p3), %s8106_s4, 4  ;;  %vm6111_vm6 = vcmask (%p3802_p3), 74752   ;;  %s6120_s13 = int_to_ptr.vmem [resolvable:$true] %s6119_s13 }
 0x5e8   : > { %7692 = vmatpush3.bf16.msra.mxu0 %v8883_v52  ;;  %7719 = vmatpush3.bf16.msra.mxu1 %v8883_v52  ;;  %v6454_v15 = vld [vmem:[%s9552_s1 + $0x8] ss:$2 sm:$0xf]  ;;  %v6457_v16 = vld [vmem:[%s9552_s1 + $0x10] ss:$2 sm:$0xf]  ;;  %p8036_p5 = scmp.lt.s32.totalorder (%p3802_p3), %s6120_s13, %s6120_s13 }
 0x5e9   : > { %7693 = vmatprep.subr.bf16.mxu0 %v8101_v47  ;;  %7720 = vmatprep.subr.bf16.mxu1 %v8101_v47  ;;  %v3809_v41 = vld [vmem:[%s9552_s1] ss:$2 sm:$0xf]  ;;  %v6460_v48 = vld [vmem:[%s9552_s1 + $0x18] ss:$2 sm:$0xf] }
 0x5ea   : > { %v6468_v49 = vld [vmem:[%s9552_s1 + $0x9] ss:$2 sm:$0xf]  ;;  %v6469_v51 = vld [vmem:[%s9552_s1 + $0x11] ss:$2 sm:$0xf] }
 0x5eb   : > { %v6467_v53 = vld [vmem:[%s9552_s1 + $0x1] ss:$2 sm:$0xf]  ;;  %v6470_v55 = vld [vmem:[%s9552_s1 + $0x19] ss:$2 sm:$0xf] }
 0x5ec   : > { %7695 = vmatpush3.bf16.msra.mxu0 %v8896_v54  ;;  %7722 = vmatpush3.bf16.msra.mxu1 %v8896_v54  ;;  %v4720_v43 = vld [vmem:[%s10013_s5 + $0x18] sm:$0xff] (%p3802_p3)  ;;  %v6506_v17 = vld [vmem:[%s10013_s5 + $0xc8] sm:$0xff] (%p3802_p3)  ;;  %v6485_v19 = vld [vmem:[%s10013_s5 + $0x40] sm:$0xff] (%p3802_p3)  ;;  %s8031_s17 = scalar_lea.vmem (%p3802_p3), %s6120_s13, 32 }
 0x5ed   : > { %7696 = vmatprep.subr.bf16.mxu0 %v8101_v47  ;;  %7723 = vmatprep.subr.bf16.mxu1 %v8101_v47  ;;  %v7805_v18 = vpack.c.bf16 (%p3802_p3), %v4720_v43, %v4719_v38  ;;  %v6486_v20 = vld [vmem:[%s10013_s5 + $0x48] sm:$0xff] (%p3802_p3)  ;;  %v7832_v24 = vpack.c.bf16 (%p3802_p3), %v6506_v17, %v6505_v45  ;;  %v6507_v25 = vld [vmem:[%s10013_s5 + $0xd0] sm:$0xff] (%p3802_p3)  ;;  %v6508_v26 = vld [vmem:[%s10013_s5 + $0xd8] sm:$0xff] (%p3802_p3)  ;;  %p8032_p4 = scmp.ne.s32.totalorder (%p3802_p3), %s6120_s13, %s8031_s17  ;;  %p8037_p6 = scmp.lt.s32.totalorder (%p3802_p3), %s8031_s17, %s8031_s17 }
 0x5ee   :  { %v7808_v30 = vpack.c.bf16 (%p3802_p3), %v6486_v20, %v6485_v19  ;;  %v6487_v31 = vld [vmem:[%s10013_s5 + $0x50] sm:$0xff] (%p3802_p3)  ;;  %v6488_v32 = vld [vmem:[%s10013_s5 + $0x58] sm:$0xff] (%p3802_p3)  ;;  %v7835_v33 = vpack.c.bf16 (%p3802_p3), %v6508_v26, %v6507_v25  ;;  %v6515_v34 = vld [vmem:[%s10013_s5 + $0x100] sm:$0xff] (%p3802_p3) }
 0x5ef   : > { %7201 = vmatmul.mubr.msk.f32.vlgmr.msra.gmra.mrb[0].mxu0 %vm97_vm3, %v6454_v15  ;;  %7246 = vmatmul.mubr.msk.f32.vlgmr.msra.gmra.mrb[0].mxu1 %vm97_vm3, %v6457_v16  ;;  %v6516_v35 = vld [vmem:[%s10013_s5 + $0x108] sm:$0xff] (%p3802_p3)  ;;  %v7811_v36 = vpack.c.bf16 (%p3802_p3), %v6488_v32, %v6487_v31  ;;  %v6490_v39 = vld [vmem:[%s10013_s5 + $0x60] sm:$0xff] (%p3802_p3)  ;;  %v6547_v17 = vld [vmem:[%s10013_s5 + $0x1d0] sm:$0xff] (%p3802_p3)  ;;  %p8038_p7 = por (%p3802_p3), %p8037_p6, %p8036_p5 }
 0x5f0   : > { %7698 = vmatpush3.bf16.msra.mxu0 %v8907_v56  ;;  %7725 = vmatpush3.bf16.msra.mxu1 %v8907_v56  ;;  %v6491_v40 = vld [vmem:[%s10013_s5 + $0x68] sm:$0xff] (%p3802_p3)  ;;  %v6510_v22 = vld [vmem:[%s10013_s5 + $0xe0] sm:$0xff] (%p3802_p3) }
 0x5f1   : > { %7699 = vmatprep.subr.bf16.mxu0 %v8101_v47  ;;  %7726 = vmatprep.subr.bf16.mxu1 %v8101_v47  ;;  %v6520_v38 = vld [vmem:[%s10013_s5 + $0x120] sm:$0xff] (%p3802_p3)  ;;  %v6521_v43 = vld [vmem:[%s10013_s5 + $0x128] sm:$0xff] (%p3802_p3)  ;;  %p8039_p8 = pnand (%p3802_p3), %p8038_p7, %p8032_p4 }
 0x5f2   : > { %7215 = vmatprep.mubr.msk.f32.mxu0 %vm8102_vm0, %v8103_v14  ;;  %7260 = vmatprep.mubr.msk.f32.mxu1 %vm8102_vm0, %v8103_v14  ;;  %v7850_v20 = vpack.c.bf16 (%p3802_p3), %v6521_v43, %v6520_v38 }
 0x5f4   : > { %7701 = vmatpush3.bf16.msra.mxu0 %v8918_v58  ;;  %7728 = vmatpush3.bf16.msra.mxu1 %v8918_v58 }
 0x5f5   : > { %7702 = vmatprep.subr.bf16.mxu0 %v8101_v47  ;;  %7729 = vmatprep.subr.bf16.mxu1 %v8101_v47 }
 0x5f8   : > { %7704 = vmatpush3.bf16.msra.mxu0 %v8930_v59  ;;  %7731 = vmatpush3.bf16.msra.mxu1 %v8930_v59 }
 0x5f9   : > { %7705 = vmatprep.subr.bf16.mxu0 %v8101_v47  ;;  %7732 = vmatprep.subr.bf16.mxu1 %v8101_v47 }
 0x5fb   : > { %7216 = vmatmul.mubr.msk.f32.vlgmr.msra.gmra.mrb[0].mxu0 %vm97_vm3, %v3809_v41  ;;  %7261 = vmatmul.mubr.msk.f32.vlgmr.msra.gmra.mrb[0].mxu1 %vm97_vm3, %v6454_v15  ;;  %v6518_v15 = vld [vmem:[%s10013_s5 + $0x118] sm:$0xff] (%p3802_p3)  ;;  %v7814_v41 = vpack.c.bf16 (%p3802_p3), %v6491_v40, %v6490_v39  ;;  %v6540_v39 = vld [vmem:[%s10013_s5 + $0x1a0] sm:$0xff] (%p3802_p3)  ;;  %v6541_v40 = vld [vmem:[%s10013_s5 + $0x1a8] sm:$0xff] (%p3802_p3) }
 0x5fc   : > { %7707 = vmatpush3.bf16.msra.mxu0 %v8939_v61  ;;  %7734 = vmatpush3.bf16.msra.mxu1 %v8939_v61 }
 0x5fd   : > { %7708 = vmatprep.subr.bf16.mxu0 %v8101_v47  ;;  %7735 = vmatprep.subr.bf16.mxu1 %v8101_v47 }
 0x5fe   : > { %7230 = vmatprep.mubr.msk.f32.mxu0 %vm8102_vm0, %v8103_v14  ;;  %7275 = vmatprep.mubr.msk.f32.mxu1 %vm8102_vm0, %v8103_v14 }
 0x600   : > { %7710 = vmatpush3.bf16.msra.mxu0 %v8949_v62  ;;  %7737 = vmatpush3.bf16.msra.mxu1 %v8949_v62 }
 0x601   : > { %7711 = vmatprep.subr.bf16.mxu0 %v8101_v47  ;;  %7738 = vmatprep.subr.bf16.mxu1 %v8101_v47 }
 0x604   : > { %7713 = vmatpush3.bf16.msra.mxu0 %v8961_v63  ;;  %7740 = vmatpush3.bf16.msra.mxu1 %v8961_v63 }
 0x605   : > { %7741 = vmatprep.subr.bf16.mxu0 %v8101_v47  ;;  %7768 = vmatprep.subr.bf16.mxu1 %v8101_v47 }
 0x607   : > { %7231 = vmatmul.mubr.msk.f32.vlgmr.msra.gmra.mrb[0].mxu0 %vm97_vm3, %v6457_v16  ;;  %7276 = vmatmul.mubr.msk.f32.vlgmr.msra.gmra.mrb[0].mxu1 %vm97_vm3, %v6460_v48  ;;  %v6492_v48 = vld [vmem:[%s10013_s5 + $0x70] sm:$0xff] (%p3802_p3) }
 0x608   : > { %7743 = vmatpush3.bf16.msra.mxu0 %v8875_v50  ;;  %7770 = vmatpush3.bf16.msra.mxu1 %v8875_v50  ;;  %v4717_v50 = vld [vmem:[%s10013_s5] sm:$0xff] (%p3802_p3) }
 0x609   : > { %7744 = vmatprep.subr.bf16.mxu0 %v8101_v47  ;;  %7771 = vmatprep.subr.bf16.mxu1 %v8101_v47 }
 0x60a   : > { %7290 = vmatprep.mubr.msk.f32.mxu0 %vm8102_vm0, %v8103_v14  ;;  %7335 = vmatprep.mubr.msk.f32.mxu1 %vm8102_vm0, %v8103_v14 }
 0x60c   : > { %7746 = vmatpush3.bf16.msra.mxu0 %v8883_v52  ;;  %7773 = vmatpush3.bf16.msra.mxu1 %v8883_v52  ;;  %v4718_v52 = vld [vmem:[%s10013_s5 + $0x8] sm:$0xff] (%p3802_p3) }
 0x60d   : > { %7747 = vmatprep.subr.bf16.mxu0 %v8101_v47  ;;  %7774 = vmatprep.subr.bf16.mxu1 %v8101_v47 }
 0x610   : > { %7749 = vmatpush3.bf16.msra.mxu0 %v8896_v54  ;;  %7776 = vmatpush3.bf16.msra.mxu1 %v8896_v54  ;;  %v6495_v54 = vld [vmem:[%s10013_s5 + $0x80] sm:$0xff] (%p3802_p3) }
 0x611   : > { %7750 = vmatprep.subr.bf16.mxu0 %v8101_v47  ;;  %7777 = vmatprep.subr.bf16.mxu1 %v8101_v47 }
 0x613   : > { %7291 = vmatmul.mubr.msk.f32.vlgmr.msra.gmra.mrb[2].mxu0 %vm97_vm3, %v6468_v49  ;;  %7336 = vmatmul.mubr.msk.f32.vlgmr.msra.gmra.mrb[2].mxu1 %vm97_vm3, %v6469_v51 }
 0x614   : > { %7752 = vmatpush3.bf16.msra.mxu0 %v8907_v56  ;;  %7779 = vmatpush3.bf16.msra.mxu1 %v8907_v56  ;;  %v6496_v56 = vld [vmem:[%s10013_s5 + $0x88] sm:$0xff] (%p3802_p3) }
 0x615   : > { %7753 = vmatprep.subr.bf16.mxu0 %v8101_v47  ;;  %7780 = vmatprep.subr.bf16.mxu1 %v8101_v47 }
 0x616   : > { %7305 = vmatprep.mubr.msk.f32.mxu0 %vm8102_vm0, %v8103_v14  ;;  %7350 = vmatprep.mubr.msk.f32.mxu1 %vm8102_vm0, %v8103_v14 }
 0x618   : > { %7755 = vmatpush3.bf16.msra.mxu0 %v8918_v58  ;;  %7782 = vmatpush3.bf16.msra.mxu1 %v8918_v58 }
 0x619   : > { %7756 = vmatprep.subr.bf16.mxu0 %v8101_v47  ;;  %7783 = vmatprep.subr.bf16.mxu1 %v8101_v47 }
 0x61c   : > { %7758 = vmatpush3.bf16.msra.mxu0 %v8930_v59  ;;  %7785 = vmatpush3.bf16.msra.mxu1 %v8930_v59  ;;  %v7802_v59 = vpack.c.bf16 (%p3802_p3), %v4718_v52, %v4717_v50  ;;  %v6538_v50 = vld [vmem:[%s10013_s5 + $0x198] sm:$0xff] (%p3802_p3) }
 0x61d   : > { %7759 = vmatprep.subr.bf16.mxu0 %v8101_v47  ;;  %7786 = vmatprep.subr.bf16.mxu1 %v8101_v47 }
 0x61f   : > { %7306 = vmatmul.mubr.msk.f32.vlgmr.msra.gmra.mrb[2].mxu0 %vm97_vm3, %v6467_v53  ;;  %7351 = vmatmul.mubr.msk.f32.vlgmr.msra.gmra.mrb[2].mxu1 %vm97_vm3, %v6468_v49  ;;  %v6493_v49 = vld [vmem:[%s10013_s5 + $0x78] sm:$0xff] (%p3802_p3)  ;;  %v6525_v53 = vld [vmem:[%s10013_s5 + $0x140] sm:$0xff] (%p3802_p3) }
 0x620   : > { %7761 = vmatpush3.bf16.msra.mxu0 %v8939_v61  ;;  %7788 = vmatpush3.bf16.msra.mxu1 %v8939_v61  ;;  %v7820_v61 = vpack.c.bf16 (%p3802_p3), %v6496_v56, %v6495_v54  ;;  %v6512_v56 = vld [vmem:[%s10013_s5 + $0xf0] sm:$0xff] (%p3802_p3) }
 0x621   : > { %7762 = vmatprep.subr.bf16.mxu0 %v8101_v47  ;;  %7789 = vmatprep.subr.bf16.mxu1 %v8101_v47 }
 0x622   : > { %7320 = vmatprep.mubr.msk.f32.mxu0 %vm8102_vm0, %v8103_v14  ;;  %7365 = vmatprep.mubr.msk.f32.mxu1 %vm8102_vm0, %v8103_v14  ;;  %v6517_v14 = vld [vmem:[%s10013_s5 + $0x110] sm:$0xff] (%p3802_p3) }
 0x624   : > { %7764 = vmatpush3.bf16.msra.mxu0 %v8949_v62  ;;  %7791 = vmatpush3.bf16.msra.mxu1 %v8949_v62  ;;  %v6497_v62 = vld [vmem:[%s10013_s5 + $0x90] sm:$0xff] (%p3802_p3) }
 0x625   : > { %7765 = vmatprep.subr.bf16.mxu0 %v8101_v47  ;;  %7792 = vmatprep.subr.bf16.mxu1 %v8101_v47  ;;  %v7844_v47 = vpack.c.bf16 (%p3802_p3), %v6516_v35, %v6515_v34  ;;  %v6532_v34 = vld [vmem:[%s10013_s5 + $0x170] sm:$0xff] (%p3802_p3)  ;;  %v6533_v35 = vld [vmem:[%s10013_s5 + $0x178] sm:$0xff] (%p3802_p3) }
 0x628   : > { %7767 = vmatpush3.bf16.msra.mxu0 %v8961_v63  ;;  %7794 = vmatpush3.bf16.msra.mxu1 %v8961_v63  ;;  %v6498_v63 = vld [vmem:[%s10013_s5 + $0x98] sm:$0xff] (%p3802_p3) }
 0x629   :  { %7795 = vmatprep.subr.bf16.mxu1 (%p3802_p3), %v8104_v27  ;;  %7819 = vmatprep.subr.bf16.mxu0 (%p3802_p3), %v8104_v27  ;;  %v7823_v44 = vpack.c.bf16 (%p3802_p3), %v6498_v63, %v6497_v62  ;;  %v6546_v62 = vld [vmem:[%s10013_s5 + $0x1c8] sm:$0xff] (%p3802_p3) }
 0x62b   : > { %7321 = vmatmul.mubr.msk.f32.vlgmr.msra.gmra.mrb[2].mxu0 %vm97_vm3, %v6469_v51  ;;  %7366 = vmatmul.mubr.msk.f32.vlgmr.msra.gmra.mrb[2].mxu1 %vm97_vm3, %v6470_v55  ;;  %vm8105_vm3 = vmmov (%p3802_p3), 0   ;;  %v7847_v51 = vpack.c.bf16 (%p3802_p3), %v6518_v15, %v6517_v14  ;;  %v6526_v55 = vld [vmem:[%s10013_s5 + $0x148] sm:$0xff] (%p3802_p3)  ;;  %v6542_v14 = vld [vmem:[%s10013_s5 + $0x1b0] sm:$0xff] (%p3802_p3)  ;;  %v6543_v15 = vld [vmem:[%s10013_s5 + $0x1b8] sm:$0xff] (%p3802_p3) }
 0x62c   :  { %7376 = vmatprep.mubr.msk.f32.mxu1 (%p3802_p3), %vm8105_vm3, %v8088_v6  ;;  %7420 = vmatprep.mubr.msk.f32.mxu0 (%p3802_p3), %vm8105_vm3, %v8088_v6 }
 0x62d   :  { %7797 = vmatpush3.bf16.msra.mxu1 (%p3802_p3), %v7796_v28  ;;  %7821 = vmatpush3.bf16.msra.mxu0 (%p3802_p3), %v7820_v61  ;;  %v6545_v61 = vld [vmem:[%s10013_s5 + $0x1c0] sm:$0xff] (%p3802_p3) }
 0x62e   :  { %7798 = vmatprep.subr.bf16.mxu1 (%p3802_p3), %v8104_v27  ;;  %7822 = vmatprep.subr.bf16.mxu0 (%p3802_p3), %v8104_v27  ;;  %v7880_v45 = vpack.c.bf16 (%p3802_p3), %v6546_v62, %v6545_v61 }
 0x631   :  { %7824 = vmatpush3.bf16.msra.mxu0 (%p3802_p3), %v7823_v44 }
 0x632   :  { %7831 = vmatprep.subr.bf16.mxu0 (%p3802_p3), %v8104_v27 }
 0x6da   : > { %v4037_v57 = vpop.f32.mrb[0].mxu0  ;;  %v4251_v60 = vpop.f32.mrb[0].mxu1 }
 0x6db   : > { %v4256_v0 = vmax.f32 %v4037_v57, %v4251_v60  ;;  %v7232_v1 = vpop.f32.mrb[1].mxu0  ;;  %v7277_v2 = vpop.f32.mrb[1].mxu1  ;;  %v7817_v57 = vpack.c.bf16 (%p3802_p3), %v6493_v49, %v6492_v48  ;;  %v6500_v60 = vld [vmem:[%s10013_s5 + $0xa0] sm:$0xff] (%p3802_p3)  ;;  %v6551_v48 = vld [vmem:[%s10013_s5 + $0x1e8] sm:$0xff] (%p3802_p3) }
 0x6dc   :  { %v7856_v2 = vpack.c.bf16 (%p3802_p3), %v6526_v55, %v6525_v53  ;;  %v6552_v53 = vld [vmem:[%s10013_s5 + $0x1f0] sm:$0xff] (%p3802_p3)  ;;  %v6553_v55 = vld [vmem:[%s10013_s5 + $0x1f8] sm:$0xff] (%p3802_p3) }
 0x6fe   : > { %v4480_v3 = vpop.f32.mrb[2].mxu0  ;;  %v4694_v4 = vpop.f32.mrb[2].mxu1 }
 0x6ff   : > { %v4699_v5 = vmax.f32 %v4480_v3, %v4694_v4  ;;  %v7322_v7 = vpop.f32.mrb[3].mxu0  ;;  %v7367_v8 = vpop.f32.mrb[3].mxu1  ;;  %v6527_v3 = vld [vmem:[%s10013_s5 + $0x150] sm:$0xff] (%p3802_p3)  ;;  %v6528_v4 = vld [vmem:[%s10013_s5 + $0x158] sm:$0xff] (%p3802_p3) }
 0x700   :  { %v6502_v8 = vld [vmem:[%s10013_s5 + $0xb0] sm:$0xff] (%p3802_p3) }
 0x701   : > { %v4700_v9 = vmax.f32 %v4256_v0, %v4699_v5  ;;  %v6501_v0 = vld [vmem:[%s10013_s5 + $0xa8] sm:$0xff] (%p3802_p3) }
 0x702   :  { %3804 = sbr.rel (!%p3802_p3) target bundleno = 1506 (0x5e2), region = 189  ;;  %v7826_v7 = vpack.c.bf16 (%p3802_p3), %v6501_v0, %v6500_v60  ;;  %v6018_v0 = vld [vmem:[%s10015_s7] sm:$0xff] (%p3802_p3) }
 0x703   : > { %v4707_v10 = vadd.f32 %v8724_v42, %v4700_v9  ;;  %v7799_v42 = vpack.c.bf16 (%p3802_p3), %v6482_v37, %v6481_v23  ;;  %v6503_v9 = vld [vmem:[%s10013_s5 + $0xb8] sm:$0xff] (%p3802_p3)  ;;  %v6511_v23 = vld [vmem:[%s10013_s5 + $0xe8] sm:$0xff] (%p3802_p3) }
 0x704   :  { %v7829_v13 = vpack.c.bf16 (%p3802_p3), %v6503_v9, %v6502_v8  ;;  %v7838_v54 = vpack.c.bf16 (%p3802_p3), %v6511_v23, %v6510_v22  ;;  %v6024_v9 = vld [vmem:[%s10015_s7 + $0x30] sm:$0xff] (%p3802_p3) }
 0x705   : > { %vm4708_vm4 = vcmp.gt.f32.partialorder %v4707_v10, 0.0  ;;  %v4709_v11 = vmul.f32 0.01, %v4707_v10  ;;  %7800 = vmatpush3.bf16.msra.mxu1 (%p3802_p3), %v7799_v42  ;;  %v6537_v42 = vld [vmem:[%s10013_s5 + $0x190] sm:$0xff] (%p3802_p3) }
 0x706   :  { %7801 = vmatprep.subr.bf16.mxu1 (%p3802_p3), %v8104_v27  ;;  %v6028_v23 = vld [vmem:[%s10015_s7 + $0x50] sm:$0xff] (%p3802_p3) }
 0x707   : > { %v4710_v12 = vsel %vm4708_vm4, %v4707_v10, %v4709_v11  ;;  %v7859_v10 = vpack.c.bf16 (%p3802_p3), %v6528_v4, %v6527_v3  ;;  %v6535_v11 = vld [vmem:[%s10013_s5 + $0x180] sm:$0xff] (%p3802_p3)  ;;  %v6021_v3 = vld [vmem:[%s10015_s7 + $0x18] sm:$0xff] (%p3802_p3) }
 0x708   : > { %6478 = vst.msk [vmem:[%s6204_s12 + $0x10] sm:$0xf] %vm2412_vm15, %v4710_v12  ;;  %v6536_v12 = vld [vmem:[%s10013_s5 + $0x188] sm:$0xff] (%p3802_p3) }
 0x709   :  { %v7868_v37 = vpack.c.bf16 %v6536_v12, %v6535_v11  ;;  %v6026_v12 = vld [vmem:[%s10015_s7 + $0x40] sm:$0xff] }
 0x70f   :  { %v4722_v58 = vld [vmem:[#allocation4 + $0x1] ss:$16 sm:$0x3]  ;;  %v5038_v21 = vld [vmem:[#allocation4 + $0x4] ss:$16 sm:$0x3] }
 0x710   :  { %7377 = vmatmul.mubr.msk.f32.vlgmr.msra.gmra.mrb[0].mxu1 %vm4728_vm5, %v4722_v58  ;;  %v4716_v29 = vld [vmem:[#allocation4] ss:$16 sm:$0x3]  ;;  %7421 = vmatmul.mubr.msk.f32.vlgmr.msra.gmra.mrb[0].mxu0 %vm4728_vm5, %v5038_v21  ;;  %v5200_v46 = vld [vmem:[#allocation4 + $0x6] ss:$16 sm:$0x3] }
 0x711   :  { %7803 = vmatpush3.bf16.msra.mxu1 %v7802_v59  ;;  %7387 = vmatprep.mubr.msk.f32.mxu1 %vm8105_vm3, %v8088_v6  ;;  %v4876_v16 = vld [vmem:[#allocation4 + $0x2] ss:$16 sm:$0x3]  ;;  %v5362_v1 = vld [vmem:[#allocation4 + $0x8] ss:$16 sm:$0x3]  ;;  %v7871_v59 = vpack.c.bf16 %v6538_v50, %v6537_v42 }
 0x712   :  { %7804 = vmatprep.subr.bf16.mxu1 %v8104_v27  ;;  %7833 = vmatpush3.bf16.msra.mxu0 %v7832_v24  ;;  %v4957_v5 = vld [vmem:[#allocation4 + $0x3] ss:$16 sm:$0x3]  ;;  %v5524_v28 = vld [vmem:[#allocation4 + $0xa] ss:$16 sm:$0x3] }
 0x713   :  { %7442 = vmatprep.mubr.msk.f32.mxu0 %vm8105_vm3, %v8088_v6  ;;  %7834 = vmatprep.subr.bf16.mxu0 %v8104_v27  ;;  %v5119_v52 = vld [vmem:[#allocation4 + $0x5] ss:$16 sm:$0x3]  ;;  %v6513_v58 = vld [vmem:[%s10013_s5 + $0xf8] sm:$0xff]  ;;  %v6031_v50 = vld [vmem:[%s10015_s7 + $0x68] sm:$0xff] }
 0x714   :  { %v7841_v63 = vpack.c.bf16 %v6513_v58, %v6512_v56  ;;  %v5686_v44 = vld [vmem:[#allocation4 + $0xc] ss:$16 sm:$0x3]  ;;  %v5281_v19 = vld [vmem:[#allocation4 + $0x7] ss:$16 sm:$0x3] }
 0x715   :  { %7806 = vmatpush3.bf16.msra.mxu1 %v7805_v18  ;;  %v6548_v18 = vld [vmem:[%s10013_s5 + $0x1d8] sm:$0xff]  ;;  %v6522_v21 = vld [vmem:[%s10013_s5 + $0x130] sm:$0xff]  ;;  %v6030_v42 = vld [vmem:[%s10015_s7 + $0x60] sm:$0xff] }
 0x716   :  { %7807 = vmatprep.subr.bf16.mxu1 %v8104_v27  ;;  %7836 = vmatpush3.bf16.msra.mxu0 %v7835_v33  ;;  %v6523_v24 = vld [vmem:[%s10013_s5 + $0x138] sm:$0xff]  ;;  %v7883_v25 = vpack.c.bf16 %v6548_v18, %v6547_v17 }
 0x717   :  { %7843 = vmatprep.subr.bf16.mxu0 %v8104_v27  ;;  %v7853_v26 = vpack.c.bf16 %v6523_v24, %v6522_v21  ;;  %v5848_v31 = vld [vmem:[#allocation4 + $0xe] ss:$16 sm:$0x3]  ;;  %v5443_v32 = vld [vmem:[#allocation4 + $0x9] ss:$16 sm:$0x3] }
 0x718   :  { %7388 = vmatmul.mubr.msk.f32.vlgmr.msra.gmra.mrb[2].mxu1 %vm4728_vm5, %v4716_v29  ;;  %v6530_v29 = vld [vmem:[%s10013_s5 + $0x160] sm:$0xff]  ;;  %v5767_v49 = vld [vmem:[#allocation4 + $0xd] ss:$16 sm:$0x3] }
 0x719   :  { %7809 = vmatpush3.bf16.msra.mxu1 %v7808_v30  ;;  %7398 = vmatprep.mubr.msk.f32.mxu1 %vm8105_vm3, %v8088_v6  ;;  %v6531_v30 = vld [vmem:[%s10013_s5 + $0x168] sm:$0xff]  ;;  %v6033_v56 = vld [vmem:[%s10015_s7 + $0x78] sm:$0xff] }
 0x71a   :  { %7810 = vmatprep.subr.bf16.mxu1 %v8104_v27  ;;  %7443 = vmatmul.mubr.msk.f32.vlgmr.msra.gmra.mrb[2].mxu0 %vm4728_vm5, %v5200_v46  ;;  %v7862_v33 = vpack.c.bf16 %v6531_v30, %v6530_v29  ;;  %v5605_v46 = vld [vmem:[#allocation4 + $0xb] ss:$16 sm:$0x3]  ;;  %v5929_v60 = vld [vmem:[#allocation4 + $0xf] ss:$16 sm:$0x3] }
 0x71b   :  { %7845 = vmatpush3.bf16.msra.mxu0 %v7844_v47  ;;  %7464 = vmatprep.mubr.msk.f32.mxu0 %vm8105_vm3, %v8088_v6  ;;  %v7874_v47 = vpack.c.bf16 %v6541_v40, %v6540_v39 }
 0x71c   :  { %7846 = vmatprep.subr.bf16.mxu0 %v8104_v27 }
 0x71d   :  { %7812 = vmatpush3.bf16.msra.mxu1 %v7811_v36  ;;  %v7865_v36 = vpack.c.bf16 %v6533_v35, %v6532_v34 }
 0x71e   :  { %7813 = vmatprep.subr.bf16.mxu1 %v8104_v27 }
 0x71f   :  { %7848 = vmatpush3.bf16.msra.mxu0 %v7847_v51 }
 0x720   :  { %7399 = vmatmul.mubr.msk.f32.vlgmr.msra.gmra.mrb[4].mxu1 %vm4728_vm5, %v4876_v16  ;;  %7855 = vmatprep.subr.bf16.mxu0 %v8104_v27  ;;  %v7877_v16 = vpack.c.bf16 %v6543_v15, %v6542_v14 }
 0x721   :  { %7815 = vmatpush3.bf16.msra.mxu1 %v7814_v41  ;;  %7409 = vmatprep.mubr.msk.f32.mxu1 %vm8105_vm3, %v8088_v6  ;;  %v6550_v41 = vld [vmem:[%s10013_s5 + $0x1e0] sm:$0xff] }
 0x722   :  { %7816 = vmatprep.subr.bf16.mxu1 %v8104_v27  ;;  %7465 = vmatmul.mubr.msk.f32.vlgmr.msra.gmra.mrb[4].mxu0 %vm4728_vm5, %v5362_v1  ;;  %v7886_v51 = vpack.c.bf16 %v6551_v48, %v6550_v41  ;;  %v6019_v1 = vld [vmem:[%s10015_s7 + $0x8] sm:$0xff] }
 0x723   :  { %7857 = vmatpush3.bf16.msra.mxu0 %v7856_v2  ;;  %7486 = vmatprep.mubr.msk.f32.mxu0 %vm8105_vm3, %v8088_v6  ;;  %v7892_v2 = vpack.c.bf16 %v6019_v1, %v6018_v0 }
 0x724   :  { %7858 = vmatprep.subr.bf16.mxu0 %v8104_v27 }
 0x725   :  { %7818 = vmatpush3.bf16.msra.mxu1 %v7817_v57  ;;  %v7889_v57 = vpack.c.bf16 %v6553_v55, %v6552_v53 }
 0x726   :  { %7825 = vmatprep.subr.bf16.mxu1 %v8104_v27 }
 0x727   :  { %7860 = vmatpush3.bf16.msra.mxu0 %v7859_v10  ;;  %v6025_v10 = vld [vmem:[%s10015_s7 + $0x38] sm:$0xff] }
 0x728   :  { %7410 = vmatmul.mubr.msk.f32.vlgmr.msra.gmra.mrb[6].mxu1 %vm4728_vm5, %v4957_v5  ;;  %7867 = vmatprep.subr.bf16.mxu0 %v8104_v27  ;;  %v6022_v5 = vld [vmem:[%s10015_s7 + $0x20] sm:$0xff]  ;;  %v7901_v11 = vpack.c.bf16 %v6025_v10, %v6024_v9 }
 0x729   :  { %7827 = vmatpush3.bf16.msra.mxu1 %v7826_v7  ;;  %7431 = vmatprep.mubr.msk.f32.mxu1 %vm8105_vm3, %v8088_v6  ;;  %v6023_v7 = vld [vmem:[%s10015_s7 + $0x28] sm:$0xff]  ;;  %v6556_v10 = vld [vmem:[%s10016_s8] ss:$0 sm:$0xff] }
 0x72a   :  { %7828 = vmatprep.subr.bf16.mxu1 %v8104_v27  ;;  %7487 = vmatmul.mubr.msk.f32.vlgmr.msra.gmra.mrb[6].mxu0 %vm4728_vm5, %v5524_v28  ;;  %v7898_v8 = vpack.c.bf16 %v6023_v7, %v6022_v5  ;;  %v6029_v28 = vld [vmem:[%s10015_s7 + $0x58] sm:$0xff] }
 0x72b   :  { %7869 = vmatpush3.bf16.msra.mxu0 %v7868_v37  ;;  %7508 = vmatprep.mubr.msk.f32.mxu0 %vm8105_vm3, %v8088_v6  ;;  %v7907_v37 = vpack.c.bf16 %v6029_v28, %v6028_v23 }
 0x72c   :  { %7870 = vmatprep.subr.bf16.mxu0 %v8104_v27 }
 0x72d   :  { %7830 = vmatpush3.bf16.msra.mxu1 %v7829_v13  ;;  %v6027_v13 = vld [vmem:[%s10015_s7 + $0x48] sm:$0xff] }
 0x72e   :  { %7837 = vmatprep.subr.bf16.mxu1 %v8104_v27  ;;  %v7904_v22 = vpack.c.bf16 %v6027_v13, %v6026_v12 }
 0x72f   :  { %7872 = vmatpush3.bf16.msra.mxu0 %v7871_v59 }
 0x730   :  { %7432 = vmatmul.mubr.msk.f32.vlgmr.msra.gmra.mrb[8].mxu1 %vm4728_vm5, %v5119_v52  ;;  %7879 = vmatprep.subr.bf16.mxu0 %v8104_v27  ;;  %v7910_v52 = vpack.c.bf16 %v6031_v50, %v6030_v42 }
 0x731   :  { %7839 = vmatpush3.bf16.msra.mxu1 %v7838_v54  ;;  %7453 = vmatprep.mubr.msk.f32.mxu1 %vm8105_vm3, %v8088_v6  ;;  %v6032_v54 = vld [vmem:[%s10015_s7 + $0x70] sm:$0xff] }
 0x732   :  { %7840 = vmatprep.subr.bf16.mxu1 %v8104_v27  ;;  %7509 = vmatmul.mubr.msk.f32.vlgmr.msra.gmra.mrb[8].mxu0 %vm4728_vm5, %v5686_v44  ;;  %v7913_v58 = vpack.c.bf16 %v6033_v56, %v6032_v54 }
 0x733   :  { %7881 = vmatpush3.bf16.msra.mxu0 %v7880_v45  ;;  %7530 = vmatprep.mubr.msk.f32.mxu0 %vm8105_vm3, %v8088_v6 }
 0x734   :  { %7882 = vmatprep.subr.bf16.mxu0 %v8104_v27 }
 0x735   :  { %7842 = vmatpush3.bf16.msra.mxu1 %v7841_v63 }
 0x736   :  { %7849 = vmatprep.subr.bf16.mxu1 %v8104_v27 }
 0x737   :  { %7884 = vmatpush3.bf16.msra.mxu0 %v7883_v25 }
 0x738   :  { %7454 = vmatmul.mubr.msk.f32.vlgmr.msra.gmra.mrb[10].mxu1 %vm4728_vm5, %v5281_v19  ;;  %7891 = vmatprep.subr.bf16.mxu0 %v8104_v27 }
 0x739   :  { %7851 = vmatpush3.bf16.msra.mxu1 %v7850_v20  ;;  %7475 = vmatprep.mubr.msk.f32.mxu1 %vm8105_vm3, %v8088_v6 }
 0x73a   :  { %7852 = vmatprep.subr.bf16.mxu1 %v8104_v27  ;;  %7531 = vmatmul.mubr.msk.f32.vlgmr.msra.gmra.mrb[10].mxu0 %vm4728_vm5, %v5848_v31 }
 0x73b   :  { %7576 = vmatprep.mubr.msk.f32.mxu0 %vm8105_vm3, %v8088_v6  ;;  %7893 = vmatpush3.bf16.msra.mxu0 %v7892_v2 }
 0x73c   :  { %7894 = vmatprep.subr.bf16.mxu0 %v8104_v27 }
 0x73d   :  { %7854 = vmatpush3.bf16.msra.mxu1 %v7853_v26 }
 0x73e   :  { %7861 = vmatprep.subr.bf16.mxu1 %v8104_v27 }
 0x740   :  { %7476 = vmatmul.mubr.msk.f32.vlgmr.msra.gmra.mrb[12].mxu1 %vm4728_vm5, %v5443_v32 }
 0x741   :  { %7863 = vmatpush3.bf16.msra.mxu1 %v7862_v33  ;;  %7497 = vmatprep.mubr.msk.f32.mxu1 %vm8105_vm3, %v8088_v6 }
 0x742   :  { %7864 = vmatprep.subr.bf16.mxu1 %v8104_v27 }
 0x745   :  { %7866 = vmatpush3.bf16.msra.mxu1 %v7865_v36 }
 0x746   :  { %7873 = vmatprep.subr.bf16.mxu1 %v8104_v27 }
 0x748   :  { %7498 = vmatmul.mubr.msk.f32.vlgmr.msra.gmra.mrb[14].mxu1 %vm4728_vm5, %v5605_v46 }
 0x749   :  { %7875 = vmatpush3.bf16.msra.mxu1 %v7874_v47  ;;  %7519 = vmatprep.mubr.msk.f32.mxu1 %vm8105_vm3, %v8088_v6 }
 0x74a   :  { %7876 = vmatprep.subr.bf16.mxu1 %v8104_v27 }
 0x74d   :  { %7878 = vmatpush3.bf16.msra.mxu1 %v7877_v16 }
 0x74e   :  { %7885 = vmatprep.subr.bf16.mxu1 %v8104_v27 }
 0x750   :  { %7520 = vmatmul.mubr.msk.f32.vlgmr.msra.gmra.mrb[16].mxu1 %vm4728_vm5, %v5767_v49 }
 0x751   :  { %7887 = vmatpush3.bf16.msra.mxu1 %v7886_v51  ;;  %7541 = vmatprep.mubr.msk.f32.mxu1 %vm8105_vm3, %v8088_v6  ;;  %v6020_v6 = vld [vmem:[%s10015_s7 + $0x10] sm:$0xff] }
 0x752   :  { %7888 = vmatprep.subr.bf16.mxu1 %v8104_v27  ;;  %v7895_v4 = vpack.c.bf16 %v6021_v3, %v6020_v6 }
 0x754   :  { %7896 = vmatpush3.bf16.msra.mxu0 %v7895_v4  ;;  %v6555_v4 = vld [vmem:[%s10014_s6] ss:$0 sm:$0xff] }
 0x755   :  { %7890 = vmatpush3.bf16.msra.mxu1 %v7889_v57  ;;  %7897 = vmatprep.subr.bf16.mxu0 %v8104_v27 }
 0x758   :  { %7542 = vmatmul.mubr.msk.f32.vlgmr.msra.gmra.mrb[18].mxu1 %vm4728_vm5, %v5929_v60  ;;  %7899 = vmatpush3.bf16.msra.mxu0 %v7898_v8 }
 0x759   :  { %7900 = vmatprep.subr.bf16.mxu0 %v8104_v27 }
 0x75c   :  { %7902 = vmatpush3.bf16.msra.mxu0 %v7901_v11 }
 0x75d   :  { %7903 = vmatprep.subr.bf16.mxu0 %v8104_v27 }
 0x760   :  { %7905 = vmatpush3.bf16.msra.mxu0 %v7904_v22 }
 0x761   :  { %7906 = vmatprep.subr.bf16.mxu0 %v8104_v27 }
 0x764   :  { %7908 = vmatpush3.bf16.msra.mxu0 %v7907_v37 }
 0x765   :  { %7909 = vmatprep.subr.bf16.mxu0 %v8104_v27 }
 0x768   :  { %7911 = vmatpush3.bf16.msra.mxu0 %v7910_v52 }
 0x769   :  { %7912 = vmatprep.subr.bf16.mxu0 %v8104_v27 }
 0x76c   :  { %7914 = vmatpush3.bf16.msra.mxu0 %v7913_v58 }
 0x7e3   :  { %v4798_v59 = vpop.f32.mrb[0].mxu1  ;;  %v5113_v62 = vpop.f32.mrb[0].mxu0 }
 0x7e4   :  { %v7378_v61 = vpop.f32.mrb[1].mxu1  ;;  %v7422_v63 = vpop.f32.mrb[1].mxu0 }
 0x7eb   :  { %v4871_v38 = vpop.f32.mrb[2].mxu1 }
 0x7ec   :  { %v4872_v43 = vadd.f32 %v4871_v38, %v4798_v59  ;;  %v7389_v44 = vpop.f32.mrb[3].mxu1 }
 0x7ed   :  { %v5275_v45 = vpop.f32.mrb[2].mxu0 }
 0x7ee   :  { %v7444_v17 = vpop.f32.mrb[3].mxu0 }
 0x7f3   :  { %v4951_v27 = vpop.f32.mrb[4].mxu1 }
 0x7f4   :  { %v4955_v18 = vadd.f32 %v4951_v27, %v4872_v43  ;;  %v7400_v19 = vpop.f32.mrb[5].mxu1 }
 0x7f5   :  { %v5437_v20 = vpop.f32.mrb[4].mxu0 }
 0x7f6   :  { %v7466_v21 = vpop.f32.mrb[5].mxu0 }
 0x7fb   :  { %v5032_v24 = vpop.f32.mrb[6].mxu1 }
 0x7fc   :  { %v5036_v25 = vadd.f32 %v5032_v24, %v4955_v18  ;;  %v7411_v26 = vpop.f32.mrb[7].mxu1 }
 0x7fd   :  { %v5599_v30 = vpop.f32.mrb[6].mxu0 }
 0x7fe   :  { %v5117_v29 = vadd.f32 %v5113_v62, %v5036_v25  ;;  %v7488_v31 = vpop.f32.mrb[7].mxu0 }
 0x803   :  { %v5194_v32 = vpop.f32.mrb[8].mxu1 }
 0x804   :  { %v5198_v33 = vadd.f32 %v5194_v32, %v5117_v29  ;;  %v7433_v34 = vpop.f32.mrb[9].mxu1 }
 0x805   :  { %v5761_v36 = vpop.f32.mrb[8].mxu0 }
 0x806   :  { %v5279_v35 = vadd.f32 %v5275_v45, %v5198_v33  ;;  %v7510_v39 = vpop.f32.mrb[9].mxu0 }
 0x80b   :  { %v5356_v40 = vpop.f32.mrb[10].mxu1 }
 0x80c   :  { %v5360_v46 = vadd.f32 %v5356_v40, %v5279_v35  ;;  %v7455_v47 = vpop.f32.mrb[11].mxu1 }
 0x80d   :  { %v5923_v15 = vpop.f32.mrb[10].mxu0 }
 0x80e   :  { %v5441_v14 = vadd.f32 %v5437_v20, %v5360_v46  ;;  %v7532_v16 = vpop.f32.mrb[11].mxu0 }
 0x813   :  { %v5518_v41 = vpop.f32.mrb[12].mxu1 }
 0x814   :  { %v5522_v48 = vadd.f32 %v5518_v41, %v5441_v14  ;;  %v7477_v49 = vpop.f32.mrb[13].mxu1 }
 0x816   :  { %v5603_v51 = vadd.f32 %v5599_v30, %v5522_v48 }
 0x81b   :  { %v5680_v53 = vpop.f32.mrb[14].mxu1 }
 0x81c   :  { %v5684_v55 = vadd.f32 %v5680_v53, %v5603_v51  ;;  %v7499_v57 = vpop.f32.mrb[15].mxu1 }
 0x81e   :  { %v5765_v60 = vadd.f32 %v5761_v36, %v5684_v55 }
 0x823   :  { %v5842_v0 = vpop.f32.mrb[16].mxu1 }
 0x824   :  { %v5846_v1 = vadd.f32 %v5842_v0, %v5765_v60  ;;  %v7521_v2 = vpop.f32.mrb[17].mxu1 }
 0x826   :  { %v5927_v6 = vadd.f32 %v5923_v15, %v5846_v1 }
 0x82b   :  { %v6004_v3 = vpop.f32.mrb[18].mxu1 }
 0x82c   :  { %v6008_v5 = vadd.f32 %v6004_v3, %v5927_v6  ;;  %v7543_v7 = vpop.f32.mrb[19].mxu1 }
 0x82e   :  { %v6016_v8 = vadd.f32 %v6555_v4, %v6008_v5 }
 0x830   :  { %v6017_v9 = vmax.f32 %v6016_v8, 0.0 }
 0x832   :  { %7577 = vmatmul.mubr.f32.vlgmr.msra.gmra.mrb[12].mxu0 %v6017_v9 }
 0x905   :  { %v6107_v11 = vpop.f32.mrb[12].mxu0 }
 0x906   :  { %v6108_v12 = vadd.f32 %v6556_v10, %v6107_v11  ;;  %v7578_v13 = vpop.f32.mrb[13].mxu0 }
 0x908   :  { %6112 = vst.msk [vmem:[#allocation5] sm:$0x3] %vm6111_vm6, %v6108_v12 }
 0x909   :  { %8042 = shalt.err (!%p8039_p8)
}
 0x90a   :  { %s8043_s19 = scalar_lea.hbm %s10017_s9, 32 }
 0x90b   :  { %p8044_p9 = scmp.ne.s32.totalorder %s10017_s9, %s8043_s19  ;;  %p8047_p10 = scmp.lt.u32.totalorder %s8043_s19, %s10017_s9 }
 0x90d   :  { %p8049_p11 = pnand %p8047_p10, %p8044_p9 }
 0x90f   :  { %8052 = shalt.err (!%p8049_p11)
}
 0x910   :  { %6122 = dma.vmem_to_hbm [thread:$0]  %s6120_s13, 32, %s10017_s9, [#allocation6]  }
 0x911   :  { %8069 = dma.done.wait [#allocation6], 32  }
 0x912   :  { %8070 = vsyncadd [#allocation6], 4294967264 }
 0x913   :  { %6126 = vsyncpa [#allocation6], 1 }

</bundles_post_ra>
